<compile_context>
chip_gen: v5e
topology: v5e:2x2
jax: 0.10.0
libtpu: 0.0.40
codegen_flags: <defaults>
</compile_context>

<pallas_src>
import functools

import jax
import jax.numpy as jnp
import numpy as np
from jax import lax
from jax.experimental import pallas as pl
from jax.experimental.pallas import tpu as pltpu


# ----------------------------------------------------------------------------
# Fused kernel: one (batch, row-tile) of the whole encoder.
# ----------------------------------------------------------------------------
def _fused_kernel(corr_ref, fpat_ref, flow_ref,
                  wc1_ref, bc1_ref, wc2_ref, bc2_ref,
                  wf1_ref, bf1_ref, wf2_ref, bf2_ref,
                  wo_ref, bo_ref, o_ref, *, TH, H, W):
    # corr_ref: (1, H+4, W, Cin)   corr padded by 2 rows each side (zero)
    # fpat_ref: (1, H+4, W, 98)    im2col'd flow patches (7x7 taps x 2 ch), +2-row halo
    # flow_ref: (1, TH, W, 2)      raw flow rows of this tile (for the final concat)
    # weights : (Kin, Cout) matmul-ready; wo/bo padded to 128 output channels
    # o_ref   : (1, TH, W, 128)
    t = pl.program_id(1)
    R2 = TH + 4                      # rows [r0-2, r0+TH+2)   (halo for the 3x3 layers)
    R1 = TH + 2                      # rows [r0-1, r0+TH+1)   (halo for the final conv)
    r0 = t * TH                      # first output row of this tile (global)

    row_start = r0
    if TH % 8 == 0:
        row_start = pl.multiple_of(row_start, 8)

    Cin = corr_ref.shape[-1]
    P = fpat_ref.shape[-1]           # 98
    C1 = wc1_ref.shape[1]            # 64
    CO = wo_ref.shape[1]             # 128 (padded)
    f32 = jnp.float32

    # Row-validity masks: zero out rows that fall outside the image.  This reproduces
    # PyTorch's zero padding of the *intermediate* activations (convc2/convf2/conv pads).
    rows2 = lax.broadcasted_iota(jnp.int32, (R2, 1, 1), 0) + (r0 - 2)
    mask2 = jnp.logical_and(rows2 >= 0, rows2 < H)
    rows1 = lax.broadcasted_iota(jnp.int32, (R1, 1, 1), 0) + (r0 - 1)
    mask1 = jnp.logical_and(rows1 >= 0, rows1 < H)

    zc = jnp.zeros((R2, 1, C1), f32)          # 1-col zero pad for the 3x3 convs

    # ---- convc1 (1x1) + ReLU over extended rows --------------------------------
    corr_x = corr_ref[0, pl.ds(row_start, R2), :, :].reshape(R2 * W, Cin)
    c1 = jnp.dot(corr_x, wc1_ref[...], preferred_element_type=f32) + bc1_ref[...]
    c1 = jnp.maximum(c1, 0.0).reshape(R2, W, C1)
    c1 = jnp.where(mask2, c1, 0.0)
    c1p = jnp.concatenate([zc, c1, zc], axis=1)          # (R2, W+2, 64)

    # ---- convc2 (3x3) as a single im2col matmul (contraction depth 576) --------
    pc2 = jnp.concatenate(
        [c1p[dy:dy + R1, dx:dx + W, :] for dy in range(3) for dx in range(3)],
        axis=-1).reshape(R1 * W, 9 * C1)
    cor = jnp.dot(pc2, wc2_ref[...], preferred_element_type=f32) + bc2_ref[...]
    cor = jnp.maximum(cor, 0.0).reshape(R1, W, C1)
    cor = jnp.where(mask1, cor, 0.0)

    # ---- convf1 (7x7, Cin=2) as ONE depth-98 matmul via wrapper im2col ---------
    fp = fpat_ref[0, pl.ds(row_start, R2), :, :].reshape(R2 * W, P)
    f1 = jnp.dot(fp, wf1_ref[...], preferred_element_type=f32) + bf1_ref[...]
    f1 = jnp.maximum(f1, 0.0).reshape(R2, W, C1)
    f1 = jnp.where(mask2, f1, 0.0)
    f1p = jnp.concatenate([zc, f1, zc], axis=1)          # (R2, W+2, 64)

    # ---- convf2 (3x3) im2col matmul ---------------------------------------------
    pf2 = jnp.concatenate(
        [f1p[dy:dy + R1, dx:dx + W, :] for dy in range(3) for dx in range(3)],
        axis=-1).reshape(R1 * W, 9 * C1)
    flo = jnp.dot(pf2, wf2_ref[...], preferred_element_type=f32) + bf2_ref[...]
    flo = jnp.maximum(flo, 0.0).reshape(R1, W, C1)
    flo = jnp.where(mask1, flo, 0.0)

    # ---- concat(cor, flo) + final 3x3 conv (Cout padded 126 -> 128) -------------
    cf = jnp.concatenate([cor, flo], axis=-1)            # (R1, W, 128)
    zo = jnp.zeros((R1, 1, 2 * C1), f32)
    cfp = jnp.concatenate([zo, cf, zo], axis=1)          # (R1, W+2, 128)
    po = jnp.concatenate(
        [cfp[dy:dy + TH, dx:dx + W, :] for dy in range(3) for dx in range(3)],
        axis=-1).reshape(TH * W, 9 * 2 * C1)             # (TH*W, 1152)
    y = jnp.dot(po, wo_ref[...], preferred_element_type=f32) + bo_ref[...]
    y = jnp.maximum(y, 0.0)                              # channels 126/127 are exactly 0

    # ---- fuse torch.cat([out, flow], dim=1) into the 128-lane store -------------
    flow_t = flow_ref[0].reshape(TH * W, 2)
    flow_pad = jnp.concatenate(
        [jnp.zeros((TH * W, CO - 2), f32), flow_t], axis=-1)
    o_ref[...] = (y + flow_pad).reshape(1, TH, W, CO)


# ----------------------------------------------------------------------------
# Wrapper: NCHW in / NCHW out, like the PyTorch module.
# ----------------------------------------------------------------------------
def basic_motion_encoder(flow_nchw, corr_nchw, params, *, tile_h=8):
    B, two, H, W = flow_nchw.shape
    assert two == 2
    Cin = corr_nchw.shape[1]

    flow = jnp.transpose(flow_nchw, (0, 2, 3, 1)).astype(jnp.float32)   # NHWC
    corr = jnp.transpose(corr_nchw, (0, 2, 3, 1)).astype(jnp.float32)   # NHWC

    # Row-tile height: multiple of 8 when possible; fall back to whole image.
    TH = tile_h if (H % tile_h == 0 and H >= tile_h) else H
    T = H // TH

    # ---- weights: torch OIHW -> matmul-ready (K*K*Cin, Cout) ----
    wc1 = jnp.transpose(params["convc1_w"].reshape(64, Cin), (1, 0))     # (Cin, 64)
    bc1 = params["convc1_b"].reshape(1, 64)
    wc2 = jnp.transpose(params["convc2_w"], (2, 3, 1, 0)).reshape(9 * 64, 64)
    bc2 = params["convc2_b"].reshape(1, 64)
    wf1 = jnp.transpose(params["convf1_w"], (2, 3, 1, 0)).reshape(49 * 2, 64)
    bf1 = params["convf1_b"].reshape(1, 64)
    wf2 = jnp.transpose(params["convf2_w"], (2, 3, 1, 0)).reshape(9 * 64, 64)
    bf2 = params["convf2_b"].reshape(1, 64)
    wo = jnp.transpose(params["conv_w"], (2, 3, 1, 0)).reshape(9 * 128, 126)
    wo = jnp.pad(wo, ((0, 0), (0, 2)))                                   # -> (1152, 128)
    bo = jnp.pad(params["conv_b"], (0, 2)).reshape(1, 128)

    # ---- inputs ----
    # corr with a 2-row zero halo (its values at out-of-image rows are masked in-kernel).
    corr_p = jnp.pad(corr, ((0, 0), (2, 2), (0, 0), (0, 0)))             # (B, H+4, W, Cin)
    # im2col the 7x7 Cin=2 conv input in the wrapper (layout plumbing): pad flow by
    # (5 rows, 3 cols) and stack the 49 shifted windows -> (B, H+4, W, 98).
    flow_p5 = jnp.pad(flow, ((0, 0), (5, 5), (3, 3), (0, 0)))
    fpat = jnp.concatenate(
        [flow_p5[:, dy:dy + H + 4, dx:dx + W, :] for dy in range(7) for dx in range(7)],
        axis=-1)                                                          # (B, H+4, W, 98)

    Hp = H + 4
    kernel = functools.partial(_fused_kernel, TH=TH, H=H, W=W)
    out_nhwc = pl.pallas_call(
        kernel,
        out_shape=jax.ShapeDtypeStruct((B, H, W, 128), jnp.float32),
        grid=(B, T),
        in_specs=[
            pl.BlockSpec((1, Hp, W, Cin), lambda b, t: (b, 0, 0, 0)),    # corr (+halo)
            pl.BlockSpec((1, Hp, W, 98), lambda b, t: (b, 0, 0, 0)),     # flow patches
            pl.BlockSpec((1, TH, W, 2), lambda b, t: (b, t, 0, 0)),      # raw flow tile
            pl.BlockSpec((Cin, 64), lambda b, t: (0, 0)),
            pl.BlockSpec((1, 64), lambda b, t: (0, 0)),
            pl.BlockSpec((9 * 64, 64), lambda b, t: (0, 0)),
            pl.BlockSpec((1, 64), lambda b, t: (0, 0)),
            pl.BlockSpec((98, 64), lambda b, t: (0, 0)),
            pl.BlockSpec((1, 64), lambda b, t: (0, 0)),
            pl.BlockSpec((9 * 64, 64), lambda b, t: (0, 0)),
            pl.BlockSpec((1, 64), lambda b, t: (0, 0)),
            pl.BlockSpec((9 * 128, 128), lambda b, t: (0, 0)),
            pl.BlockSpec((1, 128), lambda b, t: (0, 0)),
        ],
        out_specs=pl.BlockSpec((1, TH, W, 128), lambda b, t: (b, t, 0, 0)),
        compiler_params=pltpu.CompilerParams(
            dimension_semantics=("parallel", "parallel"),
            vmem_limit_bytes=32 * 1024 * 1024),
    )(corr_p, fpat, flow, wc1, bc1, wc2, bc2, wf1, bf1, wf2, bf2, wo, bo)

    return jnp.transpose(out_nhwc, (0, 3, 1, 2))                          # NCHW


# ----------------------------------------------------------------------------
# Pure-JAX reference (lax conv) for correctness check
# ----------------------------------------------------------------------------
def _ref_conv_relu(x_nhwc, w_oihw, b, pad):
    w_hwio = jnp.transpose(w_oihw, (2, 3, 1, 0))
    y = lax.conv_general_dilated(
        x_nhwc, w_hwio, window_strides=(1, 1),
        padding=((pad, pad), (pad, pad)),
        dimension_numbers=("NHWC", "HWIO", "NHWC"))
    return jnp.maximum(y + b[None, None, None, :], 0.0)


def _ref_forward(flow_nchw, corr_nchw, p):
    flow = jnp.transpose(flow_nchw, (0, 2, 3, 1))
    corr = jnp.transpose(corr_nchw, (0, 2, 3, 1))
    cor = _ref_conv_relu(corr, p["convc1_w"], p["convc1_b"], 0)
    cor = _ref_conv_relu(cor, p["convc2_w"], p["convc2_b"], 1)
    flo = _ref_conv_relu(flow, p["convf1_w"], p["convf1_b"], 3)
    flo = _ref_conv_relu(flo, p["convf2_w"], p["convf2_b"], 1)
    out = _ref_conv_relu(jnp.concatenate([cor, flo], -1), p["conv_w"], p["conv_b"], 1)
    out = jnp.concatenate([out, flow], -1)
    return jnp.transpose(out, (0, 3, 1, 2))


# ----------------------------------------------------------------------------
# Deterministic parameter init (shapes from the module's __init__)
# ----------------------------------------------------------------------------
def init_params(key, corr_levels=4, corr_radius=3):
    cor_planes = corr_levels * (2 * corr_radius + 1)  # 28
    shapes = {
        "convc1_w": (64, cor_planes, 1, 1), "convc1_b": (64,),
        "convc2_w": (64, 64, 3, 3),         "convc2_b": (64,),
        "convf1_w": (64, 2, 7, 7),          "convf1_b": (64,),
        "convf2_w": (64, 64, 3, 3),         "convf2_b": (64,),
        "conv_w":   (128 - 2, 64 + 64, 3, 3), "conv_b": (128 - 2,),
    }
    params = {}
    for name, shape in sorted(shapes.items()):
        key, sub = jax.random.split(key)
        fan_in = int(np.prod(shape[1:])) if len(shape) == 4 else 64
        params[name] = (jax.random.normal(sub, shape, jnp.float32)
                        * (0.5 / np.sqrt(fan_in)))
    return params, cor_planes


if __name__ == "__main__":
    key = jax.random.PRNGKey(0)
    params, cor_planes = init_params(key, corr_levels=4, corr_radius=3)

    B, H, W = 2, 16, 16
    k1, k2 = jax.random.split(jax.random.PRNGKey(0))
    flow = jax.random.normal(k1, (B, 2, H, W), jnp.float32)               # NCHW
    corr = jax.random.normal(k2, (B, cor_planes, H, W), jnp.float32)      # NCHW

    fwd = jax.jit(basic_motion_encoder)
    out = jax.block_until_ready(fwd(flow, corr, params))

    ref = jax.block_until_ready(_ref_forward(flow, corr, params))
    assert out.shape == (B, 128, H, W), out.shape
    np.testing.assert_allclose(np.asarray(out), np.asarray(ref),
                               rtol=1e-3, atol=1e-3)
    print("KERNEL_OK")
</pallas_src>

<mosaic_0001>
module attributes {stable_mosaic.version = 11 : i64} {
  func.func @_fused_kernel(%arg0: i32, %arg1: i32, %arg2: memref<1x20x16x28xf32, #tpu.memory_space<vmem>>, %arg3: memref<1x20x16x98xf32, #tpu.memory_space<vmem>>, %arg4: memref<1x8x16x2xf32, #tpu.memory_space<vmem>>, %arg5: memref<28x64xf32, #tpu.memory_space<vmem>>, %arg6: memref<1x64xf32, #tpu.memory_space<vmem>>, %arg7: memref<576x64xf32, #tpu.memory_space<vmem>>, %arg8: memref<1x64xf32, #tpu.memory_space<vmem>>, %arg9: memref<98x64xf32, #tpu.memory_space<vmem>>, %arg10: memref<1x64xf32, #tpu.memory_space<vmem>>, %arg11: memref<576x64xf32, #tpu.memory_space<vmem>>, %arg12: memref<1x64xf32, #tpu.memory_space<vmem>>, %arg13: memref<1152x128xf32, #tpu.memory_space<vmem>>, %arg14: memref<1x128xf32, #tpu.memory_space<vmem>>, %arg15: memref<1x8x16x128xf32, #tpu.memory_space<vmem>>) attributes {dimension_semantics = [#tpu.dimension_semantics<parallel>, #tpu.dimension_semantics<parallel>], iteration_bounds = array<i64: 2, 2>, scalar_prefetch = 0 : i64, scratch_operands = 0 : i64, tpu.core_type = #tpu.core_type<tc>, window_params = [{transform_indices = @transform_0, window_bounds = array<i64: 1, 20, 16, 28>}, {transform_indices = @transform_1, window_bounds = array<i64: 1, 20, 16, 98>}, {transform_indices = @transform_2, window_bounds = array<i64: 1, 8, 16, 2>}, {pipeline_mode = #tpu.pipeline_mode<synchronous>, transform_indices = @transform_3, window_bounds = array<i64: 28, 64>}, {pipeline_mode = #tpu.pipeline_mode<synchronous>, transform_indices = @transform_4, window_bounds = array<i64: 1, 64>}, {pipeline_mode = #tpu.pipeline_mode<synchronous>, transform_indices = @transform_5, window_bounds = array<i64: 576, 64>}, {pipeline_mode = #tpu.pipeline_mode<synchronous>, transform_indices = @transform_6, window_bounds = array<i64: 1, 64>}, {pipeline_mode = #tpu.pipeline_mode<synchronous>, transform_indices = @transform_7, window_bounds = array<i64: 98, 64>}, {pipeline_mode = #tpu.pipeline_mode<synchronous>, transform_indices = @transform_8, window_bounds = array<i64: 1, 64>}, {pipeline_mode = #tpu.pipeline_mode<synchronous>, transform_indices = @transform_9, window_bounds = array<i64: 576, 64>}, {pipeline_mode = #tpu.pipeline_mode<synchronous>, transform_indices = @transform_10, window_bounds = array<i64: 1, 64>}, {pipeline_mode = #tpu.pipeline_mode<synchronous>, transform_indices = @transform_11, window_bounds = array<i64: 1152, 128>}, {pipeline_mode = #tpu.pipeline_mode<synchronous>, transform_indices = @transform_12, window_bounds = array<i64: 1, 128>}, {transform_indices = @transform_13, window_bounds = array<i64: 1, 8, 16, 128>}]} {
    %c8_i32 = arith.constant 8 : i32
    %0 = arith.muli %arg1, %c8_i32 : i32
    %1 = tpu.assume_multiple %0, 8 : i32
    %2 = tpu.iota {dimensions = array<i32: 0>} : vector<12x1x1xi32>
    %c2_i32 = arith.constant 2 : i32
    %3 = arith.subi %0, %c2_i32 : i32
    %4 = vector.broadcast %3 : i32 to vector<12x1x1xi32>
    %5 = arith.addi %2, %4 : vector<12x1x1xi32>
    %c0_i32 = arith.constant 0 : i32
    %6 = vector.broadcast %c0_i32 : i32 to vector<12x1x1xi32>
    %7 = arith.cmpi sge, %5, %6 : vector<12x1x1xi32>
    %c16_i32 = arith.constant 16 : i32
    %8 = vector.broadcast %c16_i32 : i32 to vector<12x1x1xi32>
    %9 = arith.cmpi slt, %5, %8 : vector<12x1x1xi32>
    %10 = arith.andi %7, %9 : vector<12x1x1xi1>
    %11 = tpu.iota {dimensions = array<i32: 0>} : vector<10x1x1xi32>
    %c1_i32 = arith.constant 1 : i32
    %12 = arith.subi %0, %c1_i32 : i32
    %13 = vector.broadcast %12 : i32 to vector<10x1x1xi32>
    %14 = arith.addi %11, %13 : vector<10x1x1xi32>
    %c0_i32_0 = arith.constant 0 : i32
    %15 = vector.broadcast %c0_i32_0 : i32 to vector<10x1x1xi32>
    %16 = arith.cmpi sge, %14, %15 : vector<10x1x1xi32>
    %c16_i32_1 = arith.constant 16 : i32
    %17 = vector.broadcast %c16_i32_1 : i32 to vector<10x1x1xi32>
    %18 = arith.cmpi slt, %14, %17 : vector<10x1x1xi32>
    %19 = arith.andi %16, %18 : vector<10x1x1xi1>
    %cst = arith.constant 0.000000e+00 : f32
    %20 = vector.broadcast %cst : f32 to vector<12x1x64xf32>
    %c0 = arith.constant 0 : index
    %21 = arith.index_cast %1 : i32 to index
    %c0_2 = arith.constant 0 : index
    %c0_3 = arith.constant 0 : index
    %22 = vector.load %arg2[%c0, %21, %c0_2, %c0_3] : memref<1x20x16x28xf32, #tpu.memory_space<vmem>>, vector<1x12x16x28xf32>
    %23 = vector.shape_cast %22 : vector<1x12x16x28xf32> to vector<12x16x28xf32>
    %24 = vector.shape_cast %23 : vector<12x16x28xf32> to vector<192x28xf32>
    %c0_4 = arith.constant 0 : index
    %c0_5 = arith.constant 0 : index
    %25 = vector.load %arg5[%c0_4, %c0_5] : memref<28x64xf32, #tpu.memory_space<vmem>>, vector<28x64xf32>
    %cst_6 = arith.constant dense<0.000000e+00> : vector<192x64xf32>
    %26 = tpu.matmul %24, %25, %cst_6 {dimension_numbers = #tpu.dot_dimension_numbers<[1], [0], [0], [1], [0, 0, 1, 1], [], []>} : vector<192x28xf32>, vector<28x64xf32>, vector<192x64xf32> -> vector<192x64xf32>
    %c0_7 = arith.constant 0 : index
    %c0_8 = arith.constant 0 : index
    %27 = vector.load %arg6[%c0_7, %c0_8] : memref<1x64xf32, #tpu.memory_space<vmem>>, vector<1x64xf32>
    %28 = vector.broadcast %27 : vector<1x64xf32> to vector<192x64xf32>
    %29 = arith.addf %26, %28 : vector<192x64xf32>
    %cst_9 = arith.constant 0.000000e+00 : f32
    %30 = vector.broadcast %cst_9 : f32 to vector<192x64xf32>
    %31 = arith.maximumf %29, %30 : vector<192x64xf32>
    %32 = vector.shape_cast %31 : vector<192x64xf32> to vector<12x16x64xf32>
    %cst_10 = arith.constant 0.000000e+00 : f32
    %33 = vector.shape_cast %10 : vector<12x1x1xi1> to vector<12x1x1xi1>
    %34 = vector.broadcast %33 : vector<12x1x1xi1> to vector<12x16x64xi1>
    %35 = vector.broadcast %cst_10 : f32 to vector<12x16x64xf32>
    %36 = arith.select %34, %32, %35 : vector<12x16x64xi1>, vector<12x16x64xf32>
    %37 = tpu.concatenate %20, %36, %20 in 1 : vector<12x1x64xf32>, vector<12x16x64xf32>, vector<12x1x64xf32> -> vector<12x18x64xf32>
    %38 = vector.extract_strided_slice %37 {offsets = [0, 0, 0], sizes = [10, 16, 64], strides = [1, 1, 1]} : vector<12x18x64xf32> to vector<10x16x64xf32>
    %39 = vector.extract_strided_slice %37 {offsets = [0, 1, 0], sizes = [10, 16, 64], strides = [1, 1, 1]} : vector<12x18x64xf32> to vector<10x16x64xf32>
    %40 = vector.extract_strided_slice %37 {offsets = [0, 2, 0], sizes = [10, 16, 64], strides = [1, 1, 1]} : vector<12x18x64xf32> to vector<10x16x64xf32>
    %41 = vector.extract_strided_slice %37 {offsets = [1, 0, 0], sizes = [10, 16, 64], strides = [1, 1, 1]} : vector<12x18x64xf32> to vector<10x16x64xf32>
    %42 = vector.extract_strided_slice %37 {offsets = [1, 1, 0], sizes = [10, 16, 64], strides = [1, 1, 1]} : vector<12x18x64xf32> to vector<10x16x64xf32>
    %43 = vector.extract_strided_slice %37 {offsets = [1, 2, 0], sizes = [10, 16, 64], strides = [1, 1, 1]} : vector<12x18x64xf32> to vector<10x16x64xf32>
    %44 = vector.extract_strided_slice %37 {offsets = [2, 0, 0], sizes = [10, 16, 64], strides = [1, 1, 1]} : vector<12x18x64xf32> to vector<10x16x64xf32>
    %45 = vector.extract_strided_slice %37 {offsets = [2, 1, 0], sizes = [10, 16, 64], strides = [1, 1, 1]} : vector<12x18x64xf32> to vector<10x16x64xf32>
    %46 = vector.extract_strided_slice %37 {offsets = [2, 2, 0], sizes = [10, 16, 64], strides = [1, 1, 1]} : vector<12x18x64xf32> to vector<10x16x64xf32>
    %47 = tpu.concatenate %38, %39, %40, %41, %42, %43, %44, %45, %46 in 2 : vector<10x16x64xf32>, vector<10x16x64xf32>, vector<10x16x64xf32>, vector<10x16x64xf32>, vector<10x16x64xf32>, vector<10x16x64xf32>, vector<10x16x64xf32>, vector<10x16x64xf32>, vector<10x16x64xf32> -> vector<10x16x576xf32>
    %48 = vector.shape_cast %47 : vector<10x16x576xf32> to vector<160x576xf32>
    %c0_11 = arith.constant 0 : index
    %c0_12 = arith.constant 0 : index
    %49 = vector.load %arg7[%c0_11, %c0_12] : memref<576x64xf32, #tpu.memory_space<vmem>>, vector<576x64xf32>
    %cst_13 = arith.constant dense<0.000000e+00> : vector<160x64xf32>
    %50 = tpu.matmul %48, %49, %cst_13 {dimension_numbers = #tpu.dot_dimension_numbers<[1], [0], [0], [1], [0, 0, 1, 1], [], []>} : vector<160x576xf32>, vector<576x64xf32>, vector<160x64xf32> -> vector<160x64xf32>
    %c0_14 = arith.constant 0 : index
    %c0_15 = arith.constant 0 : index
    %51 = vector.load %arg8[%c0_14, %c0_15] : memref<1x64xf32, #tpu.memory_space<vmem>>, vector<1x64xf32>
    %52 = vector.broadcast %51 : vector<1x64xf32> to vector<160x64xf32>
    %53 = arith.addf %50, %52 : vector<160x64xf32>
    %cst_16 = arith.constant 0.000000e+00 : f32
    %54 = vector.broadcast %cst_16 : f32 to vector<160x64xf32>
    %55 = arith.maximumf %53, %54 : vector<160x64xf32>
    %56 = vector.shape_cast %55 : vector<160x64xf32> to vector<10x16x64xf32>
    %cst_17 = arith.constant 0.000000e+00 : f32
    %57 = vector.shape_cast %19 : vector<10x1x1xi1> to vector<10x1x1xi1>
    %58 = vector.broadcast %57 : vector<10x1x1xi1> to vector<10x16x64xi1>
    %59 = vector.broadcast %cst_17 : f32 to vector<10x16x64xf32>
    %60 = arith.select %58, %56, %59 : vector<10x16x64xi1>, vector<10x16x64xf32>
    %c0_18 = arith.constant 0 : index
    %61 = arith.index_cast %1 : i32 to index
    %c0_19 = arith.constant 0 : index
    %c0_20 = arith.constant 0 : index
    %62 = vector.load %arg3[%c0_18, %61, %c0_19, %c0_20] : memref<1x20x16x98xf32, #tpu.memory_space<vmem>>, vector<1x12x16x98xf32>
    %63 = vector.shape_cast %62 : vector<1x12x16x98xf32> to vector<12x16x98xf32>
    %64 = vector.shape_cast %63 : vector<12x16x98xf32> to vector<192x98xf32>
    %c0_21 = arith.constant 0 : index
    %c0_22 = arith.constant 0 : index
    %65 = vector.load %arg9[%c0_21, %c0_22] : memref<98x64xf32, #tpu.memory_space<vmem>>, vector<98x64xf32>
    %cst_23 = arith.constant dense<0.000000e+00> : vector<192x64xf32>
    %66 = tpu.matmul %64, %65, %cst_23 {dimension_numbers = #tpu.dot_dimension_numbers<[1], [0], [0], [1], [0, 0, 1, 1], [], []>} : vector<192x98xf32>, vector<98x64xf32>, vector<192x64xf32> -> vector<192x64xf32>
    %c0_24 = arith.constant 0 : index
    %c0_25 = arith.constant 0 : index
    %67 = vector.load %arg10[%c0_24, %c0_25] : memref<1x64xf32, #tpu.memory_space<vmem>>, vector<1x64xf32>
    %68 = vector.broadcast %67 : vector<1x64xf32> to vector<192x64xf32>
    %69 = arith.addf %66, %68 : vector<192x64xf32>
    %cst_26 = arith.constant 0.000000e+00 : f32
    %70 = vector.broadcast %cst_26 : f32 to vector<192x64xf32>
    %71 = arith.maximumf %69, %70 : vector<192x64xf32>
    %72 = vector.shape_cast %71 : vector<192x64xf32> to vector<12x16x64xf32>
    %cst_27 = arith.constant 0.000000e+00 : f32
    %73 = vector.shape_cast %10 : vector<12x1x1xi1> to vector<12x1x1xi1>
    %74 = vector.broadcast %73 : vector<12x1x1xi1> to vector<12x16x64xi1>
    %75 = vector.broadcast %cst_27 : f32 to vector<12x16x64xf32>
    %76 = arith.select %74, %72, %75 : vector<12x16x64xi1>, vector<12x16x64xf32>
    %77 = tpu.concatenate %20, %76, %20 in 1 : vector<12x1x64xf32>, vector<12x16x64xf32>, vector<12x1x64xf32> -> vector<12x18x64xf32>
    %78 = vector.extract_strided_slice %77 {offsets = [0, 0, 0], sizes = [10, 16, 64], strides = [1, 1, 1]} : vector<12x18x64xf32> to vector<10x16x64xf32>
    %79 = vector.extract_strided_slice %77 {offsets = [0, 1, 0], sizes = [10, 16, 64], strides = [1, 1, 1]} : vector<12x18x64xf32> to vector<10x16x64xf32>
    %80 = vector.extract_strided_slice %77 {offsets = [0, 2, 0], sizes = [10, 16, 64], strides = [1, 1, 1]} : vector<12x18x64xf32> to vector<10x16x64xf32>
    %81 = vector.extract_strided_slice %77 {offsets = [1, 0, 0], sizes = [10, 16, 64], strides = [1, 1, 1]} : vector<12x18x64xf32> to vector<10x16x64xf32>
    %82 = vector.extract_strided_slice %77 {offsets = [1, 1, 0], sizes = [10, 16, 64], strides = [1, 1, 1]} : vector<12x18x64xf32> to vector<10x16x64xf32>
    %83 = vector.extract_strided_slice %77 {offsets = [1, 2, 0], sizes = [10, 16, 64], strides = [1, 1, 1]} : vector<12x18x64xf32> to vector<10x16x64xf32>
    %84 = vector.extract_strided_slice %77 {offsets = [2, 0, 0], sizes = [10, 16, 64], strides = [1, 1, 1]} : vector<12x18x64xf32> to vector<10x16x64xf32>
    %85 = vector.extract_strided_slice %77 {offsets = [2, 1, 0], sizes = [10, 16, 64], strides = [1, 1, 1]} : vector<12x18x64xf32> to vector<10x16x64xf32>
    %86 = vector.extract_strided_slice %77 {offsets = [2, 2, 0], sizes = [10, 16, 64], strides = [1, 1, 1]} : vector<12x18x64xf32> to vector<10x16x64xf32>
    %87 = tpu.concatenate %78, %79, %80, %81, %82, %83, %84, %85, %86 in 2 : vector<10x16x64xf32>, vector<10x16x64xf32>, vector<10x16x64xf32>, vector<10x16x64xf32>, vector<10x16x64xf32>, vector<10x16x64xf32>, vector<10x16x64xf32>, vector<10x16x64xf32>, vector<10x16x64xf32> -> vector<10x16x576xf32>
    %88 = vector.shape_cast %87 : vector<10x16x576xf32> to vector<160x576xf32>
    %c0_28 = arith.constant 0 : index
    %c0_29 = arith.constant 0 : index
    %89 = vector.load %arg11[%c0_28, %c0_29] : memref<576x64xf32, #tpu.memory_space<vmem>>, vector<576x64xf32>
    %cst_30 = arith.constant dense<0.000000e+00> : vector<160x64xf32>
    %90 = tpu.matmul %88, %89, %cst_30 {dimension_numbers = #tpu.dot_dimension_numbers<[1], [0], [0], [1], [0, 0, 1, 1], [], []>} : vector<160x576xf32>, vector<576x64xf32>, vector<160x64xf32> -> vector<160x64xf32>
    %c0_31 = arith.constant 0 : index
    %c0_32 = arith.constant 0 : index
    %91 = vector.load %arg12[%c0_31, %c0_32] : memref<1x64xf32, #tpu.memory_space<vmem>>, vector<1x64xf32>
    %92 = vector.broadcast %91 : vector<1x64xf32> to vector<160x64xf32>
    %93 = arith.addf %90, %92 : vector<160x64xf32>
    %cst_33 = arith.constant 0.000000e+00 : f32
    %94 = vector.broadcast %cst_33 : f32 to vector<160x64xf32>
    %95 = arith.maximumf %93, %94 : vector<160x64xf32>
    %96 = vector.shape_cast %95 : vector<160x64xf32> to vector<10x16x64xf32>
    %cst_34 = arith.constant 0.000000e+00 : f32
    %97 = vector.shape_cast %19 : vector<10x1x1xi1> to vector<10x1x1xi1>
    %98 = vector.broadcast %97 : vector<10x1x1xi1> to vector<10x16x64xi1>
    %99 = vector.broadcast %cst_34 : f32 to vector<10x16x64xf32>
    %100 = arith.select %98, %96, %99 : vector<10x16x64xi1>, vector<10x16x64xf32>
    %101 = tpu.concatenate %60, %100 in 2 : vector<10x16x64xf32>, vector<10x16x64xf32> -> vector<10x16x128xf32>
    %cst_35 = arith.constant 0.000000e+00 : f32
    %102 = vector.broadcast %cst_35 : f32 to vector<10x1x128xf32>
    %103 = tpu.concatenate %102, %101, %102 in 1 : vector<10x1x128xf32>, vector<10x16x128xf32>, vector<10x1x128xf32> -> vector<10x18x128xf32>
    %104 = vector.extract_strided_slice %103 {offsets = [0, 0, 0], sizes = [8, 16, 128], strides = [1, 1, 1]} : vector<10x18x128xf32> to vector<8x16x128xf32>
    %105 = vector.extract_strided_slice %103 {offsets = [0, 1, 0], sizes = [8, 16, 128], strides = [1, 1, 1]} : vector<10x18x128xf32> to vector<8x16x128xf32>
    %106 = vector.extract_strided_slice %103 {offsets = [0, 2, 0], sizes = [8, 16, 128], strides = [1, 1, 1]} : vector<10x18x128xf32> to vector<8x16x128xf32>
    %107 = vector.extract_strided_slice %103 {offsets = [1, 0, 0], sizes = [8, 16, 128], strides = [1, 1, 1]} : vector<10x18x128xf32> to vector<8x16x128xf32>
    %108 = vector.extract_strided_slice %103 {offsets = [1, 1, 0], sizes = [8, 16, 128], strides = [1, 1, 1]} : vector<10x18x128xf32> to vector<8x16x128xf32>
    %109 = vector.extract_strided_slice %103 {offsets = [1, 2, 0], sizes = [8, 16, 128], strides = [1, 1, 1]} : vector<10x18x128xf32> to vector<8x16x128xf32>
    %110 = vector.extract_strided_slice %103 {offsets = [2, 0, 0], sizes = [8, 16, 128], strides = [1, 1, 1]} : vector<10x18x128xf32> to vector<8x16x128xf32>
    %111 = vector.extract_strided_slice %103 {offsets = [2, 1, 0], sizes = [8, 16, 128], strides = [1, 1, 1]} : vector<10x18x128xf32> to vector<8x16x128xf32>
    %112 = vector.extract_strided_slice %103 {offsets = [2, 2, 0], sizes = [8, 16, 128], strides = [1, 1, 1]} : vector<10x18x128xf32> to vector<8x16x128xf32>
    %113 = tpu.concatenate %104, %105, %106, %107, %108, %109, %110, %111, %112 in 2 : vector<8x16x128xf32>, vector<8x16x128xf32>, vector<8x16x128xf32>, vector<8x16x128xf32>, vector<8x16x128xf32>, vector<8x16x128xf32>, vector<8x16x128xf32>, vector<8x16x128xf32>, vector<8x16x128xf32> -> vector<8x16x1152xf32>
    %114 = vector.shape_cast %113 : vector<8x16x1152xf32> to vector<128x1152xf32>
    %c0_36 = arith.constant 0 : index
    %c0_37 = arith.constant 0 : index
    %115 = vector.load %arg13[%c0_36, %c0_37] : memref<1152x128xf32, #tpu.memory_space<vmem>>, vector<1152x128xf32>
    %cst_38 = arith.constant dense<0.000000e+00> : vector<128x128xf32>
    %116 = tpu.matmul %114, %115, %cst_38 {dimension_numbers = #tpu.dot_dimension_numbers<[1], [0], [0], [1], [0, 0, 1, 1], [], []>} : vector<128x1152xf32>, vector<1152x128xf32>, vector<128x128xf32> -> vector<128x128xf32>
    %c0_39 = arith.constant 0 : index
    %c0_40 = arith.constant 0 : index
    %117 = vector.load %arg14[%c0_39, %c0_40] : memref<1x128xf32, #tpu.memory_space<vmem>>, vector<1x128xf32>
    %118 = vector.broadcast %117 : vector<1x128xf32> to vector<128x128xf32>
    %119 = arith.addf %116, %118 : vector<128x128xf32>
    %cst_41 = arith.constant 0.000000e+00 : f32
    %120 = vector.broadcast %cst_41 : f32 to vector<128x128xf32>
    %121 = arith.maximumf %119, %120 : vector<128x128xf32>
    %c0_42 = arith.constant 0 : index
    %c0_43 = arith.constant 0 : index
    %c0_44 = arith.constant 0 : index
    %c0_45 = arith.constant 0 : index
    %122 = vector.load %arg4[%c0_42, %c0_43, %c0_44, %c0_45] : memref<1x8x16x2xf32, #tpu.memory_space<vmem>>, vector<1x8x16x2xf32>
    %123 = vector.shape_cast %122 : vector<1x8x16x2xf32> to vector<8x16x2xf32>
    %124 = vector.shape_cast %123 : vector<8x16x2xf32> to vector<128x2xf32>
    %cst_46 = arith.constant 0.000000e+00 : f32
    %125 = vector.broadcast %cst_46 : f32 to vector<128x126xf32>
    %126 = tpu.concatenate %125, %124 in 1 : vector<128x126xf32>, vector<128x2xf32> -> vector<128x128xf32>
    %127 = arith.addf %121, %126 : vector<128x128xf32>
    %128 = vector.shape_cast %127 : vector<128x128xf32> to vector<1x8x16x128xf32>
    %c0_47 = arith.constant 0 : index
    %c0_48 = arith.constant 0 : index
    %c0_49 = arith.constant 0 : index
    %c0_50 = arith.constant 0 : index
    %129 = vector.load %arg15[%c0_47, %c0_48, %c0_49, %c0_50] : memref<1x8x16x128xf32, #tpu.memory_space<vmem>>, vector<1x8x16x128xf32>
    tpu.vector_store %arg15[%c0_47, %c0_48, %c0_49, %c0_50], %128 {strides = array<i32>} : memref<1x8x16x128xf32, #tpu.memory_space<vmem>>, vector<1x8x16x128xf32>,
    return
  }
  func.func @transform_0(%arg0: i32, %arg1: i32) -> (i32, i32, i32, i32) {
    %c0_i32 = arith.constant 0 : i32
    %c0_i32_0 = arith.constant 0 : i32
    %c0_i32_1 = arith.constant 0 : i32
    %c0_i32_2 = arith.constant 0 : i32
    return %arg0, %c0_i32, %c0_i32_0, %c0_i32_1 : i32, i32, i32, i32
  }
  func.func @transform_1(%arg0: i32, %arg1: i32) -> (i32, i32, i32, i32) {
    %c0_i32 = arith.constant 0 : i32
    %c0_i32_0 = arith.constant 0 : i32
    %c0_i32_1 = arith.constant 0 : i32
    %c0_i32_2 = arith.constant 0 : i32
    return %arg0, %c0_i32, %c0_i32_0, %c0_i32_1 : i32, i32, i32, i32
  }
  func.func @transform_2(%arg0: i32, %arg1: i32) -> (i32, i32, i32, i32) {
    %c0_i32 = arith.constant 0 : i32
    %c0_i32_0 = arith.constant 0 : i32
    %c0_i32_1 = arith.constant 0 : i32
    return %arg0, %arg1, %c0_i32, %c0_i32_0 : i32, i32, i32, i32
  }
  func.func @transform_3(%arg0: i32, %arg1: i32) -> (i32, i32) {
    %c0_i32 = arith.constant 0 : i32
    %c0_i32_0 = arith.constant 0 : i32
    %c0_i32_1 = arith.constant 0 : i32
    return %c0_i32, %c0_i32_0 : i32, i32
  }
  func.func @transform_4(%arg0: i32, %arg1: i32) -> (i32, i32) {
    %c0_i32 = arith.constant 0 : i32
    %c0_i32_0 = arith.constant 0 : i32
    %c0_i32_1 = arith.constant 0 : i32
    return %c0_i32, %c0_i32_0 : i32, i32
  }
  func.func @transform_5(%arg0: i32, %arg1: i32) -> (i32, i32) {
    %c0_i32 = arith.constant 0 : i32
    %c0_i32_0 = arith.constant 0 : i32
    %c0_i32_1 = arith.constant 0 : i32
    return %c0_i32, %c0_i32_0 : i32, i32
  }
  func.func @transform_6(%arg0: i32, %arg1: i32) -> (i32, i32) {
    %c0_i32 = arith.constant 0 : i32
    %c0_i32_0 = arith.constant 0 : i32
    %c0_i32_1 = arith.constant 0 : i32
    return %c0_i32, %c0_i32_0 : i32, i32
  }
  func.func @transform_7(%arg0: i32, %arg1: i32) -> (i32, i32) {
    %c0_i32 = arith.constant 0 : i32
    %c0_i32_0 = arith.constant 0 : i32
    %c0_i32_1 = arith.constant 0 : i32
    return %c0_i32, %c0_i32_0 : i32, i32
  }
  func.func @transform_8(%arg0: i32, %arg1: i32) -> (i32, i32) {
    %c0_i32 = arith.constant 0 : i32
    %c0_i32_0 = arith.constant 0 : i32
    %c0_i32_1 = arith.constant 0 : i32
    return %c0_i32, %c0_i32_0 : i32, i32
  }
  func.func @transform_9(%arg0: i32, %arg1: i32) -> (i32, i32) {
    %c0_i32 = arith.constant 0 : i32
    %c0_i32_0 = arith.constant 0 : i32
    %c0_i32_1 = arith.constant 0 : i32
    return %c0_i32, %c0_i32_0 : i32, i32
  }
  func.func @transform_10(%arg0: i32, %arg1: i32) -> (i32, i32) {
    %c0_i32 = arith.constant 0 : i32
    %c0_i32_0 = arith.constant 0 : i32
    %c0_i32_1 = arith.constant 0 : i32
    return %c0_i32, %c0_i32_0 : i32, i32
  }
  func.func @transform_11(%arg0: i32, %arg1: i32) -> (i32, i32) {
    %c0_i32 = arith.constant 0 : i32
    %c0_i32_0 = arith.constant 0 : i32
    %c0_i32_1 = arith.constant 0 : i32
    return %c0_i32, %c0_i32_0 : i32, i32
  }
  func.func @transform_12(%arg0: i32, %arg1: i32) -> (i32, i32) {
    %c0_i32 = arith.constant 0 : i32
    %c0_i32_0 = arith.constant 0 : i32
    %c0_i32_1 = arith.constant 0 : i32
    return %c0_i32, %c0_i32_0 : i32, i32
  }
  func.func @transform_13(%arg0: i32, %arg1: i32) -> (i32, i32, i32, i32) {
    %c0_i32 = arith.constant 0 : i32
    %c0_i32_0 = arith.constant 0 : i32
    %c0_i32_1 = arith.constant 0 : i32
    return %arg0, %arg1, %c0_i32, %c0_i32_0 : i32, i32, i32, i32
  }
}

</mosaic_0001>

<bundles_post_ra>
// kernel: basic_motion_encoder.1
= control target key start
LH: loop header
LB: loop body
LE: loop exit
PB: predicated region body
PF: predicated region fallthrough
CT: control target
= control target key end

     0   :  { %s9340_s0 = inlined_call_operand.vmem [shape: f32[2,20,16,28], index: 0, kind: input, shape index: {}]   ;;  %s9341_s1 = inlined_call_operand.vmem [shape: f32[2,20,16,98], index: 1, kind: input, shape index: {}]   ;;  %s9342_s2 = inlined_call_operand.vmem [shape: f32[2,16,16,2], index: 2, kind: input, shape index: {}]   ;;  %s9343_s3 = inlined_call_operand.vmem [shape: f32[28,64], index: 3, kind: input, shape index: {}]   ;;  %s9344_s4 = inlined_call_operand.vmem [shape: f32[1,64], index: 4, kind: input, shape index: {}]   ;;  %s9345_s5 = inlined_call_operand.vmem [shape: f32[576,64], index: 5, kind: input, shape index: {}]   ;;  %s9346_s6 = inlined_call_operand.vmem [shape: f32[1,64], index: 6, kind: input, shape index: {}]   ;;  %s9347_s7 = inlined_call_operand.vmem [shape: f32[98,64], index: 7, kind: input, shape index: {}]   ;;  %s9348_s8 = inlined_call_operand.vmem [shape: f32[1,64], index: 8, kind: input, shape index: {}]   ;;  %s9349_s9 = inlined_call_operand.vmem [shape: f32[576,64], index: 9, kind: input, shape index: {}]   ;;  %s9350_s10 = inlined_call_operand.vmem [shape: f32[1,64], index: 10, kind: input, shape index: {}]   ;;  %s9351_s11 = inlined_call_operand.vmem [shape: f32[1152,128], index: 11, kind: input, shape index: {}]   ;;  %s9352_s12 = inlined_call_operand.vmem [shape: f32[1,128], index: 12, kind: input, shape index: {}]   ;;  %s9353_s13 = inlined_call_operand.hbm [shape: f32[2,16,16,128], index: 13, kind: output, shape index: {}]  }
   0x1   :  { %9417 = sst [smem:[#allocation99_spill]] %s9340_s0 }
   0x2   :  { %9418 = sst [smem:[#allocation100_spill]] %s9341_s1 }
   0x3   :  { %9419 = sst [smem:[#allocation101_spill]] %s9343_s3 }
   0x4   :  { %18 = vsyncpa [#allocation3], 0 }
   0x5   :  { %20 = vsyncpa [#allocation3 + $0x1], 0  ;;  %s5259_s25 = smov 0   ;;  %s5261_s26 = smov 0  }
   0x6   :  { %s5263_s27 = smov 0   ;;  %s5265_s28 = smov 0  }
   0x7   :  { %s5267_s29 = smov 0   ;;  %s5269_s30 = smov 0  }
   0x8   :  { %s5271_s14 = smov 0   ;;  %s5273_s15 = smov 0  }
   0x9 LB: > { %9420 = sst [smem:[#allocation5_spill]] %s5155_s25  ;;  %s4728_s16 = sadd.s32 4294967295, %s5183_s15   ;;  %s5183_s15 = sphi %s5273_s15, %s26_s15   ;;  %s5179_s14 = sphi %s5271_s14, %s9836_s14   ;;  %s5175_s30 = sphi %s5269_s30, %s9835_s30   ;;  %s5171_s29 = sphi %s5267_s29, %s9834_s29   ;;  %s5167_s28 = sphi %s5265_s28, %s9833_s28   ;;  %s5163_s27 = sphi %s5263_s27, %s9839_s27   ;;  %s5159_s26 = sphi %s5261_s26, %s9838_s26   ;;  %s5155_s25 = sphi %s5259_s25, %s9837_s25  }
   0xa   : > { %9421 = sst [smem:[#allocation6_spill]] %s5175_s30  ;;  %s4729_s17 = sadd.s32 4294967294, %s5183_s15  }
   0xb   : > { %9422 = sst [smem:[#allocation7_spill]] %s5179_s14  ;;  %s35_s18 = sadd.s32 1, %s5175_s30 }
   0xc   : > { %p36_p0 = scmp.ge.s32.totalorder %s35_s18, 2  ;;  %s38_s19 = sadd.s32 1, %s5179_s14 }
   0xd   : > { %p347_p1 = scmp.ne.s32.totalorder %s5163_s27, %s5159_s26  ;;  %p348_p2 = scmp.eq.s32.totalorder %s4728_s16, 3 }
   0xe   : > { %s9841_s18 = smov (%p36_p0, %s35_s18), 0  ;;  %s9843_s19 = smov (!%p36_p0, %s38_s19), %s5179_s14 }
   0xf   : > { %9423 = sst [smem:[#allocation8_spill]] %s9841_s18  ;;  %s333_s20 = ssub.s32 %s5175_s30, %s9841_s18 }
  0x10   : > { %p5310_p3 = por %p348_p2, %p347_p1  ;;  %p40_p4 = scmp.ge.s32.totalorder %s9843_s19, 2 }
  0x11   : > { %p353_p5 = scmp.ne.s32.totalorder %s5159_s26, %s5155_s25  ;;  %p354_p6 = scmp.eq.s32.totalorder %s4729_s17, 3 }
  0x12   : > { %p4732_p7 = scmp.ge.s32.totalorder %s5183_s15, 1  ;;  %s9845_s19 = smov (%p40_p4, %s9843_s19), 0 }
  0x13   : > { %9425 = sst [smem:[#allocation9_spill]] %s9845_s19  ;;  %p5319_p8 = por %p354_p6, %p353_p5 }
  0x14   : > { %p432_p9 = scmp.lt.s32.totalorder %s5183_s15, 5  ;;  %s332_s23 = ssub.s32 %s5179_s14, %s9845_s19 }
  0x15   : > { %s9426_s22 = scalar_select %p5319_p8, 1, 0 }
  0x16   : > { %s337_s24 = sadd.s32 1, %s5163_s27  ;;  %s334_s16 = sor.u32 %s333_s20, %s332_s23 }
  0x17   : > { %9427 = sst [smem:[#allocation10_spill]] %s9426_s22  ;;  %p433_p10 = pnand %p4732_p7, %p432_p9 }
  0x18   : > { %p335_p11 = scmp.eq.s32.totalorder %s334_s16, 0 }
  0x19   : > { %436 = sbr.rel (%p433_p10) target bundleno = 1763 (0x6e3), region = 72 }
  0x1a   : > { %s5328_s18 = scalar_select %p335_p11, %s5163_s27, %s337_s24  }
  0x1e   : > { %s9428_s3 = sld [smem:[#allocation101_spill]]  ;;  %vm711_vm0 = vcmask 1043456   ;;  %p491_p12 = scmp.lt.s32.totalorder %s5171_s29, 1  ;;  %vm9376_vm1 = vcmask 228352   ;;  %v5407_v26 = vld [vmem:[%s9344_s4] ss:$0 sm:$0xff] }
  0x1f   : > { %s9360_s19 = sshll.u32 %s5167_s28, 7  ;;  %s9429_s0 = sld [smem:[#allocation99_spill]]  ;;  %v9430_v31 = vmov 0  ;;  %vm900_vm5 = vcmask 1040384   ;;  %vm9399_vm8 = vcmask 1045504   ;;  %v9433_v51 = vmov 0 }
  0x20   : > { %s5341_s24 = scalar_select %p491_p12, %s5171_s29, 1 }
  0x21   : > { %s9395_s22 = smov 64   ;;  %s9468_s25 = smov 64  }
  0x22   : > { %s9361_s16 = smul.u32 320, %s5341_s24  ;;  %s9476_s1 = sld [smem:[#allocation100_spill]] }
  0x23   : > { %s488_s30 = sand.u32 1, %s5159_s26  }
  0x24   : > { %v633_v0 = vld [vmem:[%s9428_s3 + $0x18] sm:$0xf]  ;;  %v632_v1 = vld [vmem:[%s9428_s3 + $0x10] sm:$0xff]  ;;  %v631_v2 = vld [vmem:[%s9428_s3 + $0x8] sm:$0xff] }
  0x25   : > { %4744 = vmatpush.msk.msra.mxu0 %vm711_vm0, %v633_v0  ;;  %v630_v3 = vld [vmem:[%s9428_s3] sm:$0xff]  ;;  %s495_s14 = scalar_lea.vmem %s9429_s0, %s9361_s16  ;;  %s9475_s3 = smul.u32 320, %s5341_s24 }
  0x26   : > { %s5355_s20 = scalar_lea.vmem %s495_s14, %s9360_s19  ;;  %s5394_s14 = sshll.u32 %s5167_s28, 3 }
  0x27   : > { %728 = vmatpush.msra.mxu0 %v632_v1  ;;  %v606_v4 = vld [vmem:[%s5355_s20] sm:$0xff]  ;;  %v607_v5 = vld [vmem:[%s5355_s20 + $0x8] sm:$0xff]  ;;  %v608_v6 = vld [vmem:[%s5355_s20 + $0x10] sm:$0xff]  ;;  %s4741_s23 = sadd.s32 4294967294, %s5394_s14  ;;  %s4742_s0 = sadd.s32 4294967295, %s5394_s14 }
  0x28   : > { %v609_v7 = vld [vmem:[%s5355_s20 + $0x18] sm:$0xff]  ;;  %v610_v8 = vld [vmem:[%s5355_s20 + $0x20] sm:$0xff]  ;;  %v611_v9 = vld [vmem:[%s5355_s20 + $0x28] sm:$0xff]  ;;  %v5401_v24 = vstv %s4741_s23  ;;  %s500_s17 = scalar_lea.vmem %s9476_s1, %s9475_s3  ;;  %s9477_s23 = sshll.u32 %s5167_s28, 7 }
  0x29   : > { %729 = vmatpush.msra.mxu0 %v631_v2  ;;  %v612_v10 = vld [vmem:[%s5355_s20 + $0x30] sm:$0xff]  ;;  %v613_v11 = vld [vmem:[%s5355_s20 + $0x38] sm:$0xff]  ;;  %v614_v12 = vld [vmem:[%s5355_s20 + $0x40] sm:$0xff]  ;;  %v516_v25 = vadd.s32 1, %v5401_v24  ;;  %v517_v38 = vadd.s32 2, %v5401_v24  ;;  %v518_v60 = vadd.s32 3, %v5401_v24  ;;  %s6183_s19 = scalar_lea.vmem %s500_s17, %s9477_s23 }
  0x2a   : > { %v615_v13 = vld [vmem:[%s5355_s20 + $0x48] sm:$0xff]  ;;  %v616_v14 = vld [vmem:[%s5355_s20 + $0x50] sm:$0xff]  ;;  %v617_v15 = vld [vmem:[%s5355_s20 + $0x58] sm:$0xff]  ;;  %p504_p13 = scmp.lt.s32.totalorder %s5394_s14, 15  ;;  %s4738_s16 = sshll.u32 %s5341_s24, 5 }
  0x2b   : > { %730 = vmatpush.msra.mxu0 %v630_v3  ;;  %v618_v16 = vld [vmem:[%s5355_s20 + $0x60] sm:$0xff]  ;;  %v619_v17 = vld [vmem:[%s5355_s20 + $0x68] sm:$0xff]  ;;  %v620_v18 = vld [vmem:[%s5355_s20 + $0x70] sm:$0xff]  ;;  %vm528_vm2 = vcmp.ge.s32.totalorder %v516_v25, 0  ;;  %vm540_vm3 = vcmp.lt.s32.totalorder %v516_v25, 16  ;;  %vm529_vm6 = vcmp.ge.s32.totalorder %v517_v38, 0 }
  0x2c   : > { %4745 = vmatmul.msk.f32.vlgmr.msra.gmra.mxu0 %vm9376_vm1, %v606_v4  ;;  %v621_v19 = vld [vmem:[%s5355_s20 + $0x78] sm:$0xff]  ;;  %v622_v21 = vld [vmem:[%s5355_s20 + $0x80] sm:$0xff]  ;;  %v623_v23 = vld [vmem:[%s5355_s20 + $0x88] sm:$0xff]  ;;  %vm541_vm7 = vcmp.lt.s32.totalorder %v517_v38, 16  ;;  %vm530_vm10 = vcmp.ge.s32.totalorder %v518_v60, 0  ;;  %vm542_vm11 = vcmp.lt.s32.totalorder %v518_v60, 16 }
  0x2d   : > { %v624_v28 = vld [vmem:[%s5355_s20 + $0x90] sm:$0xff]  ;;  %vm5412_vm4 = vmand %vm528_vm2, %vm540_vm3  ;;  %v625_v34 = vld [vmem:[%s5355_s20 + $0x98] sm:$0xff]  ;;  %s9847_s14 = smov (!%p504_p13, %s5394_s14), 15  ;;  %s4733_s17 = sshll.u32 %s488_s30, 7 }
  0x2e   : > { %v9431_v31 = vsel %vm5412_vm4, 4294967295, %v9430_v31  ;;  %v626_v43 = vld [vmem:[%s5355_s20 + $0xa0] sm:$0xff]  ;;  %vm5441_vm9 = vmand %vm529_vm6, %vm541_vm7  ;;  %v627_v55 = vld [vmem:[%s5355_s20 + $0xa8] sm:$0xff]  ;;  %s9226_s23 = scalar_lea.vmem [#allocation2], %s4733_s17 }
  0x2f   : > { %9432 = vst [vmem:[#allocation11_spill] sm:$0xff] %v9431_v31  ;;  %v9434_v51 = vsel %vm5441_vm9, 4294967295, %v9433_v51  ;;  %vm5476_vm12 = vmand %vm530_vm10, %vm542_vm11  ;;  %s4612_s1 = sshll.u32 %s9226_s23, 4  ;;  %s4613_s1 = int_to_ptr.vmem [resolvable:$true] %s4612_s1 }
  0x30   : > { %9435 = vst [vmem:[#allocation12_spill] sm:$0xff] %v9434_v51 }
  0x34   : > { %4746 = vmatmul.msk.f32.gmra.mxu0 %vm9376_vm1, %v607_v5 }
  0x3c   : > { %4747 = vmatmul.msk.f32.gmra.mxu0 %vm9376_vm1, %v608_v6 }
  0x44   : > { %4748 = vmatmul.msk.f32.gmra.mxu0 %vm9376_vm1, %v609_v7 }
  0x4c   : > { %4749 = vmatmul.msk.f32.gmra.mxu0 %vm9376_vm1, %v610_v8  ;;  %v9436_v8 = vmov 0 }
  0x4d   : > { %v9437_v8 = vsel %vm5476_vm12, 4294967295, %v9436_v8 }
  0x4e   : > { %9438 = vst [vmem:[#allocation13_spill] sm:$0xff] %v9437_v8 }
  0x54   : > { %4750 = vmatmul.msk.f32.gmra.mxu0 %vm9376_vm1, %v611_v9 }
  0x5c   : > { %4751 = vmatmul.msk.f32.gmra.mxu0 %vm9376_vm1, %v612_v10 }
  0x64   : > { %4752 = vmatmul.msk.f32.gmra.mxu0 %vm9376_vm1, %v613_v11 }
  0x6c   : > { %4753 = vmatmul.msk.f32.gmra.mxu0 %vm9376_vm1, %v614_v12 }
  0x74   : > { %4754 = vmatmul.msk.f32.gmra.mxu0 %vm9376_vm1, %v615_v13 }
  0x7c   : > { %4755 = vmatmul.msk.f32.gmra.mxu0 %vm9376_vm1, %v616_v14 }
  0x84   : > { %4756 = vmatmul.msk.f32.gmra.mxu0 %vm9376_vm1, %v617_v15 }
  0x8c   : > { %4757 = vmatmul.msk.f32.gmra.mxu0 %vm9376_vm1, %v618_v16  ;;  %v519_v16 = vadd.s32 4, %v5401_v24 }
  0x8e   : > { %vm531_vm13 = vcmp.ge.s32.totalorder %v519_v16, 0  ;;  %vm543_vm14 = vcmp.lt.s32.totalorder %v519_v16, 16  ;;  %v1484_v16 = vld [vmem:[%s9345_s5 + $0x160] sm:$0xff] }
  0x8f   : > { %vm5509_vm15 = vmand %vm531_vm13, %vm543_vm14 }
  0x94   : > { %4758 = vmatmul.msk.f32.gmra.mxu0 %vm9376_vm1, %v619_v17 }
  0x9c   : > { %4759 = vmatmul.msk.f32.gmra.mxu0 %vm9376_vm1, %v620_v18 }
  0xa4   : > { %4760 = vmatmul.msk.f32.gmra.mxu0 %vm9376_vm1, %v621_v19 }
  0xa9   : > { %v5389_v20 = vpop.f32.mrf.mxu0 }
  0xac   : > { %4761 = vmatmul.msk.f32.gmra.mxu0 %vm9376_vm1, %v622_v21 }
  0xb1   : > { %v5396_v22 = vpop.f32.mrf.mxu0 }
  0xb4   : > { %4762 = vmatmul.msk.f32.gmra.mxu0 %vm9376_vm1, %v623_v23 }
  0xb9   : > { %v738_v27 = vpop.f32.mrf.mxu0 }
  0xba   : > { %v739_v29 = vadd.f32 %v5407_v26, %v738_v27 }
  0xbc   : > { %v806_v30 = vmax.f32 %v739_v29, 0.0  ;;  %4763 = vmatmul.msk.f32.gmra.mxu0 %vm9376_vm1, %v624_v28 }
  0xbe   : > { %v854_v32 = vsel %vm5412_vm4, %v806_v30, 0.0 }
  0xbf   : > { %v904_v36 = vrot.slane %v854_v32, 7 }
  0xc1   : > { %v741_v33 = vpop.f32.mrf.mxu0  ;;  %v5425_v40 = vsel %vm900_vm5, 0.0, %v904_v36 }
  0xc2   : > { %v742_v35 = vadd.f32 %v5407_v26, %v741_v33  ;;  %v1134_v46 = vrot.slane %v5425_v40, 2  ;;  %v9439_v33 = vmov 0 }
  0xc3   : > { %v9440_v33 = vsel %vm5509_vm15, 4294967295, %v9439_v33 }
  0xc4   : > { %v807_v37 = vmax.f32 %v742_v35, 0.0  ;;  %4764 = vmatmul.msk.f32.gmra.mxu0 %vm9376_vm1, %v625_v34  ;;  %9441 = vst [vmem:[#allocation14_spill] sm:$0xff] %v9440_v33 }
  0xc6   : > { %v855_v39 = vsel %vm5412_vm4, %v807_v37, 0.0 }
  0xc7   : > { %v905_v41 = vrot.slane %v855_v39, 7 }
  0xc9   : > { %v744_v42 = vpop.f32.mrf.mxu0  ;;  %v5429_v44 = vsel %vm900_vm5, %v904_v36, %v905_v41  ;;  %v5439_v50 = vsel %vm900_vm5, %v905_v41, 0.0 }
  0xca   : > { %v745_v45 = vadd.f32 %v5407_v26, %v744_v42  ;;  %v1135_v47 = vrot.slane %v5429_v44, 2  ;;  %v1137_v53 = vrot.slane %v5439_v50, 2  ;;  %v520_v42 = vadd.s32 5, %v5401_v24 }
  0xcc   : > { %v808_v48 = vmax.f32 %v745_v45, 0.0  ;;  %4765 = vmatmul.msk.f32.gmra.mxu0 %vm9376_vm1, %v626_v43  ;;  %v5436_v49 = vsel %vm9399_vm8, %v1134_v46, %v1135_v47  ;;  %v5454_v59 = vsel %vm9399_vm8, %v1135_v47, %v1137_v53  ;;  %vm532_vm0 = vcmp.ge.s32.totalorder %v520_v42, 0 }
  0xcd   : > { %1291 = vrot.lane.b32.xlu0 %v5436_v49, %s9395_s22  ;;  %vm544_vm2 = vcmp.lt.s32.totalorder %v520_v42, 16  ;;  %v1481_v42 = vld [vmem:[%s9345_s5 + $0x148] sm:$0xff] }
  0xce   : > { %v856_v52 = vsel %vm5441_vm9, %v808_v48, 0.0  ;;  %vm5546_vm3 = vmand %vm532_vm0, %vm544_vm2 }
  0xcf   : > { %v907_v57 = vrot.slane %v856_v52, 7 }
  0xd1   : > { %v747_v54 = vpop.f32.mrf.mxu0  ;;  %v5462_v62 = vsel %vm900_vm5, 0.0, %v907_v57 }
  0xd2   : > { %v748_v56 = vadd.f32 %v5407_v26, %v747_v54  ;;  %v1139_v3 = vrot.slane %v5462_v62, 2 }
  0xd4   : > { %v809_v58 = vmax.f32 %v748_v56, 0.0  ;;  %4766 = vmatmul.msk.f32.gmra.mxu0 %vm9376_vm1, %v627_v55 }
  0xd5   : > { %1293 = vrot.lane.b32.xlu0 %v5454_v59, %s9395_s22 }
  0xd6   : > { %v857_v61 = vsel %vm5441_vm9, %v809_v58, 0.0 }
  0xd7   : > { %v908_v63 = vrot.slane %v857_v61, 7  ;;  %v9442_v61 = vmov 0 }
  0xd8   : > { %v9443_v61 = vsel %vm5546_vm3, 4294967295, %v9442_v61 }
  0xd9   : > { %v5465_v0 = vsel %vm900_vm5, %v907_v57, %v908_v63  ;;  %v750_v1 = vpop.f32.mrf.mxu0  ;;  %v5474_v7 = vsel %vm900_vm5, %v908_v63, 0.0  ;;  %9444 = vst [vmem:[#allocation15_spill] sm:$0xff] %v9443_v61 }
  0xda   : > { %v751_v2 = vadd.f32 %v5407_v26, %v750_v1  ;;  %v1140_v4 = vrot.slane %v5465_v0, 2  ;;  %v1142_v10 = vrot.slane %v5474_v7, 2 }
  0xdc   : > { %v810_v5 = vmax.f32 %v751_v2, 0.0  ;;  %v5471_v6 = vsel %vm9399_vm8, %v1139_v3, %v1140_v4  ;;  %v5487_v15 = vsel %vm9399_vm8, %v1140_v4, %v1142_v10  ;;  %v1487_v2 = vld [vmem:[%s9345_s5 + $0x178] sm:$0xff]  ;;  %v521_v10 = vadd.s32 6, %v5401_v24 }
  0xdd   : > { %1295 = vrot.lane.b32.xlu1 %v5471_v6, %s9395_s22  ;;  %1710 = vmatpush.msra.mxu3 %v1487_v2 }
  0xde   : > { %v858_v9 = vsel %vm5476_vm12, %v810_v5, 0.0  ;;  %v1486_v5 = vld [vmem:[%s9345_s5 + $0x170] sm:$0xff]  ;;  %vm533_vm6 = vcmp.ge.s32.totalorder %v521_v10, 0  ;;  %vm545_vm7 = vcmp.lt.s32.totalorder %v521_v10, 16 }
  0xdf   : > { %v910_v13 = vrot.slane %v858_v9, 7  ;;  %1711 = vmatpush.msra.mxu3 %v1486_v5  ;;  %vm5597_vm10 = vmand %vm533_vm6, %vm545_vm7  ;;  %v1476_v5 = vld [vmem:[%s9345_s5 + $0x120] sm:$0xff]  ;;  %vm2116_vm6 = vcmask 1041408  }
  0xe1   : > { %v753_v11 = vpop.f32.mrf.mxu0  ;;  %v5495_v18 = vsel %vm900_vm5, 0.0, %v910_v13 }
  0xe2   : > { %v754_v12 = vadd.f32 %v5407_v26, %v753_v11  ;;  %v1144_v27 = vrot.slane %v5495_v18, 2  ;;  %v1485_v11 = vld [vmem:[%s9345_s5 + $0x168] sm:$0xff] }
  0xe3   : > { %1712 = vmatpush.msra.mxu3 %v1485_v11 }
  0xe4   : > { %v811_v14 = vmax.f32 %v754_v12, 0.0 }
  0xe5   : > { %1297 = vrot.lane.b32.xlu1 %v5487_v15, %s9395_s22  ;;  %1713 = vmatpush.msra.mxu3 %v1484_v16 }
  0xe6   : > { %v859_v17 = vsel %vm5476_vm12, %v811_v14, 0.0 }
  0xe7   : > { %v911_v19 = vrot.slane %v859_v17, 7 }
  0xe9   : > { %v5498_v21 = vsel %vm900_vm5, %v910_v13, %v911_v19  ;;  %v756_v23 = vpop.f32.mrf.mxu0  ;;  %v5507_v32 = vsel %vm900_vm5, %v911_v19, 0.0 }
  0xea   : > { %v757_v25 = vadd.f32 %v5407_v26, %v756_v23  ;;  %v1145_v28 = vrot.slane %v5498_v21, 2  ;;  %v1147_v35 = vrot.slane %v5507_v32, 2 }
  0xec   : > { %v812_v29 = vmax.f32 %v757_v25, 0.0  ;;  %v5504_v30 = vsel %vm9399_vm8, %v1144_v27, %v1145_v28  ;;  %v5520_v41 = vsel %vm9399_vm8, %v1145_v28, %v1147_v35  ;;  %v1483_v25 = vld [vmem:[%s9345_s5 + $0x158] sm:$0xff]  ;;  %v1482_v35 = vld [vmem:[%s9345_s5 + $0x150] sm:$0xff] }
  0xed   : > { %1299 = vrot.lane.b32.xlu2 %v5504_v30, %s9395_s22  ;;  %1714 = vmatpush.msra.mxu3 %v1483_v25 }
  0xee   : > { %v860_v34 = vsel %vm5509_vm15, %v812_v29, 0.0 }
  0xef   : > { %v913_v38 = vrot.slane %v860_v34, 7  ;;  %1715 = vmatpush.msra.mxu3 %v1482_v35  ;;  %v9448_v35 = vmov 0 }
  0xf1   : > { %v759_v36 = vpop.f32.mrf.mxu0  ;;  %v5528_v45 = vsel %vm900_vm5, 0.0, %v913_v38  ;;  %1716 = vmatpush.msra.mxu3 %v1481_v42  ;;  %v1472_v42 = vld [vmem:[%s9345_s5 + $0x100] sm:$0xff] }
  0xf2   : > { %v760_v37 = vadd.f32 %v5407_v26, %v759_v36  ;;  %v1149_v56 = vrot.slane %v5528_v45, 2 }
  0xf4   : > { %v813_v39 = vmax.f32 %v760_v37, 0.0 }
  0xf5   : > { %1301 = vrot.lane.b32.xlu2 %v5520_v41, %s9395_s22 }
  0xf6   : > { %v861_v43 = vsel %vm5509_vm15, %v813_v39, 0.0  ;;  %v9445_v39 = vmov 0 }
  0xf7   : > { %v914_v46 = vrot.slane %v861_v43, 7  ;;  %v9446_v39 = vsel %vm5597_vm10, 4294967295, %v9445_v39  ;;  %v1480_v43 = vld [vmem:[%s9345_s5 + $0x140] sm:$0xff] }
  0xf8   : > { %9447 = vst [vmem:[#allocation16_spill] sm:$0xff] %v9446_v39  ;;  %1717 = vmatpush.msra.mxu3 %v1480_v43 }
  0xf9   : > { %v5531_v47 = vsel %vm900_vm5, %v913_v38, %v914_v46  ;;  %v5534_v48 = vsel %vm900_vm5, %v914_v46, 0.0  ;;  %v762_v52 = vpop.f32.mrf.mxu0 }
  0xfa   : > { %v763_v53 = vadd.f32 %v5407_v26, %v762_v52  ;;  %v1150_v54 = vrot.slane %v5531_v47, 2  ;;  %v1152_v55 = vrot.slane %v5534_v48, 2 }
  0xfc   : > { %v814_v57 = vmax.f32 %v763_v53, 0.0  ;;  %v5541_v58 = vsel %vm9399_vm8, %v1150_v54, %v1152_v55  ;;  %v5544_v60 = vsel %vm9399_vm8, %v1149_v56, %v1150_v54  ;;  %v1479_v53 = vld [vmem:[%s9345_s5 + $0x138] sm:$0xff]  ;;  %v1478_v56 = vld [vmem:[%s9345_s5 + $0x130] sm:$0xff] }
  0xfd   : > { %1305 = vrot.lane.b32.xlu1 %v5541_v58, %s9395_s22  ;;  %1303 = vrot.lane.b32.xlu0 %v5544_v60, %s9395_s22 }
  0xfe   : > { %v862_v63 = vsel %vm5546_vm3, %v814_v57, 0.0  ;;  %1718 = vmatpush.msra.mxu3 %v1479_v53 }
  0xff   : > { %v916_v4 = vrot.slane %v862_v63, 7  ;;  %v522_v63 = vadd.s32 7, %v5401_v24 }
 0x100   : > { %1719 = vmatpush.msra.mxu3 %v1478_v56 }
 0x101   : > { %v765_v1 = vpop.f32.mrf.mxu0  ;;  %v5570_v13 = vsel %vm900_vm5, 0.0, %v916_v4  ;;  %vm534_vm11 = vcmp.ge.s32.totalorder %v522_v63, 0  ;;  %vm546_vm13 = vcmp.lt.s32.totalorder %v522_v63, 16 }
 0x102   : > { %v766_v3 = vadd.f32 %v5407_v26, %v765_v1  ;;  %v1154_v28 = vrot.slane %v5570_v13, 2  ;;  %v1477_v1 = vld [vmem:[%s9345_s5 + $0x128] sm:$0xff]  ;;  %vm5654_vm14 = vmand %vm534_vm11, %vm546_vm13 }
 0x103   : > { %1720 = vmatpush.msra.mxu3 %v1477_v1  ;;  %v9449_v35 = vsel %vm5654_vm14, 4294967295, %v9448_v35 }
 0x104   : > { %v815_v9 = vmax.f32 %v766_v3, 0.0  ;;  %9450 = vst [vmem:[#allocation17_spill] sm:$0xff] %v9449_v35 }
 0x105   : > { %1721 = vmatpush.msra.mxu3 %v1476_v5 }
 0x106   : > { %v863_v12 = vsel %vm5546_vm3, %v815_v9, 0.0 }
 0x107   : > { %v917_v14 = vrot.slane %v863_v12, 7  ;;  %v1475_v12 = vld [vmem:[%s9345_s5 + $0x118] sm:$0xff] }
 0x108   : > { %1722 = vmatpush.msra.mxu3 %v1475_v12 }
 0x109   : > { %v5576_v17 = vsel %vm900_vm5, %v916_v4, %v917_v14  ;;  %v5579_v19 = vsel %vm900_vm5, %v917_v14, 0.0  ;;  %v768_v23 = vpop.f32.mrf.mxu0 }
 0x10a   : > { %v769_v27 = vadd.f32 %v5407_v26, %v768_v23  ;;  %v1155_v29 = vrot.slane %v5576_v17, 2  ;;  %v1157_v34 = vrot.slane %v5579_v19, 2 }
 0x10c   : > { %v816_v36 = vmax.f32 %v769_v27, 0.0  ;;  %v5592_v37 = vsel %vm9399_vm8, %v1154_v28, %v1155_v29  ;;  %v5595_v38 = vsel %vm9399_vm8, %v1155_v29, %v1157_v34  ;;  %v1474_v27 = vld [vmem:[%s9345_s5 + $0x110] sm:$0xff] }
 0x10d   : > { %1307 = vrot.lane.b32.xlu2 %v5592_v37, %s9395_s22  ;;  %1309 = vrot.lane.b32.xlu0 %v5595_v38, %s9395_s22 }
 0x10e   : > { %v864_v46 = vsel %vm5597_vm10, %v816_v36, 0.0  ;;  %1723 = vmatpush.msra.mxu3 %v1474_v27  ;;  %v1473_v36 = vld [vmem:[%s9345_s5 + $0x108] sm:$0xff] }
 0x10f   : > { %v919_v55 = vrot.slane %v864_v46, 7 }
 0x110   : > { %1724 = vmatpush.msra.mxu3 %v1473_v36 }
 0x111   : > { %v771_v52 = vpop.f32.mrf.mxu0  ;;  %v5627_v3 = vsel %vm900_vm5, 0.0, %v919_v55 }
 0x112   : > { %v772_v54 = vadd.f32 %v5407_v26, %v771_v52  ;;  %v1159_v25 = vrot.slane %v5627_v3, 2  ;;  %1725 = vmatpush.msra.mxu3 %v1472_v42 }
 0x114   : > { %v817_v57 = vmax.f32 %v772_v54, 0.0 }
 0x116   : > { %v865_v2 = vsel %vm5597_vm10, %v817_v57, 0.0 }
 0x117   : > { %v920_v4 = vrot.slane %v865_v2, 7 }
 0x119   : > { %v5633_v9 = vsel %vm900_vm5, %v919_v55, %v920_v4  ;;  %v5636_v10 = vsel %vm900_vm5, %v920_v4, 0.0  ;;  %v774_v11 = vpop.f32.mrf.mxu0  ;;  %v523_v55 = vadd.s32 8, %v5401_v24 }
 0x11a   : > { %v775_v14 = vadd.f32 %v5407_v26, %v774_v11  ;;  %v1160_v16 = vrot.slane %v5633_v9, 2  ;;  %v1162_v23 = vrot.slane %v5636_v10, 2 }
 0x11b   : > { %vm535_vm0 = vcmp.ge.s32.totalorder %v523_v55, 0  ;;  %vm547_vm2 = vcmp.lt.s32.totalorder %v523_v55, 16 }
 0x11c   : > { %v818_v28 = vmax.f32 %v775_v14, 0.0  ;;  %v5649_v29 = vsel %vm9399_vm8, %v1160_v16, %v1162_v23  ;;  %v5652_v34 = vsel %vm9399_vm8, %v1159_v25, %v1160_v16  ;;  %v2038_v16 = vld [vmem:[%s9347_s7 + $0x60] sm:$0x3]  ;;  %vm5696_vm7 = vmand %vm535_vm0, %vm547_vm2  ;;  %vm1375_vm2 = vcmask 523264  }
 0x11d   : > { %1313 = vrot.lane.b32.xlu2 %v5649_v29, %s9395_s22  ;;  %1311 = vrot.lane.b32.xlu1 %v5652_v34, %s9395_s22 }
 0x11e   : > { %v866_v43 = vsel %vm5654_vm14, %v818_v28, 0.0  ;;  %4789 = vmatpush.msk.msrb.mxu3 %vm2116_vm6, %v2038_v16  ;;  %v9453_v28 = vmov 0  ;;  %vm1017_vm6 = vcmask 1046528  }
 0x11f   : > { %v922_v53 = vrot.slane %v866_v43, 7  ;;  %v9454_v28 = vsel %vm5696_vm7, 4294967295, %v9453_v28 }
 0x120   : > { %9455 = vst [vmem:[#allocation20_spill] sm:$0xff] %v9454_v28  ;;  %v1026_v28 = vrot.slane %v5439_v50, 1 }
 0x121   : > { %v777_v46 = vpop.f32.mrf.mxu0  ;;  %v5675_v57 = vsel %vm900_vm5, 0.0, %v922_v53 }
 0x122   : > { %v778_v52 = vadd.f32 %v5407_v26, %v777_v46  ;;  %v1164_v14 = vrot.slane %v5675_v57, 2 }
 0x124   : > { %v819_v54 = vmax.f32 %v778_v52, 0.0 }
 0x126   : > { %v867_v56 = vsel %vm5654_vm14, %v819_v54, 0.0 }
 0x127   : > { %v923_v63 = vrot.slane %v867_v56, 7 }
 0x129   : > { %v5678_v1 = vsel %vm900_vm5, %v922_v53, %v923_v63  ;;  %v5681_v2 = vsel %vm900_vm5, %v923_v63, 0.0  ;;  %v780_v4 = vpop.f32.mrf.mxu0  ;;  %v524_v53 = vadd.s32 9, %v5401_v24 }
 0x12a   : > { %v781_v5 = vadd.f32 %v5407_v26, %v780_v4  ;;  %v1165_v11 = vrot.slane %v5678_v1, 2  ;;  %v1167_v12 = vrot.slane %v5681_v2, 2  ;;  %v1054_v50 = vrot.slane %v5678_v1, 1 }
 0x12b   : > { %vm536_vm11 = vcmp.ge.s32.totalorder %v524_v53, 0  ;;  %vm548_vm13 = vcmp.lt.s32.totalorder %v524_v53, 16  ;;  %v9458_v53 = vmov 0 }
 0x12c   : > { %v820_v23 = vmax.f32 %v781_v5, 0.0  ;;  %v5691_v25 = vsel %vm9399_vm8, %v1165_v11, %v1167_v12  ;;  %v5694_v27 = vsel %vm9399_vm8, %v1164_v14, %v1165_v11  ;;  %vm5736_vm0 = vmand %vm536_vm11, %vm548_vm13 }
 0x12d   : > { %9451 = vst [vmem:[#allocation18_spill] sm:$0xff] %v5691_v25  ;;  %1317 = vrot.lane.b32.xlu1 %v5691_v25, %s9395_s22  ;;  %1315 = vrot.lane.b32.xlu0 %v5694_v27, %s9395_s22  ;;  %v9459_v53 = vsel %vm5736_vm0, 4294967295, %v9458_v53 }
 0x12e   : > { %9452 = vst [vmem:[#allocation19_spill] sm:$0xff] %v5694_v27  ;;  %v868_v36 = vsel %vm5696_vm7, %v820_v23, 0.0  ;;  %v2037_v23 = vld [vmem:[%s9347_s7 + $0x58] sm:$0xff]  ;;  %v1033_v27 = vrot.slane %v5495_v18, 1 }
 0x12f   : > { %v925_v46 = vrot.slane %v868_v36, 7  ;;  %v1024_v36 = vrot.slane %v5429_v44, 1  ;;  %2124 = vmatpush.msrb.mxu3 %v2037_v23  ;;  %9460 = vst [vmem:[#allocation23_spill] sm:$0xff] %v9459_v53 }
 0x131   : > { %v783_v42 = vpop.f32.mrf.mxu0  ;;  %v5711_v55 = vsel %vm900_vm5, 0.0, %v925_v46 }
 0x132   : > { %v784_v43 = vadd.f32 %v5407_v26, %v783_v42  ;;  %v1169_v12 = vrot.slane %v5711_v55, 2  ;;  %v2036_v42 = vld [vmem:[%s9347_s7 + $0x50] sm:$0xff] }
 0x133   : > { %2125 = vmatpush.msrb.mxu3 %v2036_v42  ;;  %v525_v42 = vadd.s32 10, %v5401_v24 }
 0x134   : > { %v821_v52 = vmax.f32 %v784_v43, 0.0 }
 0x135   : > { %vm537_vm11 = vcmp.ge.s32.totalorder %v525_v42, 0  ;;  %vm549_vm13 = vcmp.lt.s32.totalorder %v525_v42, 16 }
 0x136   : > { %v869_v54 = vsel %vm5696_vm7, %v821_v52, 0.0  ;;  %vm5791_vm1 = vmand %vm537_vm11, %vm549_vm13  ;;  %vm527_vm11 = vcmp.ge.s32.totalorder %v5401_v24, 0  ;;  %vm539_vm13 = vcmp.lt.s32.totalorder %v5401_v24, 16 }
 0x137   : > { %v926_v56 = vrot.slane %v869_v54, 7  ;;  %v1023_v54 = vrot.slane %v5425_v40, 1 }
 0x139   : > { %v5714_v63 = vsel %vm900_vm5, %v925_v46, %v926_v56  ;;  %v5717_v4 = vsel %vm900_vm5, %v926_v56, 0.0  ;;  %v786_v5 = vpop.f32.mrf.mxu0 }
 0x13a   : > { %v787_v11 = vadd.f32 %v5407_v26, %v786_v5  ;;  %v1170_v14 = vrot.slane %v5714_v63, 2  ;;  %v1172_v16 = vrot.slane %v5717_v4, 2  ;;  %v5746_v5 = vsel %vm1017_vm6, %v1023_v54, %v1024_v36 }
 0x13c   : > { %v822_v43 = vmax.f32 %v787_v11, 0.0  ;;  %v5731_v46 = vsel %vm9399_vm8, %v1169_v12, %v1170_v14  ;;  %v5734_v52 = vsel %vm9399_vm8, %v1170_v14, %v1172_v16 }
 0x13d   : > { %9456 = vst [vmem:[#allocation21_spill] sm:$0xff] %v5731_v46  ;;  %1319 = vrot.lane.b32.xlu2 %v5731_v46, %s9395_s22  ;;  %1321 = vrot.lane.b32.xlu0 %v5734_v52, %s9395_s22 }
 0x13e   : > { %9457 = vst [vmem:[#allocation22_spill] sm:$0xff] %v5734_v52  ;;  %v870_v11 = vsel %vm5736_vm0, %v822_v43, 0.0  ;;  %v1031_v52 = vrot.slane %v5474_v7, 1  ;;  %v1056_v7 = vrot.slane %v5681_v2, 1  ;;  %v1034_v2 = vrot.slane %v5498_v21, 1 }
 0x13f   : > { %v1292_v56 = vpop.permute.xlu0 %1291  ;;  %v928_v23 = vrot.slane %v870_v11, 7  ;;  %v1053_v11 = vrot.slane %v5675_v57, 1 }
 0x140   : > { %v1416_v12 = vsel %vm1375_vm2, %v5746_v5, %v1292_v56  ;;  %v5761_v56 = vsel %vm1017_vm6, %v1024_v36, %v1026_v28  ;;  %v2035_v28 = vld [vmem:[%s9347_s7 + $0x48] sm:$0xff] }
 0x141   : > { %v789_v14 = vpop.f32.mrf.mxu0  ;;  %1726 = vmatmul.f32.vlgmr.msra.gmra.mxu3 %v1416_v12  ;;  %v5758_v39 = vsel %vm900_vm5, 0.0, %v928_v23 }
 0x142   : > { %v790_v16 = vadd.f32 %v5407_v26, %v789_v14  ;;  %2126 = vmatpush.msrb.mxu3 %v2035_v28 }
 0x144   : > { %v823_v35 = vmax.f32 %v790_v16, 0.0 }
 0x146   : > { %v871_v54 = vsel %vm5736_vm0, %v823_v35, 0.0 }
 0x147   : > { %v929_v43 = vrot.slane %v871_v54, 7  ;;  %v1294_v61 = vpop.permute.xlu0 %1293  ;;  %v1174_v54 = vrot.slane %v5758_v39, 2 }
 0x148   : > { %v1417_v12 = vsel %vm1375_vm2, %v5761_v56, %v1294_v61 }
 0x149   : > { %v5768_v14 = vsel %vm900_vm5, %v928_v23, %v929_v43  ;;  %v5771_v35 = vsel %vm900_vm5, %v929_v43, 0.0  ;;  %v792_v16 = vpop.f32.mrf.mxu0  ;;  %1729 = vmatmul.f32.gmra.mxu3 %v1417_v12  ;;  %v1029_v43 = vrot.slane %v5465_v0, 1  ;;  %v5785_v12 = vsel %vm1017_vm6, %v1053_v11, %v1054_v50 }
 0x14a   : > { %v1177_v61 = vrot.slane %v5771_v35, 2  ;;  %v793_v36 = vadd.f32 %v5407_v26, %v792_v16  ;;  %v1175_v23 = vrot.slane %v5768_v14, 2  ;;  %v9463_v16 = vmov 0 }
 0x14b   : > { %v9464_v16 = vsel %vm5791_vm1, 4294967295, %v9463_v16 }
 0x14c   : > { %v824_v53 = vmax.f32 %v793_v36, 0.0  ;;  %v5782_v33 = vsel %vm9399_vm8, %v1174_v54, %v1175_v23  ;;  %v5788_v8 = vsel %vm9399_vm8, %v1175_v23, %v1177_v61  ;;  %9465 = vst [vmem:[#allocation26_spill] sm:$0xff] %v9464_v16  ;;  %v1028_v36 = vrot.slane %v5462_v62, 1 }
 0x14d   : > { %9461 = vst [vmem:[#allocation24_spill] sm:$0xff] %v5782_v33  ;;  %1323 = vrot.lane.b32.xlu1 %v5782_v33, %s9395_s22  ;;  %v4999_v28 = vpack.i.bf16 %v5788_v8, %v5785_v12  ;;  %v1061_v33 = vrot.slane %v5717_v4, 1 }
 0x14e   : > { %9462 = vst [vmem:[#allocation25_spill] sm:$0xff] %v5788_v8  ;;  %v5802_v54 = vsel %vm1017_vm6, %v1028_v36, %v1029_v43  ;;  %v872_v42 = vsel %vm5791_vm1, %v824_v53, 0.0  ;;  %v2034_v8 = vld [vmem:[%s9347_s7 + $0x40] sm:$0xff] }
 0x14f   : > { %5000 = vrot.lane.b32.xlu2 %v4999_v28, %s9395_s22  ;;  %v1296_v11 = vpop.permute.xlu1 %1295  ;;  %v1059_v28 = vrot.slane %v5714_v63, 1  ;;  %2127 = vmatpush.msrb.mxu3 %v2034_v8  ;;  %v931_v36 = vrot.slane %v872_v42, 7  ;;  %v5826_v8 = vsel %vm1017_vm6, %v1029_v43, %v1031_v52  ;;  %v1300_v43 = vpop.permute.xlu2 %1299 }
 0x150   : > { %v1418_v61 = vsel %vm1375_vm2, %v5802_v54, %v1296_v11 }
 0x151   : > { %v795_v23 = vpop.f32.mrf.mxu0  ;;  %1732 = vmatmul.f32.gmra.mxu3 %v1418_v61  ;;  %v5818_v61 = vsel %vm1017_vm6, %v1059_v28, %v1061_v33  ;;  %v5821_v31 = vsel %vm900_vm5, 0.0, %v931_v36 }
 0x152   : > { %v796_v51 = vadd.f32 %v5407_v26, %v795_v23  ;;  %v1286_v52 = vrot.slane %v5821_v31, 2 }
 0x154   : > { %v825_v53 = vmax.f32 %v796_v51, 0.0 }
 0x156   : > { %v873_v11 = vsel %vm5791_vm1, %v825_v53, 0.0  ;;  %v1058_v53 = vrot.slane %v5711_v55, 1 }
 0x157   : > { %v932_v46 = vrot.slane %v873_v11, 7  ;;  %1102 = vrot.lane.b32.xlu2 %v5818_v61, %s9395_s22  ;;  %v1298_v23 = vpop.permute.xlu1 %1297 }
 0x158   : > { %v1419_v51 = vsel %vm1375_vm2, %v5826_v8, %v1298_v23  ;;  %v5843_v23 = vsel %vm1017_vm6, %v1058_v53, %v1059_v28  ;;  %v5863_v28 = vsel %vm1017_vm6, %v1033_v27, %v1034_v2  ;;  %v1036_v53 = vrot.slane %v5507_v32, 1 }
 0x159   : > { %v5832_v4 = vsel %vm900_vm5, %v931_v36, %v932_v46  ;;  %v5835_v33 = vsel %vm900_vm5, %v932_v46, 0.0  ;;  %1735 = vmatmul.f32.gmra.mxu3 %v1419_v51  ;;  %v5849_v46 = vsel %vm1017_vm6, %v1054_v50, %v1056_v7  ;;  %v1420_v50 = vsel %vm1375_vm2, %v5863_v28, %v1300_v43  ;;  %v2033_v7 = vld [vmem:[%s9347_s7 + $0x38] sm:$0xff] }
 0x15a   : > { %v1289_v42 = vrot.slane %v5835_v33, 2  ;;  %v1287_v11 = vrot.slane %v5832_v4, 2  ;;  %2128 = vmatpush.msrb.mxu3 %v2033_v7  ;;  %v1063_v27 = vrot.slane %v5758_v39, 1  ;;  %v1455_v43 = vld [vmem:[%s9345_s5 + $0x78] sm:$0xff]  ;;  %v1038_v7 = vrot.slane %v5528_v45, 1 }
 0x15b   : > { %4892 = vmatpush.msra.mxu2 %v1455_v43  ;;  %4891 = vmatpush.msra.mxu1 %v1455_v43 }
 0x15c   : > { %v5846_v36 = vsel %vm9399_vm8, %v1287_v11, %v1289_v42  ;;  %v5852_v51 = vsel %vm9399_vm8, %v1286_v52, %v1287_v11  ;;  %v1064_v42 = vrot.slane %v5768_v14, 1  ;;  %v1302_v11 = vpop.permute.xlu2 %1301  ;;  %1556 = vmatpush.msrb.mxu0 %v1455_v43  ;;  %v1041_v43 = vrot.slane %v5534_v48, 1  ;;  %vm6019_vm8 = vmand %vm527_vm11, %vm539_vm13 }
 0x15d   : > { %9466 = vst [vmem:[#allocation27_spill] sm:$0xff] %v5846_v36  ;;  %v5009_v16 = vpack.i.bf16 %v5846_v36, %v5843_v23  ;;  %v5004_v25 = vpack.i.bf16 %v5852_v51, %v5849_v46  ;;  %v1445_v36 = vld [vmem:[%s9345_s5 + $0x28] sm:$0xff]  ;;  %vm2043_vm11 = vcmask 801792   ;;  %vm9480_vm13 = vcmask 228352  }
 0x15e   : > { %9467 = vst [vmem:[#allocation28_spill] sm:$0xff] %v5852_v51  ;;  %v5883_v52 = vsel %vm1017_vm6, %v1063_v27, %v1064_v42  ;;  %v1453_v27 = vld [vmem:[%s9345_s5 + $0x68] sm:$0xff]  ;;  %v1444_v51 = vld [vmem:[%s9345_s5 + $0x20] sm:$0xff] }
 0x15f   : > { %5010 = vrot.lane.b32.xlu1 %v5009_v16, %s9395_s22  ;;  %1200 = vrot.lane.b32.xlu2 %v5425_v40, %s9395_s22  ;;  %v1066_v16 = vrot.slane %v5771_v35, 1  ;;  %v5886_v35 = vsel %vm1017_vm6, %v1034_v2, %v1036_v53  ;;  %v1039_v2 = vrot.slane %v5531_v47, 1 }
 0x160   : > { %5005 = vrot.lane.b32.xlu0 %v5004_v25, %s9395_s22  ;;  %v1421_v32 = vsel %vm1375_vm2, %v5886_v35, %v1302_v11  ;;  %v1454_v11 = vld [vmem:[%s9345_s5 + $0x70] sm:$0xff] }
 0x161   : > { %1738 = vmatmul.f32.gmra.mxu3 %v1420_v50  ;;  %v5876_v25 = vsel %vm1017_vm6, %v1064_v42, %v1066_v16  ;;  %v2032_v50 = vld [vmem:[%s9347_s7 + $0x30] sm:$0xff]  ;;  %v5905_v16 = vsel %vm1017_vm6, %v1038_v7, %v1039_v2  ;;  %4894 = vmatpush.msra.mxu2 %v1454_v11  ;;  %v1451_v7 = vld [vmem:[%s9345_s5 + $0x58] sm:$0xff] }
 0x162   : > { %2129 = vmatpush.msrb.mxu3 %v2032_v50  ;;  %4893 = vmatpush.msra.mxu1 %v1454_v11 }
 0x163   : > { %1557 = vmatpush.msrb.mxu0 %v1454_v11  ;;  %4896 = vmatpush.msra.mxu2 %v1453_v27  ;;  %v1449_v11 = vld [vmem:[%s9345_s5 + $0x48] sm:$0xff] }
 0x164   : > { %4895 = vmatpush.msra.mxu1 %v1453_v27 }
 0x165   : > { %1558 = vmatpush.msrb.mxu0 %v1453_v27  ;;  %v1044_v27 = vrot.slane %v5576_v17, 1 }
 0x167   : > { %1106 = vrot.lane.b32.xlu1 %v5876_v25, %s9395_s22  ;;  %1206 = vrot.lane.b32.xlu2 %v5465_v0, %s9395_s22 }
 0x168   : > { %1104 = vrot.lane.b32.xlu0 %v5883_v52, %s9395_s22 }
 0x169   : > { %1741 = vmatmul.f32.gmra.mxu3 %v1421_v32  ;;  %v1452_v32 = vld [vmem:[%s9345_s5 + $0x60] sm:$0xff] }
 0x16a   : > { %4898 = vmatpush.msra.mxu2 %v1452_v32  ;;  %4897 = vmatpush.msra.mxu1 %v1452_v32 }
 0x16b   : > { %1559 = vmatpush.msrb.mxu0 %v1452_v32  ;;  %v1448_v32 = vld [vmem:[%s9345_s5 + $0x40] sm:$0xff] }
 0x16c   : > { %4900 = vmatpush.msra.mxu2 %v1451_v7  ;;  %4899 = vmatpush.msra.mxu1 %v1451_v7 }
 0x16d   : > { %1560 = vmatpush.msrb.mxu0 %v1451_v7 }
 0x16f   : > { %1204 = vrot.lane.b32.xlu1 %v5462_v62, %s9395_s22  ;;  %1212 = vrot.lane.b32.xlu2 %v5528_v45, %s9395_s22  ;;  %v1304_v42 = vpop.permute.xlu0 %1303  ;;  %v1306_v50 = vpop.permute.xlu1 %1305 }
 0x170   : > { %1202 = vrot.lane.b32.xlu0 %v5429_v44, %s9395_s22  ;;  %v1422_v53 = vsel %vm1375_vm2, %v5905_v16, %v1304_v42  ;;  %v5929_v42 = vsel %vm1017_vm6, %v1039_v2, %v1041_v43  ;;  %v2031_v2 = vld [vmem:[%s9347_s7 + $0x28] sm:$0xff]  ;;  %v1308_v43 = vpop.permute.xlu2 %1307 }
 0x171   : > { %1744 = vmatmul.f32.gmra.mxu3 %v1422_v53  ;;  %v1423_v48 = vsel %vm1375_vm2, %v5929_v42, %v1306_v50  ;;  %v1450_v53 = vld [vmem:[%s9345_s5 + $0x50] sm:$0xff]  ;;  %v1043_v50 = vrot.slane %v5570_v13, 1 }
 0x172   : > { %4902 = vmatpush.msra.mxu2 %v1450_v53  ;;  %2130 = vmatpush.msrb.mxu3 %v2031_v2 }
 0x173   : > { %4901 = vmatpush.msra.mxu1 %v1450_v53  ;;  %1561 = vmatpush.msrb.mxu0 %v1450_v53  ;;  %v5957_v2 = vsel %vm1017_vm6, %v1043_v50, %v1044_v27  ;;  %v1446_v53 = vld [vmem:[%s9345_s5 + $0x30] sm:$0xff]  ;;  %v1046_v50 = vrot.slane %v5579_v19, 1 }
 0x174   : > { %4904 = vmatpush.msra.mxu2 %v1449_v11  ;;  %v1424_v7 = vsel %vm1375_vm2, %v5957_v2, %v1308_v43 }
 0x175   : > { %4903 = vmatpush.msra.mxu1 %v1449_v11  ;;  %1562 = vmatpush.msrb.mxu0 %v1449_v11  ;;  %v5981_v19 = vsel %vm1017_vm6, %v1044_v27, %v1046_v50  ;;  %v1049_v27 = vrot.slane %v5633_v9, 1  ;;  %v1048_v50 = vrot.slane %v5627_v3, 1 }
 0x176   : > { %4906 = vmatpush.msra.mxu2 %v1448_v32 }
 0x177   : > { %1210 = vrot.lane.b32.xlu1 %v5498_v21, %s9395_s22  ;;  %1218 = vrot.lane.b32.xlu2 %v5576_v17, %s9395_s22 }
 0x178   : > { %1208 = vrot.lane.b32.xlu0 %v5495_v18, %s9395_s22  ;;  %4905 = vmatpush.msra.mxu1 %v1448_v32  ;;  %s5186_s22 = smov 126  }
 0x179   : > { %1747 = vmatmul.f32.gmra.mxu3 %v1423_v48  ;;  %v1447_v48 = vld [vmem:[%s9345_s5 + $0x38] sm:$0xff]  ;;  %1563 = vmatpush.msrb.mxu0 %v1448_v32  ;;  %v1442_v32 = vld [vmem:[%s9345_s5 + $0x10] sm:$0xff] }
 0x17a   : > { %4908 = vmatpush.msra.mxu2 %v1447_v48  ;;  %4907 = vmatpush.msra.mxu1 %v1447_v48 }
 0x17b   : > { %1564 = vmatpush.msrb.mxu0 %v1447_v48  ;;  %v1440_v48 = vld [vmem:[%s9345_s5] sm:$0xff] }
 0x17c   : > { %4910 = vmatpush.msra.mxu2 %v1446_v53  ;;  %4909 = vmatpush.msra.mxu1 %v1446_v53 }
 0x17d   : > { %1565 = vmatpush.msrb.mxu0 %v1446_v53  ;;  %v733_v53 = vadd.f32 %v5407_v26, %v5389_v20  ;;  %v1051_v20 = vrot.slane %v5636_v10, 1 }
 0x17e   : > { %4912 = vmatpush.msra.mxu2 %v1445_v36  ;;  %4911 = vmatpush.msra.mxu1 %v1445_v36 }
 0x17f   : > { %1216 = vrot.lane.b32.xlu1 %v5570_v13, %s9468_s25  ;;  %1222 = vrot.lane.b32.xlu2 %v5633_v9, %s9468_s25  ;;  %v1310_v43 = vpop.permute.xlu0 %1309  ;;  %v1052_v10 = vsel %vm1017_vm6, %v1049_v27, %v1051_v20 }
 0x180   : > { %1214 = vrot.lane.b32.xlu0 %v5531_v47, %s9468_s25  ;;  %4914 = vmatpush.msra.mxu2 %v1444_v51  ;;  %v1425_v11 = vsel %vm1375_vm2, %v5981_v19, %v1310_v43  ;;  %v736_v43 = vadd.f32 %v5407_v26, %v5396_v22  ;;  %v2029_v22 = vld [vmem:[%s9347_s7 + $0x18] sm:$0xff]  ;;  %v804_v26 = vmax.f32 %v733_v53, 0.0 }
 0x181   : > { %1750 = vmatmul.f32.gmra.mxu3 %v1424_v7  ;;  %v1443_v7 = vld [vmem:[%s9345_s5 + $0x18] sm:$0xff]  ;;  %4913 = vmatpush.msra.mxu1 %v1444_v51 }
 0x182   : > { %4916 = vmatpush.msra.mxu2 %v1443_v7  ;;  %1566 = vmatpush.msrb.mxu0 %v1445_v36 }
 0x183   : > { %4915 = vmatpush.msra.mxu1 %v1443_v7 }
 0x184   : > { %4918 = vmatpush.msra.mxu2 %v1442_v32  ;;  %1567 = vmatpush.msrb.mxu0 %v1444_v51  ;;  %v5019_v51 = vpack.i.bf16 %v5957_v2, %v5758_v39 }
 0x185   : > { %4917 = vmatpush.msra.mxu1 %v1442_v32 }
 0x186   : > { %1568 = vmatpush.msrb.mxu0 %v1443_v7  ;;  %v852_v7 = vsel %vm6019_vm8, %v804_v26, 0.0 }
 0x187   : > { %1076 = vrot.lane.b32.xlu1 %v5802_v54, %s9468_s25  ;;  %1080 = vrot.lane.b32.xlu2 %v5863_v28, %s9468_s25  ;;  %v2030_v54 = vld [vmem:[%s9347_s7 + $0x20] sm:$0xff]  ;;  %v1441_v28 = vld [vmem:[%s9345_s5 + $0x8] sm:$0xff] }
 0x188   : > { %1220 = vrot.lane.b32.xlu0 %v5627_v3, %s9468_s25  ;;  %2131 = vmatpush.msrb.mxu3 %v2030_v54  ;;  %v1050_v54 = vsel %vm1017_vm6, %v1048_v50, %v1049_v27  ;;  %v805_v50 = vmax.f32 %v736_v43, 0.0  ;;  %v5014_v27 = vpack.i.bf16 %v5929_v42, %v5714_v63 }
 0x189   : > { %1753 = vmatmul.f32.gmra.mxu3 %v1425_v11  ;;  %4920 = vmatpush.msra.mxu2 %v1441_v28 }
 0x18a   : > { %2132 = vmatpush.msrb.mxu3 %v2029_v22  ;;  %4919 = vmatpush.msra.mxu1 %v1441_v28  ;;  %v5034_v22 = vpack.i.bf16 %v1050_v54, %v5821_v31 }
 0x18b   : > { %4922 = vmatpush.msra.mxu2 %v1440_v48  ;;  %1569 = vmatpush.msrb.mxu0 %v1442_v32  ;;  %v901_v32 = vrot.slane %v852_v7, 7 }
 0x18c   : > { %4921 = vmatpush.msra.mxu1 %v1440_v48 }
 0x18d   : > { %1570 = vmatpush.msrb.mxu0 %v1441_v28 }
 0x18f   : > { %v1312_v11 = vpop.permute.xlu1 %1311  ;;  %1224 = vrot.lane.b32.xlu1 %v5675_v57, %s9468_s25  ;;  %1228 = vrot.lane.b32.xlu2 %v5711_v55, %s9468_s25 }
 0x190   : > { %1078 = vrot.lane.b32.xlu0 %v5826_v8, %s9468_s25  ;;  %v1426_v36 = vsel %vm1375_vm2, %v1050_v54, %v1312_v11  ;;  %v1314_v11 = vpop.permute.xlu2 %1313  ;;  %1571 = vmatpush.msrb.mxu0 %v1440_v48  ;;  %v2028_v48 = vld [vmem:[%s9347_s7 + $0x10] sm:$0xff] }
 0x191   : > { %1756 = vmatmul.f32.gmra.mxu3 %v1426_v36  ;;  %v853_v36 = vsel %vm6019_vm8, %v805_v50, 0.0  ;;  %v1427_v43 = vsel %vm1375_vm2, %v1052_v10, %v1314_v11  ;;  %v6051_v50 = vsel %vm900_vm5, 0.0, %v901_v32 }
 0x192   : > { %v902_v2 = vrot.slane %v853_v36, 7  ;;  %2133 = vmatpush.msrb.mxu3 %v2028_v48  ;;  %v1018_v11 = vrot.slane %v6051_v50, 1 }
 0x194   : > { %v6037_v53 = vsel %vm900_vm5, %v901_v32, %v902_v2 }
 0x195   : > { %v1019_v26 = vrot.slane %v6037_v53, 1 }
 0x197   : > { %1082 = vrot.lane.b32.xlu1 %v5886_v35, %s9468_s25  ;;  %5020 = vrot.lane.b32.xlu2 %v5019_v51, %s9468_s25  ;;  %v6040_v35 = vsel %vm900_vm5, %v902_v2, 0.0 }
 0x198   : > { %1226 = vrot.lane.b32.xlu0 %v5678_v1, %s9468_s25  ;;  %v1021_v20 = vrot.slane %v6040_v35, 1  ;;  %v1320_v54 = vpop.permute.xlu2 %1319 }
 0x199   : > { %1759 = vmatmul.f32.gmra.mxu3 %v1427_v43  ;;  %v1020_v43 = vsel %vm1017_vm6, %v1018_v11, %v1019_v26 }
 0x19a   : > { %v1022_v51 = vsel %vm1017_vm6, %v1019_v26, %v1021_v20  ;;  %v5024_v2 = vpack.i.bf16 %v5768_v14, %v1020_v43  ;;  %v1468_v20 = vld [vmem:[%s9345_s5 + $0xe0] sm:$0xff] }
 0x19b   : > { %v5029_v36 = vpack.i.bf16 %v1022_v51, %v5981_v19  ;;  %v1465_v51 = vld [vmem:[%s9345_s5 + $0xc8] sm:$0xff] }
 0x19f   : > { %5015 = vrot.lane.b32.xlu1 %v5014_v27, %s9468_s25  ;;  %5035 = vrot.lane.b32.xlu2 %v5034_v22, %s9468_s25  ;;  %v1316_v28 = vpop.permute.xlu0 %1315  ;;  %v1318_v7 = vpop.permute.xlu1 %1317  ;;  %v2027_v27 = vld [vmem:[%s9347_s7 + $0x8] sm:$0xff]  ;;  %v2026_v22 = vld [vmem:[%s9347_s7] sm:$0xff] }
 0x1a0   : > { %1084 = vrot.lane.b32.xlu0 %v5905_v16, %s9468_s25  ;;  %v1428_v42 = vsel %vm1375_vm2, %v5785_v12, %v1316_v28  ;;  %v1429_v12 = vsel %vm1375_vm2, %v5849_v46, %v1318_v7  ;;  %2134 = vmatpush.msrb.mxu3 %v2027_v27  ;;  %v1430_v46 = vsel %vm1375_vm2, %v5843_v23, %v1320_v54  ;;  %v1467_v54 = vld [vmem:[%s9345_s5 + $0xd8] sm:$0xff]  ;;  %v1261_v27 = vrot.slane %v5821_v31, 1 }
 0x1a1   : > { %1762 = vmatmul.f32.gmra.mxu3 %v1428_v42 }
 0x1a2   : > { %2135 = vmatpush.msrb.mxu3 %v2026_v22 }
 0x1a7   : > { %1074 = vrot.lane.b32.xlu2 %v5761_v56, %s9468_s25  ;;  %5030 = vrot.lane.b32.xlu1 %v5029_v36, %s9468_s25  ;;  %v5039_v56 = vpack.i.bf16 %v5832_v4, %v5746_v5  ;;  %v1471_v5 = vld [vmem:[%s9345_s5 + $0xf8] sm:$0xff]  ;;  %v1464_v36 = vld [vmem:[%s9345_s5 + $0xc0] sm:$0xff] }
 0x1a8   : > { %5025 = vrot.lane.b32.xlu0 %v5024_v2, %s9468_s25  ;;  %1633 = vmatpush.msrb.mxu2 %v1471_v5  ;;  %v1463_v2 = vld [vmem:[%s9345_s5 + $0xb8] sm:$0xff] }
 0x1a9   : > { %v5001_v16 = vpop.permute.xlu2 %5000  ;;  %1765 = vmatmul.f32.gmra.mxu3 %v1429_v12  ;;  %v1262_v12 = vrot.slane %v5832_v4, 1 }
 0x1aa   : > { %v5002_v32 = vunpack.i.l.bf16 %v5001_v16  ;;  %v5003_v26 = vunpack.i.h.bf16 %v5001_v16 }
 0x1ab   : > { %v6138_v5 = vsel %vm1017_vm6, %v1261_v27, %v1262_v12  ;;  %v2002_v27 = vld [vmem:[%s6183_s19] sm:$0xff] }
 0x1ac   : > { %v6072_v19 = vsel %vm1375_vm2, %v5675_v57, %v5002_v32  ;;  %v1433_v11 = vsel %vm1375_vm2, %v5876_v25, %v5003_v26  ;;  %v1462_v25 = vld [vmem:[%s9345_s5 + $0xb0] sm:$0xff] }
 0x1ad   : > { %1614 = vmatmul.f32.vlgmr.msra.gmra.mxu2 %v6072_v19 }
 0x1af   : > { %1094 = vrot.lane.b32.xlu1 %v1052_v10, %s9468_s25  ;;  %v1322_v57 = vpop.permute.xlu0 %1321  ;;  %v1470_v10 = vld [vmem:[%s9345_s5 + $0xf0] sm:$0xff] }
 0x1b0   : > { %5040 = vrot.lane.b32.xlu0 %v5039_v56, %s9468_s25  ;;  %v1431_v28 = vsel %vm1375_vm2, %v5818_v61, %v1322_v57  ;;  %1634 = vmatpush.msrb.mxu2 %v1470_v10  ;;  %v1469_v61 = vld [vmem:[%s9345_s5 + $0xe8] sm:$0xff] }
 0x1b1   : > { %1768 = vmatmul.f32.gmra.mxu3 %v1430_v46  ;;  %v1103_v7 = vpop.permute.xlu2 %1102  ;;  %v1461_v56 = vld [vmem:[%s9345_s5 + $0xa8] sm:$0xff]  ;;  %v1460_v46 = vld [vmem:[%s9345_s5 + $0xa0] sm:$0xff] }
 0x1b2   : > { %1635 = vmatpush.msrb.mxu2 %v1469_v61  ;;  %v1459_v61 = vld [vmem:[%s9345_s5 + $0x98] sm:$0xff] }
 0x1b4   : > { %1636 = vmatpush.msrb.mxu2 %v1468_v20  ;;  %v1458_v20 = vld [vmem:[%s9345_s5 + $0x90] sm:$0xff] }
 0x1b6   : > { %1637 = vmatpush.msrb.mxu2 %v1467_v54 }
 0x1b9   : > { %1771 = vmatmul.f32.gmra.mxu3 %v1431_v28 }
 0x1bf   : > { %v1324_v23 = vpop.permute.xlu1 %1323 }
 0x1c0   : > { %v1432_v48 = vsel %vm1375_vm2, %v5883_v52, %v1324_v23  ;;  %v1466_v52 = vld [vmem:[%s9345_s5 + $0xd0] sm:$0xff] }
 0x1c1   : > { %1774 = vmatmul.f32.gmra.mxu3 %v1432_v48  ;;  %1638 = vmatpush.msrb.mxu2 %v1466_v52  ;;  %v6146_v48 = vpop.permute.xlu2 %1200 }
 0x1c3   : > { %1639 = vmatpush.msrb.mxu2 %v1465_v51  ;;  %v1457_v51 = vld [vmem:[%s9345_s5 + $0x88] sm:$0xff] }
 0x1c4   : > { %v6103_v42 = vpop.f32.mrf.mxu3 }
 0x1c5   : > { %9471 = vst [vmem:[#allocation29_spill] sm:$0xff] %v6103_v42  ;;  %1640 = vmatpush.msrb.mxu2 %v1464_v36  ;;  %v1456_v36 = vld [vmem:[%s9345_s5 + $0x80] sm:$0xff] }
 0x1c7   : > { %1641 = vmatpush.msrb.mxu2 %v1463_v2 }
 0x1c9   : > { %1777 = vmatmul.f32.gmra.mxu3 %v1433_v11  ;;  %1642 = vmatpush.msrb.mxu2 %v1462_v25 }
 0x1cb   : > { %1643 = vmatpush.msrb.mxu2 %v1461_v56 }
 0x1cc   : > { %v6119_v43 = vpop.f32.mrf.mxu3 }
 0x1cd   : > { %9472 = vst [vmem:[#allocation30_spill] sm:$0xff] %v6119_v43  ;;  %1644 = vmatpush.msrb.mxu2 %v1460_v46  ;;  %v6190_v46 = vsel %vm1375_vm2, %v5714_v63, %v1103_v7 }
 0x1cf   : > { %1645 = vmatpush.msrb.mxu2 %v1459_v61  ;;  %v2003_v61 = vld [vmem:[%s6183_s19 + $0x8] sm:$0xff] }
 0x1d1   : > { %v5011_v16 = vpop.permute.xlu1 %5010  ;;  %1646 = vmatpush.msrb.mxu2 %v1458_v20 }
 0x1d2   : > { %v5006_v32 = vpop.permute.xlu0 %5005  ;;  %v5013_v26 = vunpack.i.h.bf16 %v5011_v16  ;;  %v5012_v54 = vunpack.i.l.bf16 %v5011_v16 }
 0x1d3   : > { %v5008_v57 = vunpack.i.h.bf16 %v5006_v32  ;;  %v5007_v22 = vunpack.i.l.bf16 %v5006_v32  ;;  %1647 = vmatpush.msrb.mxu2 %v1457_v51  ;;  %v6179_v32 = vpop.permute.xlu2 %1206 }
 0x1d4   : > { %v6135_v28 = vpop.f32.mrf.mxu3 }
 0x1d5   : > { %9473 = vst [vmem:[#allocation31_spill] sm:$0xff] %v6135_v28  ;;  %v6142_v10 = vsel %vm1375_vm2, %v5678_v1, %v5007_v22  ;;  %v1434_v23 = vsel %vm1375_vm2, %v6138_v5, %v5008_v57  ;;  %v1264_v1 = vrot.slane %v5835_v33, 1  ;;  %v6169_v33 = vsel %vm1375_vm2, %v5711_v55, %v5012_v54  ;;  %1648 = vmatpush.msrb.mxu2 %v1456_v36  ;;  %v2004_v54 = vld [vmem:[%s6183_s19 + $0x10] sm:$0xff] }
 0x1d6   : > { %1617 = vmatmul.f32.gmra.mxu2 %v6142_v10  ;;  %1780 = vmatmul.f32.gmra.mxu3 %v1434_v23 }
 0x1d7   : > { %v6165_v25 = vsel %vm1017_vm6, %v1262_v12, %v1264_v1  ;;  %v628_v1 = vld [vmem:[%s5355_s20 + $0xb0] sm:$0xff] }
 0x1d8   : > { %v1435_v16 = vsel %vm1375_vm2, %v6165_v25, %v5013_v26  ;;  %4767 = vmatmul.msk.f32.gmra.mxu0 %vm9480_vm13, %v628_v1 }
 0x1d9   : > { %v1107_v52 = vpop.permute.xlu1 %1106 }
 0x1da   : > { %v1105_v11 = vpop.permute.xlu0 %1104 }
 0x1db   : > { %v6196_v22 = vpop.permute.xlu2 %1212  ;;  %v6206_v26 = vsel %vm1375_vm2, %v5758_v39, %v1105_v11  ;;  %v6223_v39 = vsel %vm1375_vm2, %v5768_v14, %v1107_v52  ;;  %v1130_v11 = vrot.slane %v6037_v53, 2  ;;  %v2005_v14 = vld [vmem:[%s6183_s19 + $0x18] sm:$0xff] }
 0x1dc   : > { %v6162_v2 = vpop.f32.mrf.mxu3 }
 0x1dd   : > { %9474 = vst [vmem:[#allocation32_spill] sm:$0xff] %v6162_v2 }
 0x1de   : > { %1620 = vmatmul.f32.gmra.mxu2 %v6169_v33  ;;  %1783 = vmatmul.f32.gmra.mxu3 %v1435_v16  ;;  %v629_v16 = vld [vmem:[%s5355_s20 + $0xb8] sm:$0xff]  ;;  %s4737_s20 = sshll.u32 %s9847_s14, 1  ;;  %s4597_s14 = scalar_lea.sflag [#allocation3], %s488_s30 }
 0x1e0   : > { %4768 = vmatmul.msk.f32.gmra.mxu0 %vm9480_vm13, %v629_v16  ;;  %vm9483_vm13 = vcmask 1045504  }
 0x1e1   : > { %v1205_v55 = vpop.permute.xlu1 %1204 }
 0x1e2   : > { %v1203_v12 = vpop.permute.xlu0 %1202 }
 0x1e3   : > { %v6216_v51 = vpop.permute.xlu2 %1218 }
 0x1e4   : > { %v6186_v56 = vpop.f32.mrf.mxu3 }
 0x1e5   : > { %9478 = vst [vmem:[#allocation33_spill] sm:$0xff] %v6186_v56 }
 0x1e6   : > { %1623 = vmatmul.f32.gmra.mxu2 %v6190_v46  ;;  %4790 = vmatmul.msk.f32.vlgmr.msrb.gmra.mxu3 %vm2043_vm11, %v2002_v27 }
 0x1e9   : > { %v6194_v57 = vpop.permute.xlu1 %1210 }
 0x1ea   : > { %v6198_v23 = vpop.permute.xlu0 %1208 }
 0x1ec   : > { %v6201_v20 = vpop.f32.mrf.mxu3 }
 0x1ed   : > { %9479 = vst [vmem:[#allocation34_spill] sm:$0xff] %v6201_v20  ;;  %v6243_v20 = vpop.permute.xlu2 %1222 }
 0x1ee   : > { %1626 = vmatmul.f32.gmra.mxu2 %v6206_v26  ;;  %4791 = vmatmul.msk.f32.gmra.mxu3 %vm2043_vm11, %v2003_v61 }
 0x1f1   : > { %v6211_v63 = vpop.permute.xlu1 %1216 }
 0x1f2   : > { %v6213_v7 = vpop.permute.xlu0 %1214 }
 0x1f4   : > { %v6218_v36 = vpop.f32.mrf.mxu3 }
 0x1f5   : > { %9481 = vst [vmem:[#allocation35_spill] sm:$0xff] %v6218_v36  ;;  %v1129_v36 = vrot.slane %v6051_v50, 2 }
 0x1f6   : > { %1629 = vmatmul.f32.gmra.mxu2 %v6223_v39  ;;  %4792 = vmatmul.msk.f32.gmra.mxu3 %vm2043_vm11, %v2004_v54 }
 0x1f7   : > { %v1131_v16 = vsel %vm9483_vm13, %v1129_v36, %v1130_v11 }
 0x1f8   : > { %v1396_v54 = vsel %vm1375_vm2, %v1131_v16, %v6146_v48 }
 0x1f9   : > { %v1077_v27 = vpop.permute.xlu1 %1076 }
 0x1fa   : > { %v6229_v61 = vpop.permute.xlu0 %1220  ;;  %v6233_v1 = vsel %vm1375_vm2, %v5462_v62, %v1077_v27  ;;  %v1132_v62 = vrot.slane %v6040_v35, 2  ;;  %v1081_v35 = vpop.permute.xlu2 %1080 }
 0x1fb   : > { %1584 = vmatmul.f32.vlgmr.msra.gmra.mxu1 %v6233_v1 }
 0x1fc   : > { %v6238_v52 = vpop.f32.mrf.mxu3  ;;  %v1133_v48 = vsel %vm9483_vm13, %v1130_v11, %v1132_v62  ;;  %v1398_v11 = vsel %vm1375_vm2, %v5436_v49, %v1205_v55 }
 0x1fd   : > { %9482 = vst [vmem:[#allocation36_spill] sm:$0xff] %v6238_v52  ;;  %v2006_v52 = vld [vmem:[%s6183_s19 + $0x20] sm:$0xff]  ;;  %v1397_v16 = vsel %vm1375_vm2, %v1133_v48, %v1203_v12  ;;  %v1503_v12 = vld [vmem:[%s9345_s5 + $0x1f8] sm:$0xff] }
 0x1fe   : > { %1649 = vmatmul.f32.vlgmr.msrb.gmra.mxu2 %v1396_v54  ;;  %4793 = vmatmul.msk.f32.gmra.mxu3 %vm2043_vm11, %v2005_v14  ;;  %v1500_v48 = vld [vmem:[%s9345_s5 + $0x1e0] sm:$0xff] }
 0x1ff   : > { %1787 = vmatpush.msrb.mxu1 %v1503_v12  ;;  %v1499_v12 = vld [vmem:[%s9345_s5 + $0x1d8] sm:$0xff] }
 0x201   : > { %v6247_v27 = vpop.permute.xlu1 %1224 }
 0x202   : > { %v1079_v56 = vpop.permute.xlu0 %1078  ;;  %v6285_v49 = vpop.permute.xlu2 %1228 }
 0x203   : > { %v6251_v2 = vsel %vm1375_vm2, %v5465_v0, %v1079_v56  ;;  %v6264_v0 = vsel %vm1375_vm2, %v5495_v18, %v1081_v35  ;;  %v2007_v56 = vld [vmem:[%s6183_s19 + $0x28] sm:$0xff]  ;;  %v1502_v18 = vld [vmem:[%s9345_s5 + $0x1f0] sm:$0xff] }
 0x204   : > { %1587 = vmatmul.f32.gmra.mxu1 %v6251_v2  ;;  %v6255_v36 = vpop.f32.mrf.mxu3 }
 0x205   : > { %9484 = vst [vmem:[#allocation37_spill] sm:$0xff] %v6255_v36  ;;  %1788 = vmatpush.msrb.mxu1 %v1502_v18 }
 0x206   : > { %1652 = vmatmul.f32.gmra.mxu2 %v1397_v16  ;;  %4794 = vmatmul.msk.f32.gmra.mxu3 %vm2043_vm11, %v2006_v52  ;;  %v1501_v52 = vld [vmem:[%s9345_s5 + $0x1e8] sm:$0xff]  ;;  %v2008_v16 = vld [vmem:[%s6183_s19 + $0x30] sm:$0xff] }
 0x207   : > { %1789 = vmatpush.msrb.mxu1 %v1501_v52 }
 0x209   : > { %v1083_v14 = vpop.permute.xlu1 %1082  ;;  %1790 = vmatpush.msrb.mxu1 %v1500_v48 }
 0x20a   : > { %v6260_v54 = vpop.permute.xlu0 %1226  ;;  %v6289_v55 = vsel %vm1375_vm2, %v5498_v21, %v1083_v14  ;;  %v1498_v21 = vld [vmem:[%s9345_s5 + $0x1d0] sm:$0xff]  ;;  %v1497_v14 = vld [vmem:[%s9345_s5 + $0x1c8] sm:$0xff] }
 0x20b   : > { %1791 = vmatpush.msrb.mxu1 %v1499_v12  ;;  %v1495_v12 = vld [vmem:[%s9345_s5 + $0x1b8] sm:$0xff] }
 0x20c   : > { %1590 = vmatmul.f32.gmra.mxu1 %v6264_v0  ;;  %v6268_v36 = vpop.f32.mrf.mxu3 }
 0x20d   : > { %9485 = vst [vmem:[#allocation38_spill] sm:$0xff] %v6268_v36  ;;  %1792 = vmatpush.msrb.mxu1 %v1498_v21  ;;  %v1400_v21 = vsel %vm1375_vm2, %v5471_v6, %v6198_v23  ;;  %v1493_v23 = vld [vmem:[%s9345_s5 + $0x1a8] sm:$0xff] }
 0x20e   : > { %1655 = vmatmul.f32.gmra.mxu2 %v1398_v11  ;;  %4795 = vmatmul.msk.f32.gmra.mxu3 %vm2043_vm11, %v2007_v56  ;;  %v1399_v11 = vsel %vm1375_vm2, %v5454_v59, %v6179_v32  ;;  %v1496_v59 = vld [vmem:[%s9345_s5 + $0x1c0] sm:$0xff] }
 0x20f   : > { %1793 = vmatpush.msrb.mxu1 %v1497_v14 }
 0x211   : > { %v6292_v35 = vpop.permute.xlu1 %5015  ;;  %1794 = vmatpush.msrb.mxu1 %v1496_v59 }
 0x212   : > { %v1085_v62 = vpop.permute.xlu0 %1084  ;;  %v5018_v14 = vunpack.i.h.bf16 %v6292_v35 }
 0x213   : > { %v6318_v52 = vsel %vm1375_vm2, %v5528_v45, %v1085_v62  ;;  %v6332_v45 = vpop.permute.xlu2 %5020  ;;  %1795 = vmatpush.msrb.mxu1 %v1495_v12  ;;  %v2010_v12 = vld [vmem:[%s6183_s19 + $0x40] sm:$0xff] }
 0x214   : > { %1593 = vmatmul.f32.gmra.mxu1 %v6289_v55  ;;  %v6295_v56 = vpop.f32.mrf.mxu3  ;;  %v5022_v8 = vunpack.i.l.bf16 %v6332_v45 }
 0x215   : > { %9486 = vst [vmem:[#allocation39_spill] sm:$0xff] %v6295_v56 }
 0x216   : > { %1658 = vmatmul.f32.gmra.mxu2 %v1399_v11  ;;  %4796 = vmatmul.msk.f32.gmra.mxu3 %vm2043_vm11, %v2008_v16  ;;  %v2009_v16 = vld [vmem:[%s6183_s19 + $0x38] sm:$0xff] }
 0x219   : > { %v5031_v62 = vpop.permute.xlu1 %5030 }
 0x21a   : > { %v6310_v18 = vpop.permute.xlu0 %5025  ;;  %v5033_v59 = vunpack.i.h.bf16 %v5031_v62 }
 0x21b   : > { %v5027_v32 = vunpack.i.l.bf16 %v6310_v18 }
 0x21c   : > { %1596 = vmatmul.f32.gmra.mxu1 %v6318_v52  ;;  %v6321_v48 = vpop.f32.mrf.mxu3 }
 0x21d   : > { %9487 = vst [vmem:[#allocation40_spill] sm:$0xff] %v6321_v48  ;;  %v1376_v11 = vsel %vm1375_vm2, %v6051_v50, %v5027_v32  ;;  %v1494_v50 = vld [vmem:[%s9345_s5 + $0x1b0] sm:$0xff]  ;;  %v1492_v32 = vld [vmem:[%s9345_s5 + $0x1a0] sm:$0xff]  ;;  %v1401_v48 = vsel %vm1375_vm2, %v5487_v15, %v6194_v57  ;;  %v1489_v57 = vld [vmem:[%s9345_s5 + $0x188] sm:$0xff] }
 0x21e   : > { %1572 = vmatmul.f32.vlgmr.msrb.gmra.mxu0 %v1376_v11  ;;  %1661 = vmatmul.f32.gmra.mxu2 %v1400_v21  ;;  %v6347_v11 = vsel %vm1375_vm2, %v5531_v47, %v5018_v14  ;;  %v1491_v21 = vld [vmem:[%s9345_s5 + $0x198] sm:$0xff]  ;;  %v5023_v14 = vunpack.i.h.bf16 %v6332_v45 }
 0x21f   : > { %4797 = vmatmul.msk.f32.gmra.mxu3 %vm2043_vm11, %v2009_v16  ;;  %1796 = vmatpush.msrb.mxu1 %v1494_v50  ;;  %v1377_v50 = vsel %vm1375_vm2, %v6037_v53, %v5033_v59  ;;  %v6368_v53 = vpop.permute.xlu2 %5035 }
 0x221   : > { %1797 = vmatpush.msrb.mxu1 %v1493_v23  ;;  %v1490_v23 = vld [vmem:[%s9345_s5 + $0x190] sm:$0xff] }
 0x222   : > { %v6361_v47 = vpop.permute.xlu0 %5040 }
 0x223   : > { %1798 = vmatpush.msrb.mxu1 %v1492_v32  ;;  %v5042_v59 = vunpack.i.l.bf16 %v6361_v47  ;;  %v6379_v32 = vsel %vm1375_vm2, %v5570_v13, %v5023_v14  ;;  %v5032_v13 = vunpack.i.l.bf16 %v5031_v62  ;;  %v5038_v62 = vunpack.i.h.bf16 %v6368_v53 }
 0x224   : > { %1599 = vmatmul.f32.gmra.mxu1 %v6347_v11  ;;  %v6350_v16 = vpop.f32.mrf.mxu3 }
 0x225   : > { %9488 = vst [vmem:[#allocation41_spill] sm:$0xff] %v6350_v16  ;;  %1799 = vmatpush.msrb.mxu1 %v1491_v21  ;;  %v2011_v21 = vld [vmem:[%s6183_s19 + $0x48] sm:$0xff]  ;;  %v1402_v16 = vsel %vm1375_vm2, %v5504_v30, %v6196_v22 }
 0x226   : > { %1575 = vmatmul.f32.gmra.mxu0 %v1377_v50  ;;  %1664 = vmatmul.f32.gmra.mxu2 %v1401_v48  ;;  %v1488_v48 = vld [vmem:[%s9345_s5 + $0x180] sm:$0xff]  ;;  %v1511_v50 = vld [vmem:[%s9345_s5 + $0x238] sm:$0xff] }
 0x227   : > { %4798 = vmatmul.msk.f32.gmra.mxu3 %vm2043_vm11, %v2010_v12  ;;  %1800 = vmatpush.msrb.mxu1 %v1490_v23  ;;  %v1378_v23 = vsel %vm1375_vm2, %v5425_v40, %v5042_v59  ;;  %v1075_v14 = vpop.permute.xlu2 %1074  ;;  %v2012_v59 = vld [vmem:[%s6183_s19 + $0x50] sm:$0xff] }
 0x228   : > { %1872 = vmatpush.msra.mxu2 %v1511_v50  ;;  %v1379_v22 = vsel %vm1375_vm2, %v5429_v44, %v1075_v14  ;;  %v1510_v50 = vld [vmem:[%s9345_s5 + $0x230] sm:$0xff]  ;;  %v2015_v14 = vld [vmem:[%s6183_s19 + $0x68] sm:$0xff] }
 0x229   : > { %1801 = vmatpush.msrb.mxu1 %v1489_v57  ;;  %v6396_v57 = vsel %vm1375_vm2, %v5576_v17, %v5032_v13  ;;  %v6411_v17 = vsel %vm1375_vm2, %v5627_v3, %v5038_v62  ;;  %v1509_v62 = vld [vmem:[%s9345_s5 + $0x228] sm:$0xff] }
 0x22a   : > { %1873 = vmatpush.msra.mxu2 %v1510_v50 }
 0x22b   : > { %1802 = vmatpush.msrb.mxu1 %v1488_v48  ;;  %v2013_v48 = vld [vmem:[%s6183_s19 + $0x58] sm:$0xff] }
 0x22c   : > { %1602 = vmatmul.f32.gmra.mxu1 %v6379_v32  ;;  %v6382_v12 = vpop.f32.mrf.mxu3  ;;  %1874 = vmatpush.msra.mxu2 %v1509_v62  ;;  %v5017_v62 = vunpack.i.l.bf16 %v6292_v35 }
 0x22d   : > { %9489 = vst [vmem:[#allocation42_spill] sm:$0xff] %v6382_v12 }
 0x22e   : > { %1578 = vmatmul.f32.gmra.mxu0 %v1378_v23  ;;  %1667 = vmatmul.f32.gmra.mxu2 %v1402_v16  ;;  %v1403_v16 = vsel %vm1375_vm2, %v5520_v41, %v6213_v7  ;;  %v1404_v7 = vsel %vm1375_vm2, %v5544_v60, %v6211_v63  ;;  %v2014_v23 = vld [vmem:[%s6183_s19 + $0x60] sm:$0xff]  ;;  %v1405_v63 = vsel %vm1375_vm2, %v5541_v58, %v6216_v51  ;;  %v2016_v51 = vld [vmem:[%s6183_s19 + $0x70] sm:$0xff] }
 0x22f   : > { %4799 = vmatmul.msk.f32.gmra.mxu3 %vm2043_vm11, %v2011_v21  ;;  %v1095_v21 = vpop.permute.xlu1 %1094 }
 0x230   : > { %v6426_v3 = vsel %vm1375_vm2, %v5633_v9, %v1095_v21  ;;  %v1406_v9 = vsel %vm1375_vm2, %v5592_v37, %v6229_v61  ;;  %v2018_v21 = vld [vmem:[%s6183_s19 + $0x80] sm:$0xff] }
 0x234   : > { %1605 = vmatmul.f32.gmra.mxu1 %v6396_v57  ;;  %v6399_v40 = vpop.f32.mrf.mxu3 }
 0x235   : > { %9490 = vst [vmem:[#allocation43_spill] sm:$0xff] %v6399_v40 }
 0x236   : > { %1581 = vmatmul.f32.gmra.mxu0 %v1379_v22  ;;  %1670 = vmatmul.f32.gmra.mxu2 %v1403_v16 }
 0x237   : > { %4800 = vmatmul.msk.f32.gmra.mxu3 %vm2043_vm11, %v2012_v59  ;;  %v6442_v59 = vpop.f32.mrf.mxu2 }
 0x238   : > { %9493 = vst [vmem:[#allocation46_spill] sm:$0xff] %v6442_v59 }
 0x23c   : > { %1608 = vmatmul.f32.gmra.mxu1 %v6411_v17  ;;  %v6415_v44 = vpop.f32.mrf.mxu3 }
 0x23d   : > { %9491 = vst [vmem:[#allocation44_spill] sm:$0xff] %v6415_v44 }
 0x23e   : > { %1673 = vmatmul.f32.gmra.mxu2 %v1404_v7 }
 0x23f   : > { %4801 = vmatmul.msk.f32.gmra.mxu3 %vm2043_vm11, %v2013_v48  ;;  %v1408_v48 = vsel %vm1375_vm2, %v5652_v34, %v6247_v27  ;;  %v6477_v27 = vld [vmem:[%s9348_s8] ss:$0 sm:$0xff] }
 0x244   : > { %1611 = vmatmul.f32.gmra.mxu1 %v6426_v3  ;;  %v6433_v13 = vpop.f32.mrf.mxu3 }
 0x245   : > { %9492 = vst [vmem:[#allocation45_spill] sm:$0xff] %v6433_v13  ;;  %v9511_v13 = vld [vmem:[#allocation25_spill] sm:$0xff] }
 0x246   : > { %1676 = vmatmul.f32.gmra.mxu2 %v1405_v63 }
 0x247   : > { %4802 = vmatmul.msk.f32.gmra.mxu3 %vm2043_vm11, %v2014_v23 }
 0x24c   : > { %1803 = vmatmul.f32.vlgmr.msrb.gmra.mxu1 %v6233_v1  ;;  %v6444_v22 = vpop.f32.mrf.mxu3  ;;  %v1407_v1 = vsel %vm1375_vm2, %v5595_v38, %v6243_v20 }
 0x24d   : > { %9494 = vst [vmem:[#allocation47_spill] sm:$0xff] %v6444_v22  ;;  %v2024_v22 = vld [vmem:[%s6183_s19 + $0xb0] sm:$0xff] }
 0x24e   : > { %1679 = vmatmul.f32.gmra.mxu2 %v1406_v9  ;;  %v9499_v9 = vld [vmem:[#allocation19_spill] sm:$0xff] }
 0x24f   : > { %4803 = vmatmul.msk.f32.gmra.mxu3 %vm2043_vm11, %v2015_v14  ;;  %v2019_v14 = vld [vmem:[%s6183_s19 + $0x88] sm:$0xff] }
 0x254   : > { %1806 = vmatmul.f32.gmra.mxu1 %v6251_v2  ;;  %v2017_v2 = vld [vmem:[%s6183_s19 + $0x78] sm:$0xff] }
 0x256   : > { %1682 = vmatmul.f32.gmra.mxu2 %v1407_v1 }
 0x257   : > { %4804 = vmatmul.msk.f32.gmra.mxu3 %vm2043_vm11, %v2016_v51  ;;  %v1410_v51 = vsel %vm1375_vm2, %v9499_v9, %v6285_v49 }
 0x259   : > { %v6452_v16 = vpop.f32.mrf.mxu2  ;;  %v6454_v61 = vpop.f32.mrf.mxu3 }
 0x25a   : > { %9495 = vst [vmem:[#allocation48_spill] sm:$0xff] %v6454_v61 }
 0x25c   : > { %1809 = vmatmul.f32.gmra.mxu1 %v6264_v0  ;;  %v1409_v0 = vsel %vm1375_vm2, %v5649_v29, %v6260_v54 }
 0x25e   : > { %1685 = vmatmul.f32.gmra.mxu2 %v1408_v48 }
 0x25f   : > { %4805 = vmatmul.msk.f32.gmra.mxu3 %vm2043_vm11, %v2017_v2 }
 0x261   : > { %v6465_v20 = vpop.f32.mrf.mxu2  ;;  %v6467_v7 = vpop.f32.mrf.mxu3 }
 0x262   : > { %9496 = vst [vmem:[#allocation49_spill] sm:$0xff] %v6465_v20 }
 0x263   : > { %9497 = vst [vmem:[#allocation50_spill] sm:$0xff] %v6467_v7 }
 0x264   : > { %1812 = vmatmul.f32.gmra.mxu1 %v6289_v55  ;;  %v1508_v55 = vld [vmem:[%s9345_s5 + $0x220] sm:$0xff] }
 0x265   : > { %1875 = vmatpush.msra.mxu2 %v1508_v55 }
 0x266   : > { %1688 = vmatmul.f32.gmra.mxu2 %v1409_v0 }
 0x267   : > { %4806 = vmatmul.msk.f32.gmra.mxu3 %vm2043_vm11, %v2018_v21 }
 0x269   : > { %v6480_v50 = vpop.f32.mrf.mxu2  ;;  %v2137_v23 = vpop.f32.mrf.mxu3 }
 0x26a   : > { %9498 = vst [vmem:[#allocation51_spill] sm:$0xff] %v6480_v50  ;;  %v2138_v63 = vadd.f32 %v6477_v27, %v2137_v23  ;;  %v2020_v23 = vld [vmem:[%s6183_s19 + $0x90] sm:$0xff] }
 0x26c   : > { %v2209_v54 = vmax.f32 %v2138_v63, 0.0  ;;  %1815 = vmatmul.f32.gmra.mxu1 %v6318_v52  ;;  %v9501_v63 = vld [vmem:[#allocation18_spill] sm:$0xff] }
 0x26d   : > { %v1411_v49 = vsel %vm1375_vm2, %v9501_v63, %v5017_v62 }
 0x26e   : > { %1691 = vmatmul.f32.gmra.mxu2 %v1410_v51  ;;  %v2233_v1 = vsel %vm6019_vm8, %v2209_v54, 0.0 }
 0x26f   : > { %4807 = vmatmul.msk.f32.gmra.mxu3 %vm2043_vm11, %v2019_v14  ;;  %v2281_v0 = vrot.slane %v2233_v1, 7  ;;  %v1507_v14 = vld [vmem:[%s9345_s5 + $0x218] sm:$0xff] }
 0x270   : > { %1876 = vmatpush.msra.mxu2 %v1507_v14 }
 0x271   : > { %v6495_v2 = vpop.f32.mrf.mxu2  ;;  %v2140_v48 = vpop.f32.mrf.mxu3  ;;  %v6505_v54 = vsel %vm900_vm5, 0.0, %v2281_v0 }
 0x272   : > { %9500 = vst [vmem:[#allocation19_spill] sm:$0xff] %v6495_v2  ;;  %v2141_v21 = vadd.f32 %v6477_v27, %v2140_v48  ;;  %v1504_v2 = vld [vmem:[%s9345_s5 + $0x200] sm:$0xff] }
 0x274   : > { %v2210_v52 = vmax.f32 %v2141_v21, 0.0  ;;  %1818 = vmatmul.f32.gmra.mxu1 %v6347_v11  ;;  %v2888_v11 = vld [vmem:[%s9349_s9 + $0x238] sm:$0xff]  ;;  %v1506_v21 = vld [vmem:[%s9345_s5 + $0x210] sm:$0xff] }
 0x275   : > { %3249 = vmatpush.msra.mxu3 %v2888_v11  ;;  %1877 = vmatpush.msra.mxu2 %v1506_v21  ;;  %v2021_v11 = vld [vmem:[%s6183_s19 + $0x98] sm:$0xff] }
 0x276   : > { %v2234_v55 = vsel %vm6019_vm8, %v2210_v52, 0.0  ;;  %1694 = vmatmul.f32.gmra.mxu2 %v1411_v49  ;;  %v2887_v52 = vld [vmem:[%s9349_s9 + $0x230] sm:$0xff]  ;;  %v2397_v49 = vrot.slane %v6505_v54, 1 }
 0x277   : > { %v2282_v35 = vrot.slane %v2234_v55, 7  ;;  %4808 = vmatmul.msk.f32.gmra.mxu3 %vm2043_vm11, %v2020_v23 }
 0x278   : > { %3250 = vmatpush.msra.mxu3 %v2887_v52  ;;  %v9503_v52 = vld [vmem:[#allocation21_spill] sm:$0xff] }
 0x279   : > { %v6516_v51 = vsel %vm900_vm5, %v2282_v35, 0.0  ;;  %v6518_v1 = vpop.f32.mrf.mxu2  ;;  %v2143_v62 = vpop.f32.mrf.mxu3  ;;  %v6521_v48 = vsel %vm900_vm5, %v2281_v0, %v2282_v35  ;;  %v1505_v0 = vld [vmem:[%s9345_s5 + $0x208] sm:$0xff]  ;;  %v1412_v61 = vsel %vm1375_vm2, %v9503_v52, %v5022_v8  ;;  %v2884_v8 = vld [vmem:[%s9349_s9 + $0x218] sm:$0xff] }
 0x27a   : > { %9502 = vst [vmem:[#allocation18_spill] sm:$0xff] %v6518_v1  ;;  %v2144_v45 = vadd.f32 %v6477_v27, %v2143_v62  ;;  %v2398_v23 = vrot.slane %v6521_v48, 1  ;;  %v2400_v55 = vrot.slane %v6516_v51, 1  ;;  %v2886_v35 = vld [vmem:[%s9349_s9 + $0x228] sm:$0xff]  ;;  %1878 = vmatpush.msra.mxu2 %v1505_v0  ;;  %v2883_v0 = vld [vmem:[%s9349_s9 + $0x210] sm:$0xff] }
 0x27b   : > { %3251 = vmatpush.msra.mxu3 %v2886_v35  ;;  %v2882_v35 = vld [vmem:[%s9349_s9 + $0x208] sm:$0xff] }
 0x27c   : > { %1821 = vmatmul.f32.gmra.mxu1 %v6379_v32  ;;  %v2399_v14 = vsel %vm1017_vm6, %v2397_v49, %v2398_v23  ;;  %v2211_v62 = vmax.f32 %v2144_v45, 0.0  ;;  %v2401_v21 = vsel %vm1017_vm6, %v2398_v23, %v2400_v55  ;;  %v2885_v32 = vld [vmem:[%s9349_s9 + $0x220] sm:$0xff]  ;;  %1879 = vmatpush.msra.mxu2 %v1504_v2  ;;  %v5028_v45 = vunpack.i.h.bf16 %v6310_v18 }
 0x27d   : > { %2447 = vrot.lane.b32.xlu0 %v2399_v14, %s9468_s25  ;;  %2449 = vrot.lane.b32.xlu1 %v2401_v21, %s9468_s25  ;;  %v2022_v18 = vld [vmem:[%s6183_s19 + $0xa0] sm:$0xff] }
 0x27e   : > { %1697 = vmatmul.f32.gmra.mxu2 %v1412_v61  ;;  %3252 = vmatpush.msra.mxu3 %v2885_v32  ;;  %v2235_v49 = vsel %vm5412_vm4, %v2211_v62, 0.0  ;;  %v9506_v62 = vld [vmem:[#allocation22_spill] sm:$0xff]  ;;  %v2881_v32 = vld [vmem:[%s9349_s9 + $0x200] sm:$0xff] }
 0x27f   : > { %4809 = vmatmul.msk.f32.gmra.mxu3 %vm2043_vm11, %v2021_v11  ;;  %v2284_v14 = vrot.slane %v2235_v49, 7  ;;  %v1413_v21 = vsel %vm1375_vm2, %v9506_v62, %v5028_v45  ;;  %v5037_v45 = vunpack.i.l.bf16 %v6368_v53 }
 0x280   : > { %3253 = vmatpush.msra.mxu3 %v2884_v8 }
 0x281   : > { %v6560_v55 = vpop.f32.mrf.mxu2  ;;  %v2146_v61 = vpop.f32.mrf.mxu3 }
 0x282   : > { %9505 = vst [vmem:[#allocation21_spill] sm:$0xff] %v6560_v55  ;;  %v2147_v2 = vadd.f32 %v6477_v27, %v2146_v61  ;;  %3254 = vmatpush.msra.mxu3 %v2883_v0 }
 0x284   : > { %1824 = vmatmul.f32.gmra.mxu1 %v6396_v57  ;;  %v2212_v11 = vmax.f32 %v2147_v2, 0.0  ;;  %3255 = vmatpush.msra.mxu3 %v2882_v35  ;;  %v6580_v57 = vsel %vm900_vm5, 0.0, %v2284_v14 }
 0x286   : > { %1700 = vmatmul.f32.gmra.mxu2 %v1413_v21  ;;  %v2236_v8 = vsel %vm5412_vm4, %v2212_v11, 0.0  ;;  %3256 = vmatpush.msra.mxu3 %v2881_v32  ;;  %v2023_v32 = vld [vmem:[%s6183_s19 + $0xa8] sm:$0xff]  ;;  %vm9515_vm4 = vmmov %vm9483_vm13 }
 0x287   : > { %4810 = vmatmul.msk.f32.gmra.mxu3 %vm2043_vm11, %v2022_v18  ;;  %v2285_v49 = vrot.slane %v2236_v8, 7  ;;  %v2402_v18 = vrot.slane %v6580_v57, 1  ;;  %vm9518_vm8 = vmmov %vm9515_vm4 }
 0x289   : > { %v6582_v0 = vpop.f32.mrf.mxu2  ;;  %v6586_v61 = vsel %vm900_vm5, %v2284_v14, %v2285_v49  ;;  %v6589_v2 = vsel %vm900_vm5, %v2285_v49, 0.0  ;;  %v2149_v23 = vpop.f32.mrf.mxu3  ;;  %v9508_v49 = vld [vmem:[#allocation24_spill] sm:$0xff] }
 0x28a   : > { %9507 = vst [vmem:[#allocation11_spill] sm:$0xff] %v6582_v0  ;;  %v2150_v35 = vadd.f32 %v6477_v27, %v2149_v23  ;;  %v2403_v11 = vrot.slane %v6586_v61, 1  ;;  %v2405_v21 = vrot.slane %v6589_v2, 1  ;;  %v1414_v23 = vsel %vm1375_vm2, %v9508_v49, %v5037_v45 }
 0x28c   : > { %1827 = vmatmul.f32.gmra.mxu1 %v6411_v17  ;;  %v2213_v53 = vmax.f32 %v2150_v35, 0.0  ;;  %v6598_v14 = vsel %vm1017_vm6, %v2402_v18, %v2403_v11  ;;  %v6601_v8 = vsel %vm1017_vm6, %v2403_v11, %v2405_v21  ;;  %v5043_v11 = vunpack.i.h.bf16 %v6361_v47 }
 0x28d   : > { %2451 = vrot.lane.b32.xlu2 %v6598_v14, %s9468_s25  ;;  %2453 = vrot.lane.b32.xlu0 %v6601_v8, %s9468_s25 }
 0x28e   : > { %1703 = vmatmul.f32.gmra.mxu2 %v1414_v23  ;;  %v2237_v35 = vsel %vm5441_vm9, %v2213_v53, 0.0  ;;  %v1415_v45 = vsel %vm1375_vm2, %v9511_v13, %v5043_v11 }
 0x28f   : > { %4811 = vmatmul.msk.f32.gmra.mxu3 %vm2043_vm11, %v2023_v32  ;;  %v2287_v1 = vrot.slane %v2237_v35, 7 }
 0x291   : > { %v6612_v18 = vpop.f32.mrf.mxu2  ;;  %v2152_v21 = vpop.f32.mrf.mxu3  ;;  %v6624_v47 = vsel %vm900_vm5, 0.0, %v2287_v1 }
 0x292   : > { %9510 = vst [vmem:[#allocation22_spill] sm:$0xff] %v6612_v18  ;;  %v2153_v7 = vadd.f32 %v6477_v27, %v2152_v21  ;;  %v2407_v21 = vrot.slane %v6624_v47, 1 }
 0x294   : > { %1830 = vmatmul.f32.gmra.mxu1 %v6426_v3  ;;  %v2214_v50 = vmax.f32 %v2153_v7, 0.0 }
 0x296   : > { %v2238_v32 = vsel %vm5441_vm9, %v2214_v50, 0.0  ;;  %1706 = vmatmul.f32.gmra.mxu2 %v1415_v45  ;;  %vm9521_vm9 = vmmov %vm9515_vm4 }
 0x297   : > { %4812 = vmatmul.msk.f32.gmra.mxu3 %vm2043_vm11, %v2024_v22  ;;  %v2288_v53 = vrot.slane %v2238_v32, 7  ;;  %v2025_v22 = vld [vmem:[%s6183_s19 + $0xb8] sm:$0xff] }
 0x299   : > { %v6626_v23 = vpop.f32.mrf.mxu2  ;;  %v6629_v3 = vsel %vm900_vm5, %v2287_v1, %v2288_v53  ;;  %v2367_v7 = vsel %vm900_vm5, %v2288_v53, 0.0  ;;  %v2155_v35 = vpop.f32.mrf.mxu3 }
 0x29a   : > { %9512 = vst [vmem:[#allocation24_spill] sm:$0xff] %v6626_v23  ;;  %v2156_v11 = vadd.f32 %v6477_v27, %v2155_v35  ;;  %v2408_v17 = vrot.slane %v6629_v3, 1  ;;  %v2410_v50 = vrot.slane %v2367_v7, 1 }
 0x29c   : > { %1833 = vmatmul.f32.gmra.mxu1 %v6072_v19  ;;  %v2215_v45 = vmax.f32 %v2156_v11, 0.0  ;;  %v6638_v32 = vsel %vm1017_vm6, %v2408_v17, %v2410_v50  ;;  %v6641_v1 = vsel %vm1017_vm6, %v2407_v21, %v2408_v17  ;;  %v2518_v17 = vrot.slane %v6629_v3, 2 }
 0x29d   : > { %2457 = vrot.lane.b32.xlu2 %v6638_v32, %s9468_s25  ;;  %2455 = vrot.lane.b32.xlu1 %v6641_v1, %s9468_s25  ;;  %v2517_v21 = vrot.slane %v6624_v47, 2 }
 0x29e   : > { %4769 = vmatmul.msk.f32.vlgmr.msra.gmra.mxu2 %vm1375_vm2, %v5471_v6  ;;  %v2239_v53 = vsel %vm5476_vm12, %v2215_v45, 0.0 }
 0x29f   : > { %4813 = vmatmul.msk.f32.gmra.mxu3 %vm2043_vm11, %v2025_v22  ;;  %v2290_v20 = vrot.slane %v2239_v53, 7  ;;  %v6659_v6 = vsel %vm9515_vm4, %v2517_v21, %v2518_v17 }
 0x2a1   : > { %v6652_v35 = vpop.f32.mrf.mxu2  ;;  %v6668_v45 = vsel %vm900_vm5, 0.0, %v2290_v20 }
 0x2a2   : > { %9514 = vst [vmem:[#allocation12_spill] sm:$0xff] %v6652_v35  ;;  %v2158_v11 = vpop.f32.mrf.mxu3  ;;  %v2412_v59 = vrot.slane %v6668_v45, 1 }
 0x2a3   : > { %v2159_v50 = vadd.f32 %v6477_v27, %v2158_v11 }
 0x2a4   : > { %1836 = vmatmul.f32.gmra.mxu1 %v6142_v10  ;;  %v2520_v10 = vrot.slane %v2367_v7, 2 }
 0x2a5   : > { %v2216_v44 = vmax.f32 %v2159_v50, 0.0 }
 0x2a6   : > { %4770 = vmatmul.msk.f32.gmra.mxu2 %vm1375_vm2, %v5487_v15 }
 0x2a7   : > { %v2240_v22 = vsel %vm5476_vm12, %v2216_v44, 0.0  ;;  %4814 = vmatmul.msk.f32.vlgmr.msra.gmra.mxu3 %vm1375_vm2, %v6659_v6  ;;  %vm9526_vm12 = vmmov %vm9515_vm4 }
 0x2a8   : > { %v2291_v11 = vrot.slane %v2240_v22, 7 }
 0x2a9   : > { %v6670_v53 = vpop.f32.mrf.mxu2 }
 0x2aa   : > { %9516 = vst [vmem:[#allocation25_spill] sm:$0xff] %v6670_v53  ;;  %v6673_v50 = vsel %vm900_vm5, %v2290_v20, %v2291_v11  ;;  %v2368_v21 = vsel %vm900_vm5, %v2291_v11, 0.0  ;;  %v2161_v19 = vpop.f32.mrf.mxu3  ;;  %v6691_v20 = vsel %vm9518_vm8, %v2518_v17, %v2520_v10  ;;  %v2832_v17 = vld [vmem:[%s9349_s9 + $0x78] sm:$0xff] }
 0x2ab   : > { %v2162_v44 = vadd.f32 %v6477_v27, %v2161_v19  ;;  %v2413_v15 = vrot.slane %v6673_v50, 1  ;;  %v2415_v40 = vrot.slane %v2368_v21, 1  ;;  %v2523_v19 = vrot.slane %v6673_v50, 2  ;;  %2933 = vmatpush.msra.mxu0 %v2832_v17  ;;  %v2824_v53 = vld [vmem:[%s9349_s9 + $0x38] sm:$0xff] }
 0x2ac   : > { %1839 = vmatmul.f32.gmra.mxu1 %v6169_v33  ;;  %v2829_v33 = vld [vmem:[%s9349_s9 + $0x60] sm:$0xff] }
 0x2ad   : > { %v2217_v12 = vmax.f32 %v2162_v44, 0.0  ;;  %v6681_v22 = vsel %vm1017_vm6, %v2413_v15, %v2415_v40  ;;  %v6684_v7 = vsel %vm1017_vm6, %v2412_v59, %v2413_v15 }
 0x2ae   : > { %9517 = vst [vmem:[#allocation13_spill] sm:$0xff] %v6681_v22  ;;  %2461 = vrot.lane.b32.xlu1 %v6681_v22, %s9468_s25  ;;  %2459 = vrot.lane.b32.xlu0 %v6684_v7, %s9468_s25 }
 0x2af   : > { %4771 = vmatmul.msk.f32.gmra.mxu2 %vm1375_vm2, %v5504_v30  ;;  %4815 = vmatmul.msk.f32.gmra.mxu3 %vm1375_vm2, %v6691_v20  ;;  %v2241_v40 = vsel %vm5509_vm15, %v2217_v12, 0.0  ;;  %v2522_v30 = vrot.slane %v6668_v45, 2  ;;  %v2831_v12 = vld [vmem:[%s9349_s9 + $0x70] sm:$0xff] }
 0x2b0   : > { %v2293_v10 = vrot.slane %v2241_v40, 7  ;;  %2934 = vmatpush.msra.mxu0 %v2831_v12 }
 0x2b1   : > { %v6699_v59 = vpop.f32.mrf.mxu2  ;;  %v6712_v56 = vsel %vm9521_vm9, %v2522_v30, %v2523_v19  ;;  %v6731_v30 = vpop.f32.mrf.mxu1 }
 0x2b2   : > { %9520 = vst [vmem:[#allocation14_spill] sm:$0xff] %v6699_v59  ;;  %v2164_v11 = vpop.f32.mrf.mxu3  ;;  %v6724_v40 = vsel %vm900_vm5, 0.0, %v2293_v10 }
 0x2b3   : > { %v2165_v44 = vadd.f32 %v6477_v27, %v2164_v11  ;;  %9523 = vst [vmem:[#allocation53_spill] sm:$0xff] %v6731_v30  ;;  %v2823_v30 = vld [vmem:[%s9349_s9 + $0x30] sm:$0xff] }
 0x2b4   : > { %1842 = vmatmul.f32.gmra.mxu1 %v6190_v46  ;;  %v2830_v46 = vld [vmem:[%s9349_s9 + $0x68] sm:$0xff] }
 0x2b5   : > { %v2218_v15 = vmax.f32 %v2165_v44, 0.0  ;;  %2935 = vmatpush.msra.mxu0 %v2830_v46  ;;  %v2417_v46 = vrot.slane %v6724_v40, 1 }
 0x2b7   : > { %v2242_v11 = vsel %vm5509_vm15, %v2218_v15, 0.0  ;;  %4772 = vmatmul.msk.f32.gmra.mxu2 %vm1375_vm2, %v5520_v41  ;;  %4816 = vmatmul.msk.f32.gmra.mxu3 %vm1375_vm2, %v6712_v56  ;;  %v2525_v41 = vrot.slane %v2368_v21, 2  ;;  %v2828_v21 = vld [vmem:[%s9349_s9 + $0x58] sm:$0xff]  ;;  %vm9530_vm15 = vmmov %vm9515_vm4 }
 0x2b8   : > { %v2294_v44 = vrot.slane %v2242_v11, 7  ;;  %2936 = vmatpush.msra.mxu0 %v2829_v33 }
 0x2b9   : > { %v6726_v17 = vpop.f32.mrf.mxu2 }
 0x2ba   : > { %9522 = vst [vmem:[#allocation52_spill] sm:$0xff] %v6726_v17  ;;  %v6734_v15 = vsel %vm900_vm5, %v2293_v10, %v2294_v44  ;;  %v6737_v12 = vsel %vm900_vm5, %v2294_v44, 0.0  ;;  %v2167_v36 = vpop.f32.mrf.mxu3  ;;  %2937 = vmatpush.msra.mxu0 %v2828_v21 }
 0x2bb   : > { %v2168_v11 = vadd.f32 %v6477_v27, %v2167_v36  ;;  %v2418_v17 = vrot.slane %v6734_v15, 1  ;;  %v2420_v59 = vrot.slane %v6737_v12, 1  ;;  %v2827_v36 = vld [vmem:[%s9349_s9 + $0x50] sm:$0xff] }
 0x2bc   : > { %1845 = vmatmul.f32.gmra.mxu1 %v6206_v26  ;;  %v6761_v26 = vsel %vm9526_vm12, %v2523_v19, %v2525_v41  ;;  %2938 = vmatpush.msra.mxu0 %v2827_v36  ;;  %v2825_v19 = vld [vmem:[%s9349_s9 + $0x40] sm:$0xff]  ;;  %v6782_v36 = vpop.f32.mrf.mxu1 }
 0x2bd   : > { %v2219_v10 = vmax.f32 %v2168_v11, 0.0  ;;  %v6748_v44 = vsel %vm1017_vm6, %v2417_v46, %v2418_v17  ;;  %v6751_v33 = vsel %vm1017_vm6, %v2418_v17, %v2420_v59  ;;  %v2826_v59 = vld [vmem:[%s9349_s9 + $0x48] sm:$0xff]  ;;  %9529 = vst [vmem:[#allocation56_spill] sm:$0xff] %v6782_v36 }
 0x2be   : > { %9524 = vst [vmem:[#allocation54_spill] sm:$0xff] %v6748_v44  ;;  %2463 = vrot.lane.b32.xlu2 %v6748_v44, %s9468_s25  ;;  %2465 = vrot.lane.b32.xlu0 %v6751_v33, %s9468_s25 }
 0x2bf   : > { %9525 = vst [vmem:[#allocation55_spill] sm:$0xff] %v6751_v33  ;;  %4773 = vmatmul.msk.f32.gmra.mxu2 %vm1375_vm2, %v5544_v60  ;;  %4817 = vmatmul.msk.f32.gmra.mxu3 %vm1375_vm2, %v6761_v26  ;;  %v2243_v11 = vsel %vm5546_vm3, %v2219_v10, 0.0  ;;  %v2528_v60 = vrot.slane %v6734_v15, 2  ;;  %v2527_v10 = vrot.slane %v6724_v40, 2 }
 0x2c0   : > { %2939 = vmatpush.msra.mxu0 %v2826_v59  ;;  %v2296_v35 = vrot.slane %v2243_v11, 7 }
 0x2c1   : > { %v6772_v46 = vpop.f32.mrf.mxu2  ;;  %v6790_v59 = vsel %vm9530_vm15, %v2527_v10, %v2528_v60 }
 0x2c2   : > { %9528 = vst [vmem:[#allocation15_spill] sm:$0xff] %v6772_v46  ;;  %v2170_v41 = vpop.f32.mrf.mxu3  ;;  %2940 = vmatpush.msra.mxu0 %v2825_v19  ;;  %v6802_v11 = vsel %vm900_vm5, 0.0, %v2296_v35 }
 0x2c3   : > { %v2171_v21 = vadd.f32 %v6477_v27, %v2170_v41 }
 0x2c4   : > { %1848 = vmatmul.f32.gmra.mxu1 %v6223_v39  ;;  %2941 = vmatpush.msra.mxu0 %v2824_v53  ;;  %v2822_v39 = vld [vmem:[%s9349_s9 + $0x28] sm:$0xff]  ;;  %v2821_v53 = vld [vmem:[%s9349_s9 + $0x20] sm:$0xff] }
 0x2c5   : > { %v2220_v46 = vmax.f32 %v2171_v21, 0.0 }
 0x2c6   : > { %2942 = vmatpush.msra.mxu0 %v2823_v30 }
 0x2c7   : > { %v2244_v41 = vsel %vm5546_vm3, %v2220_v46, 0.0  ;;  %4774 = vmatmul.msk.f32.gmra.mxu2 %vm1375_vm2, %v5541_v58  ;;  %4818 = vmatmul.msk.f32.gmra.mxu3 %vm1375_vm2, %v6790_v59  ;;  %v2530_v58 = vrot.slane %v6737_v12, 2  ;;  %vm9534_vm3 = vmmov %vm9515_vm4 }
 0x2c8   : > { %v2297_v19 = vrot.slane %v2244_v41, 7  ;;  %2943 = vmatpush.msra.mxu0 %v2822_v39  ;;  %vm9537_vm11 = vmmov %vm9534_vm3 }
 0x2c9   : > { %v6804_v21 = vpop.f32.mrf.mxu2  ;;  %v6831_v39 = vsel %vm9534_vm3, %v2528_v60, %v2530_v58  ;;  %v2818_v60 = vld [vmem:[%s9349_s9 + $0x8] sm:$0xff]  ;;  %vm9544_vm13 = vmmov %vm9534_vm3 }
 0x2ca   : > { %9531 = vst [vmem:[#allocation57_spill] sm:$0xff] %v6804_v21  ;;  %v6811_v17 = vsel %vm900_vm5, %v2296_v35, %v2297_v19  ;;  %v2370_v46 = vsel %vm900_vm5, %v2297_v19, 0.0  ;;  %v2173_v10 = vpop.f32.mrf.mxu3  ;;  %v2422_v21 = vrot.slane %v6802_v11, 1  ;;  %2944 = vmatpush.msra.mxu0 %v2821_v53  ;;  %v2820_v35 = vld [vmem:[%s9349_s9 + $0x18] sm:$0xff]  ;;  %vm9548_vm8 = vmmov %vm9534_vm3 }
 0x2cb   : > { %v2174_v36 = vadd.f32 %v6477_v27, %v2173_v10  ;;  %v2423_v41 = vrot.slane %v6811_v17, 1  ;;  %v2425_v30 = vrot.slane %v2370_v46, 1  ;;  %v2864_v10 = vld [vmem:[%s9349_s9 + $0x178] sm:$0xff]  ;;  %vm9554_vm12 = vmmov %vm9534_vm3 }
 0x2cc   : > { %2945 = vmatpush.msra.mxu0 %v2820_v35  ;;  %3087 = vmatpush.msrb.mxu2 %v2864_v10  ;;  %v2532_v35 = vrot.slane %v6802_v11, 2  ;;  %vm9562_vm15 = vmmov %vm9534_vm3 }
 0x2cd   : > { %v2221_v23 = vmax.f32 %v2174_v36, 0.0  ;;  %v6818_v28 = vsel %vm1017_vm6, %v2423_v41, %v2425_v30  ;;  %v6821_v12 = vsel %vm1017_vm6, %v2422_v21, %v2423_v41  ;;  %v2819_v36 = vld [vmem:[%s9349_s9 + $0x10] sm:$0xff] }
 0x2ce   : > { %9532 = vst [vmem:[#allocation58_spill] sm:$0xff] %v6818_v28  ;;  %2469 = vrot.lane.b32.xlu2 %v6818_v28, %s9468_s25  ;;  %2467 = vrot.lane.b32.xlu1 %v6821_v12, %s9468_s25 }
 0x2cf   : > { %9533 = vst [vmem:[#allocation59_spill] sm:$0xff] %v6821_v12  ;;  %4775 = vmatmul.msk.f32.gmra.mxu2 %vm1375_vm2, %v5592_v37  ;;  %4819 = vmatmul.msk.f32.gmra.mxu3 %vm1375_vm2, %v6831_v39  ;;  %v2245_v21 = vsel %vm5597_vm10, %v2221_v23, 0.0  ;;  %v2533_v37 = vrot.slane %v6811_v17, 2  ;;  %v2817_v23 = vld [vmem:[%s9349_s9] sm:$0xff] }
 0x2d0   : > { %2946 = vmatpush.msra.mxu0 %v2819_v36  ;;  %v2299_v30 = vrot.slane %v2245_v21, 7 }
 0x2d1   : > { %v6842_v53 = vpop.f32.mrf.mxu2  ;;  %v6857_v18 = vsel %vm9537_vm11, %v2532_v35, %v2533_v37 }
 0x2d2   : > { %9536 = vst [vmem:[#allocation16_spill] sm:$0xff] %v6842_v53  ;;  %v2176_v58 = vpop.f32.mrf.mxu3  ;;  %2947 = vmatpush.msra.mxu0 %v2818_v60  ;;  %v2535_v60 = vrot.slane %v2370_v46, 2  ;;  %v2880_v46 = vld [vmem:[%s9349_s9 + $0x1f8] sm:$0xff] }
 0x2d3   : > { %v2177_v41 = vadd.f32 %v6477_v27, %v2176_v58  ;;  %v6866_v58 = vsel %vm900_vm5, 0.0, %v2299_v30 }
 0x2d4   : > { %2948 = vmatpush.msra.mxu0 %v2817_v23  ;;  %v2427_v42 = vrot.slane %v6866_v58, 1 }
 0x2d5   : > { %v2222_v53 = vmax.f32 %v2177_v41, 0.0 }
 0x2d6   : > { %3164 = vmatpush.msrb.mxu0 %v2880_v46 }
 0x2d7   : > { %v2246_v36 = vsel %vm5597_vm10, %v2222_v53, 0.0  ;;  %4776 = vmatmul.msk.f32.gmra.mxu2 %vm1375_vm2, %v5595_v38  ;;  %4820 = vmatmul.msk.f32.gmra.mxu3 %vm1375_vm2, %v6857_v18  ;;  %vm9541_vm10 = vmmov %vm9534_vm3 }
 0x2d8   : > { %v2300_v21 = vrot.slane %v2246_v36, 7  ;;  %v2848_v36 = vld [vmem:[%s9349_s9 + $0xf8] sm:$0xff]  ;;  %v6900_v55 = vsel %vm9541_vm10, %v2533_v37, %v2535_v60  ;;  %v2847_v37 = vld [vmem:[%s9349_s9 + $0xf0] sm:$0xff] }
 0x2d9   : > { %v6868_v10 = vpop.f32.mrf.mxu2  ;;  %3010 = vmatpush.msra.mxu1 %v2848_v36 }
 0x2da   : > { %9538 = vst [vmem:[#allocation60_spill] sm:$0xff] %v6868_v10  ;;  %v6871_v41 = vsel %vm900_vm5, %v2299_v30, %v2300_v21  ;;  %v6874_v23 = vsel %vm900_vm5, %v2300_v21, 0.0  ;;  %v2179_v19 = vpop.f32.mrf.mxu3  ;;  %v2863_v30 = vld [vmem:[%s9349_s9 + $0x170] sm:$0xff] }
 0x2db   : > { %v2180_v53 = vadd.f32 %v6477_v27, %v2179_v19  ;;  %v2428_v38 = vrot.slane %v6871_v41, 1  ;;  %v2430_v35 = vrot.slane %v6874_v23, 1  ;;  %3088 = vmatpush.msrb.mxu2 %v2863_v30  ;;  %v2538_v46 = vrot.slane %v6871_v41, 2  ;;  %3011 = vmatpush.msra.mxu1 %v2847_v37 }
 0x2dd   : > { %v2223_v21 = vmax.f32 %v2180_v53, 0.0  ;;  %v6890_v19 = vsel %vm1017_vm6, %v2428_v38, %v2430_v35  ;;  %v6893_v10 = vsel %vm1017_vm6, %v2427_v42, %v2428_v38  ;;  %v798_v35 = vpop.f32.mrf.mxu0 }
 0x2de   : > { %9539 = vst [vmem:[#allocation61_spill] sm:$0xff] %v6890_v19  ;;  %2473 = vrot.lane.b32.xlu1 %v6890_v19, %s9468_s25  ;;  %2471 = vrot.lane.b32.xlu0 %v6893_v10, %s9468_s25 }
 0x2df   : > { %9540 = vst [vmem:[#allocation62_spill] sm:$0xff] %v6893_v10  ;;  %4777 = vmatmul.msk.f32.gmra.mxu2 %vm1375_vm2, %v5652_v34  ;;  %4821 = vmatmul.msk.f32.gmra.mxu3 %vm1375_vm2, %v6900_v55  ;;  %v2247_v42 = vsel %vm5654_vm14, %v2223_v21, 0.0  ;;  %v2879_v34 = vld [vmem:[%s9349_s9 + $0x1f0] sm:$0xff]  ;;  %v2537_v21 = vrot.slane %v6866_v58, 2 }
 0x2e0   : > { %3165 = vmatpush.msrb.mxu0 %v2879_v34  ;;  %v2302_v30 = vrot.slane %v2247_v42, 7  ;;  %v2540_v34 = vrot.slane %v6874_v23, 2  ;;  %v2846_v23 = vld [vmem:[%s9349_s9 + $0xe8] sm:$0xff] }
 0x2e1   : > { %v6908_v38 = vpop.f32.mrf.mxu2  ;;  %v6922_v43 = vsel %vm9544_vm13, %v2537_v21, %v2538_v46  ;;  %3012 = vmatpush.msra.mxu1 %v2846_v23 }
 0x2e2   : > { %9543 = vst [vmem:[#allocation17_spill] sm:$0xff] %v6908_v38  ;;  %v2182_v36 = vpop.f32.mrf.mxu3  ;;  %v6931_v42 = vsel %vm900_vm5, 0.0, %v2302_v30 }
 0x2e3   : > { %v2183_v60 = vadd.f32 %v6477_v27, %v2182_v36  ;;  %v2432_v21 = vrot.slane %v6931_v42, 1 }
 0x2e5   : > { %v2224_v38 = vmax.f32 %v2183_v60, 0.0 }
 0x2e6   : > { %1358 = vrot.lane.b32.xlu1 %v6138_v5, %s9468_s25  ;;  %v526_v5 = vadd.s32 11, %v5401_v24  ;;  %v2862_v24 = vld [vmem:[%s9349_s9 + $0x168] sm:$0xff] }
 0x2e7   : > { %v2248_v0 = vsel %vm5654_vm14, %v2224_v38, 0.0  ;;  %4778 = vmatmul.msk.f32.gmra.mxu2 %vm1375_vm2, %v5649_v29  ;;  %4822 = vmatmul.msk.f32.gmra.mxu3 %vm1375_vm2, %v6922_v43 }
 0x2e8   : > { %v2303_v36 = vrot.slane %v2248_v0, 7  ;;  %3089 = vmatpush.msrb.mxu2 %v2862_v24  ;;  %vm538_vm14 = vcmp.ge.s32.totalorder %v526_v5, 0  ;;  %vm550_vm4 = vcmp.lt.s32.totalorder %v526_v5, 16 }
 0x2e9   : > { %v6933_v37 = vpop.f32.mrf.mxu2  ;;  %vm6984_vm9 = vmand %vm538_vm14, %vm550_vm4 }
 0x2ea   : > { %9545 = vst [vmem:[#allocation63_spill] sm:$0xff] %v6933_v37  ;;  %v6938_v60 = vsel %vm900_vm5, %v2302_v30, %v2303_v36  ;;  %v6941_v53 = vsel %vm900_vm5, %v2303_v36, 0.0  ;;  %v2185_v29 = vpop.f32.mrf.mxu3  ;;  %v5084_v30 = vld [vmem:[%s9344_s4] ss:$0 sm:$0xff] }
 0x2eb   : > { %v2186_v38 = vadd.f32 %v6477_v27, %v2185_v29  ;;  %v2433_v19 = vrot.slane %v6938_v60, 1  ;;  %v2435_v0 = vrot.slane %v6941_v53, 1  ;;  %v799_v36 = vadd.f32 %v5084_v30, %v798_v35  ;;  %v801_v29 = vpop.f32.mrf.mxu0 }
 0x2ec   : > { %v802_v37 = vadd.f32 %v5084_v30, %v801_v29  ;;  %v6967_v35 = vsel %vm9548_vm8, %v2538_v46, %v2540_v34  ;;  %v2861_v46 = vld [vmem:[%s9349_s9 + $0x160] sm:$0xff]  ;;  %v9549_v34 = vmov 0  ;;  %v2543_v29 = vrot.slane %v6938_v60, 2 }
 0x2ed   : > { %v2225_v10 = vmax.f32 %v2186_v38, 0.0  ;;  %v6957_v28 = vsel %vm1017_vm6, %v2432_v21, %v2433_v19  ;;  %v6960_v12 = vsel %vm1017_vm6, %v2433_v19, %v2435_v0  ;;  %v826_v19 = vmax.f32 %v799_v36, 0.0  ;;  %v2878_v21 = vld [vmem:[%s9349_s9 + $0x1e8] sm:$0xff]  ;;  %3090 = vmatpush.msrb.mxu2 %v2861_v46 }
 0x2ee   : > { %9546 = vst [vmem:[#allocation64_spill] sm:$0xff] %v6957_v28  ;;  %2475 = vrot.lane.b32.xlu2 %v6957_v28, %s9468_s25  ;;  %2477 = vrot.lane.b32.xlu0 %v6960_v12, %s9468_s25  ;;  %v9550_v34 = vsel %vm6984_vm9, 4294967295, %v9549_v34  ;;  %v827_v0 = vmax.f32 %v802_v37, 0.0  ;;  %v2542_v37 = vrot.slane %v6931_v42, 2 }
 0x2ef   : > { %9547 = vst [vmem:[#allocation65_spill] sm:$0xff] %v6960_v12  ;;  %4779 = vmatmul.msk.f32.gmra.mxu2 %vm1375_vm2, %v9499_v9  ;;  %4823 = vmatmul.msk.f32.gmra.mxu3 %vm1375_vm2, %v6967_v35  ;;  %v2448_v38 = vpop.permute.xlu0 %2447  ;;  %v2845_v9 = vld [vmem:[%s9349_s9 + $0xe0] sm:$0xff]  ;;  %v2249_v23 = vsel %vm5696_vm7, %v2225_v10, 0.0  ;;  %v874_v12 = vsel %vm6984_vm9, %v826_v19, 0.0  ;;  %v2450_v46 = vpop.permute.xlu1 %2449 }
 0x2f0   : > { %v2753_v5 = vsel %vm1375_vm2, %v6505_v54, %v2448_v38  ;;  %9551 = vst [vmem:[#allocation66_spill] sm:$0xff] %v9550_v34  ;;  %3166 = vmatpush.msrb.mxu0 %v2878_v21  ;;  %3013 = vmatpush.msra.mxu1 %v2845_v9  ;;  %v2305_v28 = vrot.slane %v2249_v23, 7  ;;  %v5080_v10 = vld [vmem:[%s9346_s6] ss:$0 sm:$0xff]  ;;  %v7005_v21 = vsel %vm9554_vm12, %v2542_v37, %v2543_v29  ;;  %v934_v9 = vrot.slane %v874_v12, 7 }
 0x2f1   : > { %v6990_v30 = vpop.f32.mrf.mxu2  ;;  %2949 = vmatmul.f32.vlgmr.msra.gmra.mxu0 %v2753_v5  ;;  %v875_v5 = vsel %vm6984_vm9, %v827_v0, 0.0  ;;  %v1619_v19 = vadd.f32 %v5080_v10, %v6452_v16  ;;  %v2545_v16 = vrot.slane %v6941_v53, 2  ;;  %v2877_v53 = vld [vmem:[%s9349_s9 + $0x1e0] sm:$0xff] }
 0x2f2   : > { %9553 = vst [vmem:[#allocation20_spill] sm:$0xff] %v6990_v30  ;;  %v2188_v36 = vpop.f32.mrf.mxu3  ;;  %v935_v0 = vrot.slane %v875_v5, 7  ;;  %3167 = vmatpush.msrb.mxu0 %v2877_v53 }
 0x2f3   : > { %v2189_v38 = vadd.f32 %v6477_v27, %v2188_v36  ;;  %v7015_v36 = vsel %vm900_vm5, 0.0, %v2305_v28 }
 0x2f4   : > { %v2437_v5 = vrot.slane %v7015_v36, 1 }
 0x2f5   : > { %v2226_v30 = vmax.f32 %v2189_v38, 0.0  ;;  %v2754_v38 = vsel %vm1375_vm2, %v6521_v48, %v2450_v46 }
 0x2f6   : > { %1360 = vrot.lane.b32.xlu0 %v6165_v25, %s9468_s25 }
 0x2f7   : > { %v2250_v23 = vsel %vm5696_vm7, %v2226_v30, 0.0  ;;  %4780 = vmatmul.msk.f32.gmra.mxu2 %vm1375_vm2, %v9501_v63  ;;  %4824 = vmatmul.msk.f32.gmra.mxu3 %vm1375_vm2, %v7005_v21  ;;  %vm9559_vm7 = vmmov %vm9534_vm3 }
 0x2f8   : > { %v2306_v25 = vrot.slane %v2250_v23, 7 }
 0x2f9   : > { %v1695_v37 = vpop.f32.mrf.mxu2  ;;  %2952 = vmatmul.f32.gmra.mxu0 %v2754_v38  ;;  %v7044_v38 = vsel %vm900_vm5, %v934_v9, %v935_v0 }
 0x2fa   : > { %v7021_v12 = vsel %vm900_vm5, %v2305_v28, %v2306_v25  ;;  %v7024_v63 = vsel %vm900_vm5, %v2306_v25, 0.0  ;;  %v7026_v24 = vadd.f32 %v1695_v37, %v1619_v19  ;;  %v2191_v30 = vpop.f32.mrf.mxu3  ;;  %v2860_v28 = vld [vmem:[%s9349_s9 + $0x158] sm:$0xff]  ;;  %v7038_v25 = vpop.f32.mrf.mxu1  ;;  %v7041_v19 = vsel %vm900_vm5, 0.0, %v934_v9 }
 0x2fb   : > { %v2192_v10 = vadd.f32 %v6477_v27, %v2191_v30  ;;  %v2438_v23 = vrot.slane %v7021_v12, 1  ;;  %v2440_v46 = vrot.slane %v7024_v63, 1  ;;  %9556 = vst [vmem:[#allocation68_spill] sm:$0xff] %v7038_v25  ;;  %3091 = vmatpush.msrb.mxu2 %v2860_v28  ;;  %v2452_v37 = vpop.permute.xlu2 %2451  ;;  %v7057_v25 = vsel %vm9559_vm7, %v2543_v29, %v2545_v16  ;;  %v2844_v28 = vld [vmem:[%s9349_s9 + $0xd8] sm:$0xff] }
 0x2fc   : > { %9555 = vst [vmem:[#allocation67_spill] sm:$0xff] %v7026_v24  ;;  %v1353_v9 = vrot.slane %v7041_v19, 1  ;;  %v2548_v29 = vrot.slane %v7021_v12, 2  ;;  %3014 = vmatpush.msra.mxu1 %v2844_v28  ;;  %v2513_v28 = vrot.slane %v6586_v61, 2 }
 0x2fd   : > { %v2227_v30 = vmax.f32 %v2192_v10, 0.0  ;;  %v7047_v24 = vsel %vm1017_vm6, %v2437_v5, %v2438_v23  ;;  %v7050_v34 = vsel %vm1017_vm6, %v2438_v23, %v2440_v46  ;;  %v1354_v10 = vrot.slane %v7044_v38, 1 }
 0x2fe   : > { %9557 = vst [vmem:[#allocation69_spill] sm:$0xff] %v7047_v24  ;;  %2479 = vrot.lane.b32.xlu2 %v7047_v24, %s9468_s25  ;;  %2481 = vrot.lane.b32.xlu1 %v7050_v34, %s9468_s25  ;;  %v2755_v5 = vsel %vm1375_vm2, %v6580_v57, %v2452_v37  ;;  %v2859_v37 = vld [vmem:[%s9349_s9 + $0x150] sm:$0xff]  ;;  %v7085_v24 = vsel %vm900_vm5, %v935_v0, 0.0  ;;  %v2550_v23 = vrot.slane %v7024_v63, 2 }
 0x2ff   : > { %9558 = vst [vmem:[#allocation70_spill] sm:$0xff] %v7050_v34  ;;  %4781 = vmatmul.msk.f32.gmra.mxu2 %vm1375_vm2, %v9503_v52  ;;  %4825 = vmatmul.msk.f32.gmra.mxu3 %vm1375_vm2, %v7057_v25  ;;  %v2251_v46 = vsel %vm5736_vm0, %v2227_v30, 0.0  ;;  %v1355_v52 = vsel %vm1017_vm6, %v1353_v9, %v1354_v10  ;;  %v2876_v34 = vld [vmem:[%s9349_s9 + $0x1d8] sm:$0xff]  ;;  %v2875_v63 = vld [vmem:[%s9349_s9 + $0x1d0] sm:$0xff] }
 0x300   : > { %v2308_v30 = vrot.slane %v2251_v46, 7  ;;  %3168 = vmatpush.msrb.mxu0 %v2876_v34  ;;  %3092 = vmatpush.msrb.mxu2 %v2859_v37 }
 0x301   : > { %2955 = vmatmul.f32.gmra.mxu0 %v2755_v5  ;;  %v2547_v5 = vrot.slane %v7015_v36, 2 }
 0x302   : > { %v2194_v53 = vpop.f32.mrf.mxu3  ;;  %v7082_v9 = vpop.f32.mrf.mxu1  ;;  %v7098_v34 = vsel %vm900_vm5, 0.0, %v2308_v30  ;;  %3169 = vmatpush.msrb.mxu0 %v2875_v63 }
 0x303   : > { %v2195_v16 = vadd.f32 %v6477_v27, %v2194_v53  ;;  %v2454_v27 = vpop.permute.xlu0 %2453  ;;  %9561 = vst [vmem:[#allocation23_spill] sm:$0xff] %v7082_v9  ;;  %v7089_v33 = vsel %vm9562_vm15, %v2547_v5, %v2548_v29  ;;  %v2442_v9 = vrot.slane %v7098_v34, 1  ;;  %v2458_v63 = vpop.permute.xlu2 %2457 }
 0x304   : > { %v2756_v0 = vsel %vm1375_vm2, %v6586_v61, %v2454_v27  ;;  %v2843_v27 = vld [vmem:[%s9349_s9 + $0xd0] sm:$0xff] }
 0x305   : > { %v2228_v53 = vmax.f32 %v2195_v16, 0.0  ;;  %3015 = vmatpush.msra.mxu1 %v2843_v27 }
 0x306   : > { %1362 = vrot.lane.b32.xlu2 %v1355_v52, %s9468_s25  ;;  %v1356_v52 = vrot.slane %v7085_v24, 1 }
 0x307   : > { %v2252_v46 = vsel %vm5736_vm0, %v2228_v53, 0.0  ;;  %4782 = vmatmul.msk.f32.gmra.mxu2 %vm1375_vm2, %v9506_v62  ;;  %4826 = vmatmul.msk.f32.gmra.mxu3 %vm1375_vm2, %v7089_v33  ;;  %vm9564_vm0 = vmmov %vm9534_vm3 }
 0x308   : > { %v2309_v16 = vrot.slane %v2252_v46, 7  ;;  %v2512_v46 = vrot.slane %v6580_v57, 2  ;;  %vm9566_vm3 = vmmov %vm9564_vm0 }
 0x309   : > { %2958 = vmatmul.f32.gmra.mxu0 %v2756_v0  ;;  %v1357_v0 = vsel %vm1017_vm6, %v1354_v10, %v1356_v52  ;;  %v7131_v22 = vsel %vm9566_vm3, %v2548_v29, %v2550_v23  ;;  %v2842_v10 = vld [vmem:[%s9349_s9 + $0xc8] sm:$0xff]  ;;  %v2515_v52 = vrot.slane %v6589_v2, 2  ;;  %v2552_v23 = vrot.slane %v7098_v34, 2  ;;  %vm9568_vm11 = vmmov %vm9564_vm0 }
 0x30a   : > { %v7106_v37 = vsel %vm900_vm5, %v2308_v30, %v2309_v16  ;;  %v2374_v62 = vsel %vm900_vm5, %v2309_v16, 0.0  ;;  %v7122_v16 = vsel %vm9564_vm0, %v2512_v46, %v2513_v28  ;;  %v2858_v46 = vld [vmem:[%s9349_s9 + $0x148] sm:$0xff]  ;;  %3016 = vmatpush.msra.mxu1 %v2842_v10  ;;  %vm9569_vm10 = vmmov %vm9564_vm0  ;;  %v7190_v10 = vpop.f32.mrf.mxu2 }
 0x30b   : > { %v2445_v5 = vrot.slane %v2374_v62, 1  ;;  %v2443_v53 = vrot.slane %v7106_v37, 1  ;;  %3093 = vmatpush.msrb.mxu2 %v2858_v46  ;;  %v7174_v2 = vsel %vm9569_vm10, %v2513_v28, %v2515_v52  ;;  %v7185_v46 = vsel %vm1375_vm2, %v6629_v3, %v2458_v63  ;;  %9571 = vst [vmem:[#allocation75_spill] sm:$0xff] %v7190_v10  ;;  %vm9572_vm13 = vmmov %vm9564_vm0  ;;  %v2856_v52 = vld [vmem:[%s9349_s9 + $0x138] sm:$0xff] }
 0x30c   : > { %v2555_v28 = vrot.slane %v2374_v62, 2  ;;  %v9573_v62 = vld [vmem:[#allocation28_spill] sm:$0xff]  ;;  %v2840_v63 = vld [vmem:[%s9349_s9 + $0xb8] sm:$0xff]  ;;  %vm9578_vm14 = vmmov %vm9564_vm0 }
 0x30d   : > { %v7119_v30 = vsel %vm1017_vm6, %v2443_v53, %v2445_v5  ;;  %v7126_v44 = vsel %vm1017_vm6, %v2442_v9, %v2443_v53  ;;  %v2874_v53 = vld [vmem:[%s9349_s9 + $0x1c8] sm:$0xff]  ;;  %vm9580_vm4 = vmmov %vm9564_vm0 }
 0x30e   : > { %9563 = vst [vmem:[#allocation71_spill] sm:$0xff] %v7119_v30  ;;  %2578 = vrot.lane.b32.xlu2 %v6580_v57, %s9468_s25  ;;  %v5049_v27 = vpack.i.bf16 %v7122_v16, %v7119_v30  ;;  %v5044_v5 = vpack.i.bf16 %v1357_v0, %v7126_v44  ;;  %v7146_v57 = vpop.f32.mrf.mxu1  ;;  %3170 = vmatpush.msrb.mxu0 %v2874_v53  ;;  %vm9602_vm8 = vmmov %vm9564_vm0 }
 0x30f   : > { %9565 = vst [vmem:[#allocation72_spill] sm:$0xff] %v7126_v44  ;;  %4783 = vmatmul.msk.f32.gmra.mxu2 %vm1375_vm2, %v9508_v49  ;;  %4827 = vmatmul.msk.f32.gmra.mxu3 %vm1375_vm2, %v7131_v22  ;;  %v2456_v29 = vpop.permute.xlu1 %2455  ;;  %v2553_v49 = vrot.slane %v7106_v37, 2  ;;  %vm9614_vm12 = vmmov %vm9564_vm0 }
 0x310   : > { %9567 = vst [vmem:[#allocation73_spill] sm:$0xff] %v7146_v57  ;;  %5050 = vrot.lane.b32.xlu1 %v5049_v27, %s9468_s25  ;;  %5045 = vrot.lane.b32.xlu0 %v5044_v5, %s9468_s25  ;;  %v7152_v9 = vsel %vm1375_vm2, %v6624_v47, %v2456_v29  ;;  %v2857_v27 = vld [vmem:[%s9349_s9 + $0x140] sm:$0xff]  ;;  %vm9618_vm7 = vmmov %vm9564_vm0 }
 0x311   : > { %2961 = vmatmul.f32.gmra.mxu0 %v7152_v9  ;;  %v7164_v0 = vsel %vm9568_vm11, %v2552_v23, %v2553_v49  ;;  %v2841_v5 = vld [vmem:[%s9349_s9 + $0xc0] sm:$0xff]  ;;  %3094 = vmatpush.msrb.mxu2 %v2857_v27  ;;  %v7198_v29 = vsel %vm9572_vm13, %v2553_v49, %v2555_v28  ;;  %v2855_v28 = vld [vmem:[%s9349_s9 + $0x130] sm:$0xff]  ;;  %vm9626_vm15 = vmmov %vm9564_vm0 }
 0x312   : > { %3017 = vmatpush.msra.mxu1 %v2841_v5  ;;  %v7218_v53 = vpop.f32.mrf.mxu2  ;;  %v9576_v5 = vld [vmem:[#allocation27_spill] sm:$0xff] }
 0x313   : > { %3095 = vmatpush.msrb.mxu2 %v2856_v52  ;;  %9575 = vst [vmem:[#allocation76_spill] sm:$0xff] %v7218_v53  ;;  %v1370_v52 = vrot.slane %v7041_v19, 2  ;;  %v2851_v53 = vld [vmem:[%s9349_s9 + $0x110] sm:$0xff] }
 0x314   : > { %3018 = vmatpush.msra.mxu1 %v2840_v63 }
 0x315   : > { %3096 = vmatpush.msrb.mxu2 %v2855_v28 }
 0x316   : > { %2673 = vrot.lane.b32.xlu2 %v6659_v6, %s9468_s25 }
 0x317   : > { %4784 = vmatmul.msk.f32.gmra.mxu2 %vm1375_vm2, %v9511_v13  ;;  %4828 = vmatmul.msk.f32.gmra.mxu3 %vm1375_vm2, %v7164_v0  ;;  %v7187_v13 = vpop.f32.mrf.mxu1 }
 0x318   : > { %2580 = vrot.lane.b32.xlu1 %v6586_v61, %s9468_s25  ;;  %2671 = vrot.lane.b32.xlu0 %v7174_v2, %s9468_s25  ;;  %9570 = vst [vmem:[#allocation74_spill] sm:$0xff] %v7187_v13  ;;  %v2873_v61 = vld [vmem:[%s9349_s9 + $0x1c0] sm:$0xff]  ;;  %v2464_v63 = vpop.permute.xlu2 %2463 }
 0x319   : > { %2964 = vmatmul.f32.gmra.mxu0 %v7185_v46  ;;  %v7264_v28 = vsel %vm1375_vm2, %v6724_v40, %v2464_v63 }
 0x31a   : > { %3171 = vmatpush.msrb.mxu0 %v2873_v61 }
 0x31e   : > { %2584 = vrot.lane.b32.xlu2 %v6629_v3, %s9468_s25 }
 0x31f   : > { %4785 = vmatmul.msk.f32.gmra.mxu2 %vm1375_vm2, %v9573_v62  ;;  %4829 = vmatmul.msk.f32.gmra.mxu3 %vm1375_vm2, %v7198_v29  ;;  %v7216_v23 = vpop.f32.mrf.mxu1  ;;  %v1371_v62 = vrot.slane %v7044_v38, 2 }
 0x320   : > { %2675 = vrot.lane.b32.xlu1 %v6691_v20, %s9468_s25  ;;  %2582 = vrot.lane.b32.xlu0 %v6624_v47, %s9468_s25  ;;  %v2460_v3 = vpop.permute.xlu0 %2459  ;;  %9574 = vst [vmem:[#allocation28_spill] sm:$0xff] %v7216_v23  ;;  %v2462_v27 = vpop.permute.xlu1 %2461  ;;  %v2872_v47 = vld [vmem:[%s9349_s9 + $0x1b8] sm:$0xff] }
 0x321   : > { %v7213_v49 = vsel %vm1375_vm2, %v6668_v45, %v2460_v3  ;;  %3172 = vmatpush.msrb.mxu0 %v2872_v47  ;;  %v7239_v61 = vsel %vm1375_vm2, %v6673_v50, %v2462_v27  ;;  %v1372_v27 = vsel %vm9578_vm14, %v1370_v52, %v1371_v62  ;;  %v7252_v47 = vpop.f32.mrf.mxu2  ;;  %v1373_v52 = vrot.slane %v7085_v24, 2 }
 0x322   : > { %2967 = vmatmul.f32.gmra.mxu0 %v7213_v49  ;;  %9579 = vst [vmem:[#allocation77_spill] sm:$0xff] %v7252_v47  ;;  %v2869_v47 = vld [vmem:[%s9349_s9 + $0x1a0] sm:$0xff] }
 0x326   : > { %2679 = vrot.lane.b32.xlu2 %v6761_v26, %s9468_s25 }
 0x327   : > { %4786 = vmatmul.msk.f32.gmra.mxu2 %vm1375_vm2, %v9576_v5  ;;  %v7247_v3 = vpop.f32.mrf.mxu1  ;;  %v2871_v5 = vld [vmem:[%s9349_s9 + $0x1b0] sm:$0xff] }
 0x328   : > { %2586 = vrot.lane.b32.xlu1 %v6668_v45, %s9468_s25  ;;  %2677 = vrot.lane.b32.xlu0 %v6712_v56, %s9468_s25  ;;  %v2839_v45 = vld [vmem:[%s9349_s9 + $0xb0] sm:$0xff]  ;;  %9577 = vst [vmem:[#allocation27_spill] sm:$0xff] %v7247_v3 }
 0x329   : > { %3019 = vmatpush.msra.mxu1 %v2839_v45  ;;  %3173 = vmatpush.msrb.mxu0 %v2871_v5  ;;  %v2854_v45 = vld [vmem:[%s9349_s9 + $0x128] sm:$0xff]  ;;  %v7284_v63 = vpop.f32.mrf.mxu2  ;;  %v2835_v3 = vld [vmem:[%s9349_s9 + $0x90] sm:$0xff] }
 0x32a   : > { %2970 = vmatmul.f32.gmra.mxu0 %v7239_v61  ;;  %3097 = vmatpush.msrb.mxu2 %v2854_v45  ;;  %9582 = vst [vmem:[#allocation79_spill] sm:$0xff] %v7284_v63  ;;  %v2837_v45 = vld [vmem:[%s9349_s9 + $0xa0] sm:$0xff]  ;;  %v2470_v63 = vpop.permute.xlu2 %2469 }
 0x32e   : > { %2590 = vrot.lane.b32.xlu2 %v6724_v40, %s9468_s25  ;;  %v1374_v40 = vsel %vm9580_vm4, %v1371_v62, %v1373_v52  ;;  %v2870_v62 = vld [vmem:[%s9349_s9 + $0x1a8] sm:$0xff]  ;;  %v2853_v52 = vld [vmem:[%s9349_s9 + $0x120] sm:$0xff] }
 0x32f   : > { %4787 = vmatmul.msk.f32.gmra.mxu2 %vm1375_vm2, %v1372_v27  ;;  %v7278_v24 = vpop.f32.mrf.mxu1  ;;  %3174 = vmatpush.msrb.mxu0 %v2870_v62  ;;  %v7323_v62 = vpop.f32.mrf.mxu0 }
 0x330   : > { %2681 = vrot.lane.b32.xlu1 %v6790_v59, %s9468_s25  ;;  %2588 = vrot.lane.b32.xlu0 %v6673_v50, %s9468_s25  ;;  %v2838_v50 = vld [vmem:[%s9349_s9 + $0xa8] sm:$0xff]  ;;  %v2466_v27 = vpop.permute.xlu0 %2465  ;;  %9581 = vst [vmem:[#allocation78_spill] sm:$0xff] %v7278_v24 }
 0x331   : > { %3020 = vmatpush.msra.mxu1 %v2838_v50  ;;  %v7288_v5 = vsel %vm1375_vm2, %v6734_v15, %v2466_v27  ;;  %3098 = vmatpush.msrb.mxu2 %v2853_v52  ;;  %v7331_v52 = vsel %vm1375_vm2, %v6811_v17, %v2470_v63 }
 0x332   : > { %2973 = vmatmul.f32.gmra.mxu0 %v7264_v28 }
 0x333   : > { %3021 = vmatpush.msra.mxu1 %v2837_v45  ;;  %3175 = vmatpush.msrb.mxu0 %v2869_v47 }
 0x336   : > { %2685 = vrot.lane.b32.xlu2 %v6857_v18, %s9468_s25 }
 0x337   : > { %4788 = vmatmul.msk.f32.gmra.mxu2 %vm1375_vm2, %v1374_v40  ;;  %v7310_v27 = vpop.f32.mrf.mxu1  ;;  %v7313_v40 = vpop.f32.mrf.mxu2 }
 0x338   : > { %2592 = vrot.lane.b32.xlu1 %v6734_v15, %s9468_s25  ;;  %2683 = vrot.lane.b32.xlu0 %v6831_v39, %s9468_s25  ;;  %9583 = vst [vmem:[#allocation80_spill] sm:$0xff] %v7310_v27  ;;  %v7357_v27 = vpop.f32.mrf.mxu0 }
 0x339   : > { %9584 = vst [vmem:[#allocation81_spill] sm:$0xff] %v7313_v40  ;;  %v2850_v40 = vld [vmem:[%s9349_s9 + $0x108] sm:$0xff] }
 0x33a   : > { %2976 = vmatmul.f32.gmra.mxu0 %v7288_v5 }
 0x33e   : > { %2596 = vrot.lane.b32.xlu2 %v6811_v17, %s9468_s25 }
 0x33f   : > { %v7334_v47 = vpop.f32.mrf.mxu1  ;;  %v7336_v45 = vpop.f32.mrf.mxu2 }
 0x340   : > { %2687 = vrot.lane.b32.xlu1 %v6900_v55, %s9468_s25  ;;  %v2468_v15 = vpop.permute.xlu1 %2467  ;;  %2594 = vrot.lane.b32.xlu0 %v6802_v11, %s9468_s25  ;;  %9585 = vst [vmem:[#allocation82_spill] sm:$0xff] %v7334_v47 }
 0x341   : > { %v7308_v50 = vsel %vm1375_vm2, %v6802_v11, %v2468_v15  ;;  %v2852_v11 = vld [vmem:[%s9349_s9 + $0x118] sm:$0xff]  ;;  %9586 = vst [vmem:[#allocation83_spill] sm:$0xff] %v7336_v45 }
 0x342   : > { %2979 = vmatmul.f32.gmra.mxu0 %v7308_v50  ;;  %3099 = vmatpush.msrb.mxu2 %v2852_v11  ;;  %v2836_v15 = vld [vmem:[%s9349_s9 + $0x98] sm:$0xff] }
 0x343   : > { %v2868_v11 = vld [vmem:[%s9349_s9 + $0x198] sm:$0xff]  ;;  %3022 = vmatpush.msra.mxu1 %v2836_v15  ;;  %v2197_v15 = vpop.f32.mrf.mxu3 }
 0x344   : > { %3176 = vmatpush.msrb.mxu0 %v2868_v11  ;;  %3100 = vmatpush.msrb.mxu2 %v2851_v53  ;;  %v7363_v11 = vld [vmem:[%s9348_s8] ss:$0 sm:$0xff] }
 0x345   : > { %v2198_v24 = vadd.f32 %v7363_v11, %v2197_v15  ;;  %3023 = vmatpush.msra.mxu1 %v2835_v3  ;;  %v2867_v15 = vld [vmem:[%s9349_s9 + $0x190] sm:$0xff] }
 0x346   : > { %2691 = vrot.lane.b32.xlu2 %v6967_v35, %s9468_s25  ;;  %3177 = vmatpush.msrb.mxu0 %v2867_v15 }
 0x347   : > { %v7369_v23 = vpop.f32.mrf.mxu1  ;;  %v2229_v53 = vmax.f32 %v2198_v24, 0.0  ;;  %v7389_v24 = vpop.f32.mrf.mxu0  ;;  %3101 = vmatpush.msrb.mxu2 %v2850_v40 }
 0x348   : > { %2598 = vrot.lane.b32.xlu1 %v6866_v58, %s9468_s25  ;;  %2689 = vrot.lane.b32.xlu0 %v6922_v43, %s9468_s25  ;;  %9588 = vst [vmem:[#allocation85_spill] sm:$0xff] %v7389_v24  ;;  %v2476_v44 = vpop.permute.xlu2 %2475 }
 0x349   : > { %v2253_v30 = vsel %vm5791_vm1, %v2229_v53, 0.0 }
 0x34a   : > { %2982 = vmatmul.f32.gmra.mxu0 %v7331_v52 }
 0x34e   : > { %2602 = vrot.lane.b32.xlu2 %v6931_v42, %s9468_s25 }
 0x350   : > { %2693 = vrot.lane.b32.xlu1 %v7005_v21, %s9468_s25  ;;  %v2474_v17 = vpop.permute.xlu1 %2473  ;;  %2600 = vrot.lane.b32.xlu0 %v6871_v41, %s9468_s25  ;;  %v2472_v63 = vpop.permute.xlu0 %2471 }
 0x351   : > { %v7355_v10 = vsel %vm1375_vm2, %v6866_v58, %v2472_v63  ;;  %v7373_v58 = vpop.f32.mrf.mxu2  ;;  %v7386_v3 = vsel %vm1375_vm2, %v6871_v41, %v2474_v17  ;;  %v7402_v17 = vpop.f32.mrf.mxu1 }
 0x352   : > { %2985 = vmatmul.f32.gmra.mxu0 %v7355_v10  ;;  %9587 = vst [vmem:[#allocation84_spill] sm:$0xff] %v7373_v58  ;;  %v2200_v58 = vpop.f32.mrf.mxu3 }
 0x353   : > { %v2201_v41 = vadd.f32 %v7363_v11, %v2200_v58  ;;  %9590 = vst [vmem:[#allocation26_spill] sm:$0xff] %v7402_v17  ;;  %v7412_v58 = vsel %vm1375_vm2, %v6931_v42, %v2476_v44  ;;  %v7421_v17 = vpop.f32.mrf.mxu0  ;;  %v2866_v44 = vld [vmem:[%s9349_s9 + $0x188] sm:$0xff]  ;;  %v2833_v42 = vld [vmem:[%s9349_s9 + $0x80] sm:$0xff] }
 0x354   : > { %9592 = vst [vmem:[#allocation87_spill] sm:$0xff] %v7421_v17  ;;  %3178 = vmatpush.msrb.mxu0 %v2866_v44 }
 0x355   : > { %v2230_v15 = vmax.f32 %v2201_v41, 0.0 }
 0x356   : > { %2697 = vrot.lane.b32.xlu2 %v7089_v33, %s9468_s25 }
 0x358   : > { %2604 = vrot.lane.b32.xlu1 %v6938_v60, %s9468_s25  ;;  %v1359_v63 = vpop.permute.xlu1 %1358  ;;  %2695 = vrot.lane.b32.xlu0 %v7057_v25, %s9468_s25  ;;  %v2480_v40 = vpop.permute.xlu2 %2479 }
 0x359   : > { %v1436_v13 = vsel %vm1375_vm2, %v5821_v31, %v1359_v63  ;;  %v2834_v31 = vld [vmem:[%s9349_s9 + $0x88] sm:$0xff]  ;;  %v7408_v63 = vpop.f32.mrf.mxu2  ;;  %v7446_v44 = vpop.f32.mrf.mxu1 }
 0x35a   : > { %1851 = vmatmul.f32.gmra.mxu1 %v1436_v13  ;;  %2988 = vmatmul.f32.gmra.mxu0 %v7386_v3  ;;  %v2311_v13 = vrot.slane %v2253_v30, 7  ;;  %9591 = vst [vmem:[#allocation86_spill] sm:$0xff] %v7408_v63  ;;  %v7425_v63 = vsel %vm5791_vm1, %v2230_v15, 0.0  ;;  %vm9601_vm1 = vmmov %vm9564_vm0 }
 0x35b   : > { %3024 = vmatpush.msra.mxu1 %v2834_v31  ;;  %v2849_v31 = vld [vmem:[%s9349_s9 + $0x100] sm:$0xff]  ;;  %v9415_v41 = vrot.slane %v7425_v63, 7  ;;  %9593 = vst [vmem:[#allocation88_spill] sm:$0xff] %v7446_v44 }
 0x35c   : > { %v7416_v30 = vsel %vm900_vm5, 0.0, %v2311_v13  ;;  %3102 = vmatpush.msrb.mxu2 %v2849_v31 }
 0x35d   : > { %3025 = vmatpush.msra.mxu1 %v2833_v42  ;;  %v7454_v24 = vsel %vm900_vm5, %v2311_v13, %v9415_v41 }
 0x35e   : > { %2608 = vrot.lane.b32.xlu2 %v7021_v12, %s9468_s25 }
 0x360   : > { %2699 = vrot.lane.b32.xlu1 %v7131_v22, %s9468_s25  ;;  %2606 = vrot.lane.b32.xlu0 %v7015_v36, %s9468_s25  ;;  %v2478_v53 = vpop.permute.xlu0 %2477  ;;  %v1363_v47 = vpop.permute.xlu2 %1362 }
 0x361   : > { %v7444_v31 = vsel %vm1375_vm2, %v6938_v60, %v2478_v53  ;;  %v7449_v17 = vpop.f32.mrf.mxu2  ;;  %v1438_v60 = vsel %vm1375_vm2, %v7041_v19, %v1363_v47  ;;  %v7467_v53 = vsel %vm1375_vm2, %v7015_v36, %v2480_v40  ;;  %v7470_v13 = vpop.f32.mrf.mxu1 }
 0x362   : > { %2991 = vmatmul.f32.gmra.mxu0 %v7412_v58  ;;  %9594 = vst [vmem:[#allocation89_spill] sm:$0xff] %v7449_v17 }
 0x363   : > { %9595 = vst [vmem:[#allocation90_spill] sm:$0xff] %v7470_v13 }
 0x366   : > { %2614 = vrot.lane.b32.xlu2 %v7416_v30, %s9468_s25 }
 0x368   : > { %2612 = vrot.lane.b32.xlu1 %v7106_v37, %s9468_s25  ;;  %2610 = vrot.lane.b32.xlu0 %v7098_v34, %s9468_s25  ;;  %v1361_v57 = vpop.permute.xlu0 %1360  ;;  %v2579_v44 = vpop.permute.xlu2 %2578 }
 0x369   : > { %v1437_v15 = vsel %vm1375_vm2, %v5832_v4, %v1361_v57  ;;  %v2865_v4 = vld [vmem:[%s9349_s9 + $0x180] sm:$0xff]  ;;  %v7472_v42 = vpop.f32.mrf.mxu2  ;;  %v7481_v19 = vpop.f32.mrf.mxu1 }
 0x36a   : > { %1854 = vmatmul.f32.gmra.mxu1 %v1437_v15  ;;  %2994 = vmatmul.f32.gmra.mxu0 %v7444_v31  ;;  %9596 = vst [vmem:[#allocation91_spill] sm:$0xff] %v7472_v42 }
 0x36b   : > { %3179 = vmatpush.msrb.mxu0 %v2865_v4  ;;  %9597 = vst [vmem:[#allocation92_spill] sm:$0xff] %v7481_v19 }
 0x36e   : > { %v7456_v45 = vpop.f32.mrf.mxu0 }
 0x370   : > { %2616 = vrot.lane.b32.xlu0 %v7454_v24, %s9468_s25  ;;  %v2482_v57 = vpop.permute.xlu1 %2481 }
 0x371   : > { %v7478_v41 = vsel %vm1375_vm2, %v7021_v12, %v2482_v57  ;;  %v7485_v47 = vpop.f32.mrf.mxu2 }
 0x372   : > { %1857 = vmatmul.f32.gmra.mxu1 %v1438_v60  ;;  %2997 = vmatmul.f32.gmra.mxu0 %v7467_v53  ;;  %9598 = vst [vmem:[#allocation93_spill] sm:$0xff] %v7485_v47  ;;  %v7498_v47 = vpop.f32.mrf.mxu1 }
 0x373   : > { %9599 = vst [vmem:[#allocation94_spill] sm:$0xff] %v7498_v47 }
 0x376   : > { %v7474_v15 = vpop.f32.mrf.mxu0 }
 0x37a   : > { %3000 = vmatmul.f32.gmra.mxu0 %v7478_v41 }
 0x37e   : > { %v7483_v36 = vpop.f32.mrf.mxu0 }
 0x382   : > { %v5051_v40 = vpop.permute.xlu1 %5050  ;;  %v5046_v60 = vpop.permute.xlu0 %5045 }
 0x383   : > { %v5053_v4 = vunpack.i.h.bf16 %v5051_v40  ;;  %v5048_v17 = vunpack.i.h.bf16 %v5046_v60  ;;  %v5047_v42 = vunpack.i.l.bf16 %v5046_v60  ;;  %v7500_v60 = vpop.f32.mrf.mxu2 }
 0x384   : > { %9600 = vst [vmem:[#allocation95_spill] sm:$0xff] %v7500_v60  ;;  %v7516_v60 = vpop.f32.mrf.mxu1 }
 0x385   : > { %v2793_v13 = vsel %vm1375_vm2, %v6598_v14, %v5053_v4  ;;  %v1439_v12 = vsel %vm1375_vm2, %v7044_v38, %v5048_v17  ;;  %v7493_v57 = vsel %vm1375_vm2, %v7098_v34, %v5047_v42  ;;  %v2508_v14 = vrot.slane %v6521_v48, 2 }
 0x386   : > { %3103 = vmatmul.f32.vlgmr.msrb.gmra.mxu2 %v2793_v13  ;;  %v7495_v19 = vpop.f32.mrf.mxu0  ;;  %1860 = vmatmul.f32.gmra.mxu1 %v1439_v12  ;;  %v5052_v4 = vunpack.i.l.bf16 %v5051_v40  ;;  %v2507_v38 = vrot.slane %v6505_v54, 2  ;;  %v2510_v54 = vrot.slane %v6516_v51, 2 }
 0x387   : > { %3003 = vmatmul.f32.gmra.mxu0 %v7493_v57 }
 0x388   : > { %v2509_v34 = vsel %vm9601_vm1, %v2507_v38, %v2508_v14  ;;  %v7510_v12 = vsel %vm1375_vm2, %v7106_v37, %v5052_v4  ;;  %v2674_v38 = vpop.permute.xlu2 %2673 }
 0x389   : > { %v2773_v42 = vsel %vm1375_vm2, %v2509_v34, %v2579_v44  ;;  %v2795_v37 = vsel %vm1375_vm2, %v6641_v1, %v2674_v38 }
 0x38a   : > { %v2672_v17 = vpop.permute.xlu0 %2671  ;;  %v2581_v40 = vpop.permute.xlu1 %2580 }
 0x38b   : > { %v2794_v13 = vsel %vm1375_vm2, %v6601_v8, %v2672_v17  ;;  %v7518_v47 = vpop.f32.mrf.mxu2  ;;  %v2511_v8 = vsel %vm9602_vm8, %v2508_v14, %v2510_v54 }
 0x38c   : > { %v2774_v44 = vsel %vm1375_vm2, %v2511_v8, %v2581_v40  ;;  %v7527_v34 = vpop.f32.mrf.mxu1 }
 0x38e   : > { %3106 = vmatmul.f32.gmra.mxu2 %v2794_v13  ;;  %3026 = vmatmul.f32.vlgmr.msra.gmra.mxu1 %v2773_v42  ;;  %v7513_v48 = vpop.f32.mrf.mxu0 }
 0x38f   : > { %3006 = vmatmul.f32.gmra.mxu0 %v7510_v12 }
 0x392   : > { %v2583_v17 = vpop.permute.xlu0 %2582  ;;  %v2676_v51 = vpop.permute.xlu1 %2675 }
 0x393   : > { %v7529_v13 = vpop.f32.mrf.mxu2  ;;  %v2796_v14 = vsel %vm1375_vm2, %v6638_v32, %v2676_v51  ;;  %v2775_v1 = vsel %vm1375_vm2, %v7122_v16, %v2583_v17 }
 0x394   : > { %v7540_v38 = vpop.f32.mrf.mxu1 }
 0x396   : > { %3109 = vmatmul.f32.gmra.mxu2 %v2795_v37  ;;  %3029 = vmatmul.f32.gmra.mxu1 %v2774_v44  ;;  %v7525_v4 = vpop.f32.mrf.mxu0  ;;  %v9603_v44 = vld [vmem:[#allocation13_spill] sm:$0xff] }
 0x397   : > { %3180 = vmatmul.f32.vlgmr.msrb.gmra.mxu0 %v7152_v9  ;;  %v2585_v9 = vpop.permute.xlu2 %2584 }
 0x398   : > { %v2776_v8 = vsel %vm1375_vm2, %v7174_v2, %v2585_v9  ;;  %v9604_v9 = vld [vmem:[#allocation54_spill] sm:$0xff] }
 0x39a   : > { %v2678_v40 = vpop.permute.xlu0 %2677 }
 0x39b   : > { %v2797_v54 = vsel %vm1375_vm2, %v6684_v7, %v2678_v40  ;;  %v7544_v32 = vpop.f32.mrf.mxu2 }
 0x39c   : > { %v7556_v51 = vpop.f32.mrf.mxu1 }
 0x39e   : > { %3112 = vmatmul.f32.gmra.mxu2 %v2796_v14  ;;  %3032 = vmatmul.f32.gmra.mxu1 %v2775_v1 }
 0x39f   : > { %3183 = vmatmul.f32.gmra.mxu0 %v7185_v46  ;;  %v7536_v42 = vpop.f32.mrf.mxu0  ;;  %v2587_v46 = vpop.permute.xlu1 %2586 }
 0x3a0   : > { %v2680_v37 = vpop.permute.xlu2 %2679  ;;  %v2777_v7 = vsel %vm1375_vm2, %v6659_v6, %v2587_v46 }
 0x3a1   : > { %v2798_v17 = vsel %vm1375_vm2, %v9603_v44, %v2680_v37  ;;  %v9606_v44 = vld [vmem:[#allocation55_spill] sm:$0xff] }
 0x3a2   : > { %v2589_v14 = vpop.permute.xlu0 %2588 }
 0x3a6   : > { %3115 = vmatmul.f32.gmra.mxu2 %v2797_v54  ;;  %3035 = vmatmul.f32.gmra.mxu1 %v2776_v8  ;;  %v2778_v54 = vsel %vm1375_vm2, %v6691_v20, %v2589_v14  ;;  %v7567_v8 = vpop.f32.mrf.mxu1 }
 0x3a7   : > { %3186 = vmatmul.f32.gmra.mxu0 %v7213_v49  ;;  %v7547_v16 = vpop.f32.mrf.mxu0  ;;  %v7558_v49 = vpop.f32.mrf.mxu2 }
 0x3a8   : > { %v2682_v1 = vpop.permute.xlu1 %2681 }
 0x3a9   : > { %v2799_v40 = vsel %vm1375_vm2, %v9604_v9, %v2682_v1 }
 0x3aa   : > { %v2684_v46 = vpop.permute.xlu0 %2683 }
 0x3ae   : > { %3118 = vmatmul.f32.gmra.mxu2 %v2798_v17  ;;  %3038 = vmatmul.f32.gmra.mxu1 %v2777_v7  ;;  %v2800_v17 = vsel %vm1375_vm2, %v9606_v44, %v2684_v46  ;;  %v7578_v1 = vpop.f32.mrf.mxu1  ;;  %v2203_v44 = vpop.f32.mrf.mxu3 }
 0x3af   : > { %3189 = vmatmul.f32.gmra.mxu0 %v7239_v61  ;;  %v7554_v2 = vpop.f32.mrf.mxu0  ;;  %v2591_v61 = vpop.permute.xlu2 %2590 }
 0x3b0   : > { %v7569_v37 = vpop.f32.mrf.mxu2  ;;  %v2779_v7 = vsel %vm1375_vm2, %v6712_v56, %v2591_v61 }
 0x3b1   : > { %9605 = vst [vmem:[#allocation13_spill] sm:$0xff] %v7569_v37 }
 0x3b6   : > { %3121 = vmatmul.f32.gmra.mxu2 %v2799_v40  ;;  %3041 = vmatmul.f32.gmra.mxu1 %v2778_v54  ;;  %v9608_v40 = vld [vmem:[#allocation59_spill] sm:$0xff]  ;;  %v7591_v37 = vpop.f32.mrf.mxu1 }
 0x3b7   : > { %3192 = vmatmul.f32.gmra.mxu0 %v7264_v28  ;;  %v7565_v6 = vpop.f32.mrf.mxu0  ;;  %v2593_v28 = vpop.permute.xlu1 %2592 }
 0x3b8   : > { %v2686_v14 = vpop.permute.xlu2 %2685  ;;  %v7580_v9 = vpop.f32.mrf.mxu2  ;;  %v2780_v46 = vsel %vm1375_vm2, %v6761_v26, %v2593_v28 }
 0x3b9   : > { %9607 = vst [vmem:[#allocation54_spill] sm:$0xff] %v7580_v9  ;;  %v2801_v54 = vsel %vm1375_vm2, %v9608_v40, %v2686_v14  ;;  %v2206_v9 = vpop.f32.mrf.mxu3 }
 0x3be   : > { %3124 = vmatmul.f32.gmra.mxu2 %v2800_v17  ;;  %3044 = vmatmul.f32.gmra.mxu1 %v2779_v7  ;;  %v9609_v17 = vld [vmem:[#allocation58_spill] sm:$0xff] }
 0x3bf   : > { %3195 = vmatmul.f32.gmra.mxu0 %v7288_v5  ;;  %v7576_v20 = vpop.f32.mrf.mxu0  ;;  %v2595_v5 = vpop.permute.xlu0 %2594 }
 0x3c0   : > { %v2688_v61 = vpop.permute.xlu1 %2687  ;;  %v2781_v14 = vsel %vm1375_vm2, %v6790_v59, %v2595_v5  ;;  %v7595_v40 = vpop.f32.mrf.mxu2  ;;  %v2204_v5 = vadd.f32 %v7363_v11, %v2203_v44 }
 0x3c1   : > { %v2802_v7 = vsel %vm1375_vm2, %v9609_v17, %v2688_v61  ;;  %9610 = vst [vmem:[#allocation55_spill] sm:$0xff] %v7595_v40  ;;  %v9611_v61 = vld [vmem:[#allocation62_spill] sm:$0xff] }
 0x3c6   : > { %3127 = vmatmul.f32.gmra.mxu2 %v2801_v54  ;;  %3047 = vmatmul.f32.gmra.mxu1 %v2780_v46  ;;  %v2664_v54 = vrot.slane %v7416_v30, 2  ;;  %v2665_v46 = vrot.slane %v7454_v24, 2 }
 0x3c7   : > { %3198 = vmatmul.f32.gmra.mxu0 %v7308_v50  ;;  %v7587_v56 = vpop.f32.mrf.mxu0  ;;  %v2597_v50 = vpop.permute.xlu2 %2596 }
 0x3c8   : > { %v2690_v28 = vpop.permute.xlu0 %2689  ;;  %v2782_v59 = vsel %vm1375_vm2, %v6831_v39, %v2597_v50  ;;  %v7619_v39 = vsel %vm9614_vm12, %v2664_v54, %v2665_v46  ;;  %v7621_v50 = vpop.f32.mrf.mxu2 }
 0x3c9   : > { %v2803_v17 = vsel %vm1375_vm2, %v9611_v61, %v2690_v28  ;;  %v7616_v28 = vpop.f32.mrf.mxu1  ;;  %v2599_v61 = vpop.permute.xlu1 %2598  ;;  %9615 = vst [vmem:[#allocation58_spill] sm:$0xff] %v7621_v50  ;;  %4830 = vmatmul.msk.f32.gmra.mxu3 %vm1375_vm2, %v7619_v39 }
 0x3ca   : > { %9613 = vst [vmem:[#allocation59_spill] sm:$0xff] %v7616_v28 }
 0x3ce   : > { %3130 = vmatmul.f32.gmra.mxu2 %v2802_v7  ;;  %3050 = vmatmul.f32.gmra.mxu1 %v2781_v14  ;;  %v9612_v14 = vrot.slane %v7425_v63, 7  ;;  %v9616_v63 = vld [vmem:[#allocation61_spill] sm:$0xff] }
 0x3cf   : > { %3201 = vmatmul.f32.gmra.mxu0 %v7331_v52  ;;  %v7598_v26 = vpop.f32.mrf.mxu0  ;;  %v2207_v52 = vadd.f32 %v7363_v11, %v2206_v9  ;;  %v2692_v11 = vpop.permute.xlu2 %2691  ;;  %v2231_v9 = vmax.f32 %v2204_v5, 0.0 }
 0x3d0   : > { %v7614_v40 = vsel %vm900_vm5, %v9612_v14, 0.0 }
 0x3d1   : > { %v2232_v44 = vmax.f32 %v2207_v52, 0.0  ;;  %v2255_v54 = vsel %vm6984_vm9, %v2231_v9, 0.0  ;;  %v2601_v52 = vpop.permute.xlu0 %2600  ;;  %v2694_v9 = vpop.permute.xlu1 %2693 }
 0x3d3   : > { %v2256_v50 = vsel %vm6984_vm9, %v2232_v44, 0.0  ;;  %v9621_v44 = vld [vmem:[#allocation64_spill] sm:$0xff]  ;;  %vm9622_vm9 = vmmov %vm9564_vm0 }
 0x3d6   : > { %3133 = vmatmul.f32.gmra.mxu2 %v2803_v17  ;;  %3053 = vmatmul.f32.gmra.mxu1 %v2782_v59  ;;  %v2804_v17 = vsel %vm1375_vm2, %v9616_v63, %v2692_v11  ;;  %v2783_v59 = vsel %vm1375_vm2, %v6857_v18, %v2599_v61  ;;  %v2314_v18 = vrot.slane %v2255_v54, 7  ;;  %v2315_v61 = vrot.slane %v2256_v50, 7  ;;  %v7642_v11 = vpop.f32.mrf.mxu1  ;;  %v7644_v63 = vpop.f32.mrf.mxu2 }
 0x3d7   : > { %3204 = vmatmul.f32.gmra.mxu0 %v7355_v10  ;;  %v7609_v7 = vpop.f32.mrf.mxu0  ;;  %v2667_v10 = vrot.slane %v7614_v40, 2  ;;  %9619 = vst [vmem:[#allocation62_spill] sm:$0xff] %v7642_v11 }
 0x3d8   : > { %9620 = vst [vmem:[#allocation61_spill] sm:$0xff] %v7644_v63 }
 0x3d9   : > { %v7638_v5 = vsel %vm9618_vm7, %v2665_v46, %v2667_v10  ;;  %v7652_v46 = vsel %vm900_vm5, %v2314_v18, %v2315_v61  ;;  %v2784_v10 = vsel %vm1375_vm2, %v6900_v55, %v2601_v52 }
 0x3da   : > { %4831 = vmatmul.msk.f32.gmra.mxu3 %vm1375_vm2, %v7638_v5  ;;  %v2749_v14 = vrot.slane %v7652_v46, 2 }
 0x3de   : > { %3136 = vmatmul.f32.gmra.mxu2 %v2804_v17  ;;  %3056 = vmatmul.f32.gmra.mxu1 %v2783_v59  ;;  %v2805_v17 = vsel %vm1375_vm2, %v9621_v44, %v2694_v9  ;;  %v2603_v59 = vpop.permute.xlu2 %2602  ;;  %v7663_v44 = vsel %vm900_vm5, %v2315_v61, 0.0  ;;  %v7665_v63 = vpop.f32.mrf.mxu1 }
 0x3df   : > { %3207 = vmatmul.f32.gmra.mxu0 %v7386_v3  ;;  %v7635_v28 = vpop.f32.mrf.mxu0  ;;  %v7649_v3 = vsel %vm900_vm5, 0.0, %v2314_v18  ;;  %v2696_v18 = vpop.permute.xlu0 %2695  ;;  %9623 = vst [vmem:[#allocation66_spill] sm:$0xff] %v7665_v63  ;;  %v2751_v55 = vrot.slane %v7663_v44, 2 }
 0x3e0   : > { %v2748_v50 = vrot.slane %v7649_v3, 2  ;;  %v7669_v52 = vpop.f32.mrf.mxu2  ;;  %v2605_v61 = vpop.permute.xlu1 %2604 }
 0x3e1   : > { %9624 = vst [vmem:[#allocation64_spill] sm:$0xff] %v7669_v52  ;;  %v2752_v63 = vsel %vm9626_vm15, %v2749_v14, %v2751_v55  ;;  %v9628_v52 = vld [vmem:[#allocation69_spill] sm:$0xff] }
 0x3e2   : > { %v2750_v9 = vsel %vm9622_vm9, %v2748_v50, %v2749_v14 }
 0x3e3   : > { %4832 = vmatmul.msk.f32.gmra.mxu3 %vm1375_vm2, %v2750_v9 }
 0x3e6   : > { %3139 = vmatmul.f32.gmra.mxu2 %v2805_v17  ;;  %3059 = vmatmul.f32.gmra.mxu1 %v2784_v10  ;;  %v2785_v10 = vsel %vm1375_vm2, %v6922_v43, %v2603_v59  ;;  %v2698_v50 = vpop.permute.xlu2 %2697  ;;  %v2786_v43 = vsel %vm1375_vm2, %v6967_v35, %v2605_v61  ;;  %v3258_v59 = vpop.f32.mrf.mxu3 }
 0x3e7   : > { %3210 = vmatmul.f32.gmra.mxu0 %v7412_v58  ;;  %v7659_v54 = vpop.f32.mrf.mxu0  ;;  %v9625_v58 = vld [vmem:[#allocation65_spill] sm:$0xff]  ;;  %v7677_v11 = vpop.f32.mrf.mxu1 }
 0x3e8   : > { %v2806_v17 = vsel %vm1375_vm2, %v9625_v58, %v2696_v18  ;;  %9627 = vst [vmem:[#allocation65_spill] sm:$0xff] %v7677_v11  ;;  %v2807_v18 = vsel %vm1375_vm2, %v9628_v52, %v2698_v50  ;;  %v7686_v58 = vpop.f32.mrf.mxu2  ;;  %v2607_v14 = vpop.permute.xlu0 %2606 }
 0x3e9   : > { %9629 = vst [vmem:[#allocation69_spill] sm:$0xff] %v7686_v58  ;;  %v2787_v52 = vsel %vm1375_vm2, %v7005_v21, %v2607_v14  ;;  %v7710_v21 = vld [vmem:[%s9350_s10] ss:$0 sm:$0xff] }
 0x3eb   : > { %4833 = vmatmul.msk.f32.gmra.mxu3 %vm1375_vm2, %v2752_v63  ;;  %v9631_v63 = vld [vmem:[#allocation70_spill] sm:$0xff] }
 0x3ee   : > { %3142 = vmatmul.f32.gmra.mxu2 %v2806_v17  ;;  %3062 = vmatmul.f32.gmra.mxu1 %v2785_v10  ;;  %v3261_v35 = vpop.f32.mrf.mxu3 }
 0x3ef   : > { %3213 = vmatmul.f32.gmra.mxu0 %v7444_v31  ;;  %v7679_v9 = vpop.f32.mrf.mxu0  ;;  %v2700_v31 = vpop.permute.xlu1 %2699 }
 0x3f0   : > { %v7689_v55 = vpop.f32.mrf.mxu1  ;;  %v2808_v10 = vsel %vm1375_vm2, %v9631_v63, %v2700_v31  ;;  %v7698_v61 = vpop.f32.mrf.mxu2 }
 0x3f1   : > { %9630 = vst [vmem:[#allocation96_spill] sm:$0xff] %v7689_v55  ;;  %v2611_v14 = vpop.permute.xlu0 %2610  ;;  %v7720_v55 = vstv %s4742_s0 }
 0x3f2   : > { %9632 = vst [vmem:[#allocation70_spill] sm:$0xff] %v7698_v61  ;;  %vm574_vm0 = vcmp.ge.s32.totalorder %v7720_v55, 0  ;;  %vm584_vm3 = vcmp.lt.s32.totalorder %v7720_v55, 16 }
 0x3f3   : > { %vm7728_vm11 = vmand %vm574_vm0, %vm584_vm3 }
 0x3f6   : > { %3145 = vmatmul.f32.gmra.mxu2 %v2807_v18  ;;  %3065 = vmatmul.f32.gmra.mxu1 %v2786_v43  ;;  %v3264_v31 = vpop.f32.mrf.mxu3 }
 0x3f7   : > { %3216 = vmatmul.f32.gmra.mxu0 %v7467_v53  ;;  %v7691_v17 = vpop.f32.mrf.mxu0  ;;  %v2609_v53 = vpop.permute.xlu2 %2608 }
 0x3f8   : > { %v2788_v43 = vsel %vm1375_vm2, %v7057_v25, %v2609_v53  ;;  %v2789_v25 = vsel %vm1375_vm2, %v7089_v33, %v2611_v14 }
 0x3fe   : > { %3148 = vmatmul.f32.gmra.mxu2 %v2808_v10  ;;  %3068 = vmatmul.f32.gmra.mxu1 %v2787_v52  ;;  %v2951_v52 = vadd.f32 %v7710_v21, %v7456_v45  ;;  %v3267_v11 = vpop.f32.mrf.mxu3 }
 0x3ff   : > { %3219 = vmatmul.f32.gmra.mxu0 %v7478_v41 }
 0x403   : > { %v7700_v50 = vpop.f32.mrf.mxu1 }
 0x404   : > { %9633 = vst [vmem:[#allocation97_spill] sm:$0xff] %v7700_v50  ;;  %v7702_v18 = vpop.f32.mrf.mxu0 }
 0x406   : > { %3071 = vmatmul.f32.gmra.mxu1 %v2788_v43  ;;  %v2613_v43 = vpop.permute.xlu1 %2612 }
 0x407   : > { %3222 = vmatmul.f32.gmra.mxu0 %v7493_v57  ;;  %v2790_v33 = vsel %vm1375_vm2, %v7131_v22, %v2613_v43 }
 0x409   : > { %v3104_v41 = vpop.f32.mrf.mxu2 }
 0x40b   : > { %v3027_v10 = vpop.f32.mrf.mxu1 }
 0x40c   : > { %v7712_v63 = vpop.f32.mrf.mxu0  ;;  %v3028_v53 = vadd.f32 %v3027_v10, %v2951_v52 }
 0x40d   : > { %9634 = vst [vmem:[#allocation98_spill] sm:$0xff] %v7712_v63  ;;  %v2954_v63 = vadd.f32 %v7710_v21, %v7474_v15 }
 0x40e   : > { %3074 = vmatmul.f32.gmra.mxu1 %v2789_v25  ;;  %v3105_v58 = vadd.f32 %v3104_v41, %v3028_v53  ;;  %v2615_v25 = vpop.permute.xlu2 %2614 }
 0x40f   : > { %3225 = vmatmul.f32.gmra.mxu0 %v7510_v12 }
 0x411   : > { %v3107_v57 = vpop.f32.mrf.mxu2 }
 0x413   : > { %v3030_v61 = vpop.f32.mrf.mxu1 }
 0x414   : > { %v3181_v50 = vpop.f32.mrf.mxu0  ;;  %v3031_v14 = vadd.f32 %v3030_v61, %v2954_v63  ;;  %v3270_v63 = vpop.f32.mrf.mxu3 }
 0x415   : > { %v3182_v45 = vadd.f32 %v3181_v50, %v3105_v58  ;;  %v2791_v50 = vsel %vm1375_vm2, %v7164_v0, %v2615_v25 }
 0x416   : > { %3077 = vmatmul.f32.gmra.mxu1 %v2790_v33  ;;  %v3108_v53 = vadd.f32 %v3107_v57, %v3031_v14  ;;  %v3733_v14 = vld [vmem:[%s9351_s11 + $0x78] sm:$0xff] }
 0x417   : > { %v3259_v10 = vadd.f32 %v3258_v59, %v3182_v45  ;;  %v2957_v59 = vadd.f32 %v7710_v21, %v7483_v36  ;;  %3866 = vmatpush.msrb.mxu1 %v3733_v14 }
 0x419   : > { %v3110_v12 = vpop.f32.mrf.mxu2  ;;  %v3318_v41 = vmax.f32 %v3259_v10, 0.0  ;;  %v2617_v10 = vpop.permute.xlu0 %2616 }
 0x41b   : > { %v3338_v15 = vsel %vm7728_vm11, %v3318_v41, 0.0  ;;  %v3033_v58 = vpop.f32.mrf.mxu1 }
 0x41c   : > { %v3184_v22 = vpop.f32.mrf.mxu0  ;;  %3378 = vrot.lane.b32.xlu1 %v3338_v15, %s9468_s25  ;;  %v3034_v43 = vadd.f32 %v3033_v58, %v2957_v59 }
 0x41d   : > { %v3185_v61 = vadd.f32 %v3184_v22, %v3108_v53  ;;  %v565_v53 = vadd.s32 1, %v7720_v55  ;;  %v2792_v22 = vsel %vm1375_vm2, %v7198_v29, %v2617_v10 }
 0x41e   : > { %3080 = vmatmul.f32.gmra.mxu1 %v2791_v50  ;;  %v3111_v41 = vadd.f32 %v3110_v12, %v3034_v43  ;;  %v3273_v12 = vpop.f32.mrf.mxu3 }
 0x41f   : > { %v3262_v45 = vadd.f32 %v3261_v35, %v3185_v61  ;;  %v2960_v35 = vadd.f32 %v7710_v21, %v7495_v19  ;;  %vm575_vm10 = vcmp.ge.s32.totalorder %v565_v53, 0  ;;  %vm585_vm13 = vcmp.lt.s32.totalorder %v565_v53, 16 }
 0x420   : > { %vm7750_vm14 = vmand %vm575_vm10, %vm585_vm13 }
 0x421   : > { %v3113_v33 = vpop.f32.mrf.mxu2  ;;  %v3319_v57 = vmax.f32 %v3262_v45, 0.0 }
 0x423   : > { %v3339_v36 = vsel %vm7728_vm11, %v3319_v57, 0.0  ;;  %v3036_v15 = vpop.f32.mrf.mxu1 }
 0x424   : > { %v3187_v25 = vpop.f32.mrf.mxu0  ;;  %3380 = vrot.lane.b32.xlu2 %v3339_v36, %s9468_s25  ;;  %v3037_v59 = vadd.f32 %v3036_v15, %v2960_v35  ;;  %v3732_v35 = vld [vmem:[%s9351_s11 + $0x70] sm:$0xff] }
 0x425   : > { %v3188_v58 = vadd.f32 %v3187_v25, %v3111_v41  ;;  %3867 = vmatpush.msrb.mxu1 %v3732_v35  ;;  %v2969_v35 = vadd.f32 %v7710_v21, %v7536_v42 }
 0x426   : > { %3083 = vmatmul.f32.gmra.mxu1 %v2792_v22  ;;  %v3114_v57 = vadd.f32 %v3113_v33, %v3037_v59  ;;  %v3276_v33 = vpop.f32.mrf.mxu3  ;;  %v566_v59 = vadd.s32 2, %v7720_v55 }
 0x427   : > { %v3265_v61 = vadd.f32 %v3264_v31, %v3188_v58  ;;  %v2963_v31 = vadd.f32 %v7710_v21, %v7513_v48  ;;  %v2966_v48 = vadd.f32 %v7710_v21, %v7525_v4 }
 0x428   : > { %vm576_vm4 = vcmp.ge.s32.totalorder %v566_v59, 0  ;;  %vm586_vm1 = vcmp.lt.s32.totalorder %v566_v59, 16 }
 0x429   : > { %v3116_v50 = vpop.f32.mrf.mxu2  ;;  %v3320_v43 = vmax.f32 %v3265_v61, 0.0  ;;  %vm7771_vm8 = vmand %vm576_vm4, %vm586_vm1 }
 0x42b   : > { %v3340_v19 = vsel %vm7750_vm14, %v3320_v43, 0.0  ;;  %v3039_v14 = vpop.f32.mrf.mxu1 }
 0x42c   : > { %v3190_v41 = vpop.f32.mrf.mxu0  ;;  %3382 = vrot.lane.b32.xlu0 %v3340_v19, %s9468_s25  ;;  %v3040_v36 = vadd.f32 %v3039_v14, %v2963_v31 }
 0x42d   : > { %v3191_v10 = vadd.f32 %v3190_v41, %v3114_v57 }
 0x42e   : > { %v3117_v58 = vadd.f32 %v3116_v50, %v3040_v36  ;;  %v3731_v50 = vld [vmem:[%s9351_s11 + $0x68] sm:$0xff] }
 0x42f   : > { %v3268_v53 = vadd.f32 %v3267_v11, %v3191_v10  ;;  %3868 = vmatpush.msrb.mxu1 %v3731_v50  ;;  %v5054_v10 = vpack.i.bf16 %v7198_v29, %v7164_v0  ;;  %v2642_v0 = vrot.slane %v7614_v40, 1  ;;  %v3730_v29 = vld [vmem:[%s9351_s11 + $0x60] sm:$0xff]  ;;  %v2972_v40 = vadd.f32 %v7710_v21, %v7547_v16 }
 0x431   : > { %v3119_v15 = vpop.f32.mrf.mxu2  ;;  %v3321_v25 = vmax.f32 %v3268_v53, 0.0  ;;  %3869 = vmatpush.msrb.mxu1 %v3730_v29 }
 0x433   : > { %v3341_v22 = vsel %vm7750_vm14, %v3321_v25, 0.0  ;;  %v3042_v61 = vpop.f32.mrf.mxu1  ;;  %v3279_v25 = vpop.f32.mrf.mxu3 }
 0x434   : > { %v3193_v43 = vpop.f32.mrf.mxu0  ;;  %3384 = vrot.lane.b32.xlu1 %v3341_v22, %s9468_s25  ;;  %v3043_v57 = vadd.f32 %v3042_v61, %v2966_v48  ;;  %v2640_v61 = vrot.slane %v7454_v24, 1  ;;  %v567_v48 = vadd.s32 3, %v7720_v55 }
 0x435   : > { %v3194_v11 = vadd.f32 %v3193_v43, %v3117_v58 }
 0x436   : > { %v3120_v4 = vadd.f32 %v3119_v15, %v3043_v57  ;;  %v7792_v57 = vsel %vm1017_vm6, %v2640_v61, %v2642_v0  ;;  %vm577_vm12 = vcmp.ge.s32.totalorder %v567_v48, 0  ;;  %vm587_vm7 = vcmp.lt.s32.totalorder %v567_v48, 16 }
 0x437   : > { %v3271_v19 = vadd.f32 %v3270_v63, %v3194_v11  ;;  %vm7802_vm9 = vmand %vm577_vm12, %vm587_vm7  ;;  %v2639_v0 = vrot.slane %v7416_v30, 1 }
 0x439   : > { %v3122_v14 = vpop.f32.mrf.mxu2  ;;  %v3322_v41 = vmax.f32 %v3271_v19, 0.0 }
 0x43b   : > { %v3342_v63 = vsel %vm7771_vm8, %v3322_v41, 0.0  ;;  %v3045_v36 = vpop.f32.mrf.mxu1 }
 0x43c   : > { %v3196_v53 = vpop.f32.mrf.mxu0  ;;  %3386 = vrot.lane.b32.xlu2 %v3342_v63, %s9468_s25  ;;  %5055 = vrot.lane.b32.xlu1 %v5054_v10, %s9468_s25  ;;  %v3046_v22 = vadd.f32 %v3045_v36, %v2969_v35  ;;  %v3729_v36 = vld [vmem:[%s9351_s11 + $0x58] sm:$0xff] }
 0x43d   : > { %v3197_v58 = vadd.f32 %v3196_v53, %v3120_v4  ;;  %3870 = vmatpush.msrb.mxu1 %v3729_v36 }
 0x43e   : > { %v3123_v11 = vadd.f32 %v3122_v14, %v3046_v22  ;;  %v3282_v14 = vpop.f32.mrf.mxu3 }
 0x43f   : > { %v3274_v59 = vadd.f32 %v3273_v12, %v3197_v58 }
 0x441   : > { %v3125_v15 = vpop.f32.mrf.mxu2  ;;  %v3323_v43 = vmax.f32 %v3274_v59, 0.0 }
 0x443   : > { %v3343_v42 = vsel %vm7771_vm8, %v3323_v43, 0.0  ;;  %v3048_v12 = vpop.f32.mrf.mxu1 }
 0x444   : > { %v3199_v19 = vpop.f32.mrf.mxu0  ;;  %3388 = vrot.lane.b32.xlu0 %v3343_v42, %s9468_s25  ;;  %2738 = vrot.lane.b32.xlu1 %v7792_v57, %s9468_s25  ;;  %v3049_v41 = vadd.f32 %v3048_v12, %v2972_v40  ;;  %v568_v40 = vadd.s32 4, %v7720_v55 }
 0x445   : > { %v3200_v50 = vadd.f32 %v3199_v19, %v3123_v11 }
 0x446   : > { %v3126_v35 = vadd.f32 %v3125_v15, %v3049_v41  ;;  %v3285_v48 = vpop.f32.mrf.mxu3  ;;  %v7813_v15 = vsel %vm1017_vm6, %v2639_v0, %v2640_v61  ;;  %vm578_vm15 = vcmp.ge.s32.totalorder %v568_v40, 0  ;;  %vm588_vm0 = vcmp.lt.s32.totalorder %v568_v40, 16  ;;  %v3728_v61 = vld [vmem:[%s9351_s11 + $0x50] sm:$0xff]  ;;  %v3725_v40 = vld [vmem:[%s9351_s11 + $0x38] sm:$0xff] }
 0x447   : > { %v3277_v10 = vadd.f32 %v3276_v33, %v3200_v50  ;;  %v2975_v33 = vadd.f32 %v7710_v21, %v7554_v2  ;;  %3871 = vmatpush.msrb.mxu1 %v3728_v61  ;;  %vm7825_vm3 = vmand %vm578_vm15, %vm588_vm0  ;;  %v2984_v61 = vadd.f32 %v7710_v21, %v7587_v56  ;;  %v3722_v56 = vld [vmem:[%s9351_s11 + $0x20] sm:$0xff] }
 0x449   : > { %v3128_v4 = vpop.f32.mrf.mxu2  ;;  %v3324_v63 = vmax.f32 %v3277_v10, 0.0  ;;  %v2978_v10 = vadd.f32 %v7710_v21, %v7565_v6 }
 0x44b   : > { %v3344_v16 = vsel %vm7802_vm9, %v3324_v63, 0.0  ;;  %v3051_v58 = vpop.f32.mrf.mxu1 }
 0x44c   : > { %v3202_v22 = vpop.f32.mrf.mxu0  ;;  %3390 = vrot.lane.b32.xlu2 %v3344_v16, %s9468_s25  ;;  %v3052_v29 = vadd.f32 %v3051_v58, %v2975_v33  ;;  %v9705_v16 = vld [vmem:[#allocation60_spill] sm:$0xff] }
 0x44d   : > { %v3203_v59 = vadd.f32 %v3202_v22, %v3126_v35 }
 0x44e   : > { %v3129_v12 = vadd.f32 %v3128_v4, %v3052_v29  ;;  %v3288_v58 = vpop.f32.mrf.mxu3  ;;  %v3727_v29 = vld [vmem:[%s9351_s11 + $0x48] sm:$0xff] }
 0x44f   : > { %v3280_v43 = vadd.f32 %v3279_v25, %v3203_v59  ;;  %v2981_v59 = vadd.f32 %v7710_v21, %v7576_v20  ;;  %3872 = vmatpush.msrb.mxu1 %v3727_v29  ;;  %v3781_v20 = vld [vmem:[%s9351_s11 + $0x1f8] sm:$0xff]  ;;  %v3755_v29 = vld [vmem:[%s9351_s11 + $0x128] sm:$0xff] }
 0x450   : > { %4061 = vmatpush.msrb.mxu3 %v3781_v20  ;;  %v3720_v20 = vld [vmem:[%s9351_s11 + $0x10] sm:$0xff] }
 0x451   : > { %v3325_v11 = vmax.f32 %v3280_v43, 0.0  ;;  %v3131_v42 = vpop.f32.mrf.mxu2 }
 0x453   : > { %v3345_v19 = vsel %vm7802_vm9, %v3325_v11, 0.0  ;;  %v3054_v50 = vpop.f32.mrf.mxu1 }
 0x454   : > { %v3205_v41 = vpop.f32.mrf.mxu0  ;;  %v5059_v2 = vpack.i.bf16 %v3345_v19, %v7813_v15  ;;  %v3055_v63 = vadd.f32 %v3054_v50, %v2978_v10 }
 0x455   : > { %v3206_v25 = vadd.f32 %v3205_v41, %v3129_v12  ;;  %v569_v41 = vadd.s32 5, %v7720_v55 }
 0x456   : > { %5060 = vrot.lane.b32.xlu0 %v5059_v2, %s9468_s25  ;;  %v3132_v6 = vadd.f32 %v3131_v42, %v3055_v63  ;;  %v3726_v42 = vld [vmem:[%s9351_s11 + $0x40] sm:$0xff]  ;;  %v3780_v63 = vld [vmem:[%s9351_s11 + $0x1f0] sm:$0xff] }
 0x457   : > { %v3283_v4 = vadd.f32 %v3282_v14, %v3206_v25  ;;  %3873 = vmatpush.msrb.mxu1 %v3726_v42  ;;  %v3724_v25 = vld [vmem:[%s9351_s11 + $0x30] sm:$0xff]  ;;  %4062 = vmatpush.msrb.mxu3 %v3780_v63  ;;  %vm579_vm10 = vcmp.ge.s32.totalorder %v569_v41, 0  ;;  %vm589_vm13 = vcmp.lt.s32.totalorder %v569_v41, 16  ;;  %v3719_v41 = vld [vmem:[%s9351_s11 + $0x8] sm:$0xff] }
 0x458   : > { %vm7876_vm4 = vmand %vm579_vm10, %vm589_vm13 }
 0x459   : > { %v3134_v36 = vpop.f32.mrf.mxu2  ;;  %v3326_v35 = vmax.f32 %v3283_v4, 0.0  ;;  %3874 = vmatpush.msrb.mxu1 %v3725_v40  ;;  %v3291_v4 = vpop.f32.mrf.mxu3  ;;  %vm7992_vm13 = vmneg %vm900_vm5 }
 0x45b   : > { %v3346_v22 = vsel %vm7825_vm3, %v3326_v35, 0.0  ;;  %v3057_v33 = vpop.f32.mrf.mxu1  ;;  %3875 = vmatpush.msrb.mxu1 %v3724_v25  ;;  %v3723_v35 = vld [vmem:[%s9351_s11 + $0x28] sm:$0xff] }
 0x45c   : > { %v3208_v14 = vpop.f32.mrf.mxu0  ;;  %3394 = vrot.lane.b32.xlu2 %v3346_v22, %s9468_s25  ;;  %v3058_v43 = vadd.f32 %v3057_v33, %v2981_v59  ;;  %v3721_v59 = vld [vmem:[%s9351_s11 + $0x18] sm:$0xff] }
 0x45d   : > { %v3209_v0 = vadd.f32 %v3208_v14, %v3132_v6  ;;  %v3779_v6 = vld [vmem:[%s9351_s11 + $0x1e8] sm:$0xff]  ;;  %3876 = vmatpush.msrb.mxu1 %v3723_v35  ;;  %v3778_v14 = vld [vmem:[%s9351_s11 + $0x1e0] sm:$0xff] }
 0x45e   : > { %v3135_v50 = vadd.f32 %v3134_v36, %v3058_v43  ;;  %4063 = vmatpush.msrb.mxu3 %v3779_v6  ;;  %v7906_v35 = vld [vmem:[%s9346_s6] ss:$0 sm:$0xff]  ;;  %v570_v6 = vadd.s32 6, %v7720_v55 }
 0x45f   : > { %v3286_v11 = vadd.f32 %v3285_v48, %v3209_v0  ;;  %3877 = vmatpush.msrb.mxu1 %v3722_v56 }
 0x460   : > { %4064 = vmatpush.msrb.mxu3 %v3778_v14  ;;  %vm580_vm1 = vcmp.ge.s32.totalorder %v570_v6, 0  ;;  %vm590_vm12 = vcmp.lt.s32.totalorder %v570_v6, 16 }
 0x461   : > { %v3137_v12 = vpop.f32.mrf.mxu2  ;;  %v3327_v19 = vmax.f32 %v3286_v11, 0.0  ;;  %3878 = vmatpush.msrb.mxu1 %v3721_v59  ;;  %v2732_v59 = vrot.slane %v7652_v46, 1  ;;  %vm7937_vm7 = vmand %vm580_vm1, %vm590_vm12 }
 0x463   : > { %v3347_v48 = vsel %vm7825_vm3, %v3327_v19, 0.0  ;;  %v3060_v2 = vpop.f32.mrf.mxu1  ;;  %3879 = vmatpush.msrb.mxu1 %v3720_v20  ;;  %v3771_v20 = vld [vmem:[%s9351_s11 + $0x1a8] sm:$0xff] }
 0x464   : > { %v3211_v10 = vpop.f32.mrf.mxu0  ;;  %3396 = vrot.lane.b32.xlu0 %v3347_v48, %s9468_s25  ;;  %v3061_v22 = vadd.f32 %v3060_v2, %v2984_v61  ;;  %v3775_v2 = vld [vmem:[%s9351_s11 + $0x1c8] sm:$0xff]  ;;  %v3774_v61 = vld [vmem:[%s9351_s11 + $0x1c0] sm:$0xff] }
 0x465   : > { %v3212_v36 = vadd.f32 %v3211_v10, %v3135_v50  ;;  %v3776_v50 = vld [vmem:[%s9351_s11 + $0x1d0] sm:$0xff]  ;;  %v3294_v10 = vpop.f32.mrf.mxu3  ;;  %3880 = vmatpush.msrb.mxu1 %v3719_v41 }
 0x466   : > { %v3138_v11 = vadd.f32 %v3137_v12, %v3061_v22  ;;  %v2987_v12 = vadd.f32 %v7710_v21, %v7598_v26  ;;  %v3718_v26 = vld [vmem:[%s9351_s11] sm:$0xff]  ;;  %v3773_v22 = vld [vmem:[%s9351_s11 + $0x1b8] sm:$0xff] }
 0x467   : > { %v3289_v33 = vadd.f32 %v3288_v58, %v3212_v36  ;;  %v3777_v58 = vld [vmem:[%s9351_s11 + $0x1d8] sm:$0xff]  ;;  %3881 = vmatpush.msrb.mxu1 %v3718_v26 }
 0x468   : > { %4065 = vmatpush.msrb.mxu3 %v3777_v58 }
 0x469   : > { %v3328_v0 = vmax.f32 %v3289_v33, 0.0  ;;  %v3140_v43 = vpop.f32.mrf.mxu2  ;;  %v2731_v33 = vrot.slane %v7649_v3, 1 }
 0x46a   : > { %4066 = vmatpush.msrb.mxu3 %v3776_v50 }
 0x46b   : > { %v3348_v42 = vsel %vm7876_vm4, %v3328_v0, 0.0  ;;  %v3063_v19 = vpop.f32.mrf.mxu1 }
 0x46c   : > { %v3214_v40 = vpop.f32.mrf.mxu0  ;;  %3398 = vrot.lane.b32.xlu1 %v3348_v42, %s9468_s25  ;;  %v3064_v25 = vadd.f32 %v3063_v19, %v2987_v12  ;;  %4067 = vmatpush.msrb.mxu3 %v3775_v2 }
 0x46d   : > { %v3215_v48 = vadd.f32 %v3214_v40, %v3138_v11  ;;  %v2990_v11 = vadd.f32 %v7710_v21, %v7609_v7  ;;  %v3770_v7 = vld [vmem:[%s9351_s11 + $0x1a0] sm:$0xff]  ;;  %v3297_v41 = vpop.f32.mrf.mxu3 }
 0x46e   : > { %4068 = vmatpush.msrb.mxu3 %v3774_v61  ;;  %v3141_v56 = vadd.f32 %v3140_v43, %v3064_v25  ;;  %v9647_v43 = vld [vmem:[#allocation11_spill] sm:$0xff]  ;;  %v1574_v25 = vadd.f32 %v7906_v35, %v7323_v62 }
 0x46f   : > { %v3292_v63 = vadd.f32 %v3291_v4, %v3215_v48  ;;  %v1577_v4 = vadd.f32 %v7906_v35, %v7357_v27  ;;  %v3772_v27 = vld [vmem:[%s9351_s11 + $0x1b0] sm:$0xff]  ;;  %v2733_v48 = vsel %vm1017_vm6, %v2731_v33, %v2732_v59 }
 0x470   : > { %4069 = vmatpush.msrb.mxu3 %v3773_v22 }
 0x471   : > { %v3329_v36 = vmax.f32 %v3292_v63, 0.0  ;;  %v1654_v19 = vadd.f32 %v9647_v43, %v1577_v4  ;;  %v3143_v40 = vpop.f32.mrf.mxu2  ;;  %v9648_v63 = vld [vmem:[#allocation30_spill] sm:$0xff]  ;;  %v3767_v43 = vld [vmem:[%s9351_s11 + $0x188] sm:$0xff] }
 0x472   : > { %4070 = vmatpush.msrb.mxu3 %v3772_v27  ;;  %v9652_v27 = vld [vmem:[#allocation83_spill] sm:$0xff] }
 0x473   : > { %v3349_v14 = vsel %vm7876_vm4, %v3329_v36, 0.0  ;;  %v3066_v58 = vpop.f32.mrf.mxu1  ;;  %v1731_v26 = vadd.f32 %v9648_v63, %v1654_v19  ;;  %v3769_v36 = vld [vmem:[%s9351_s11 + $0x198] sm:$0xff] }
 0x474   : > { %v3217_v0 = vpop.f32.mrf.mxu0  ;;  %3400 = vrot.lane.b32.xlu2 %v3349_v14, %s9468_s25  ;;  %v3067_v50 = vadd.f32 %v3066_v58, %v2990_v11  ;;  %4071 = vmatpush.msrb.mxu3 %v3771_v20  ;;  %v3768_v14 = vld [vmem:[%s9351_s11 + $0x190] sm:$0xff] }
 0x475   : > { %v3218_v42 = vadd.f32 %v3217_v0, %v3141_v56  ;;  %v1808_v22 = vadd.f32 %v7369_v23, %v1731_v26  ;;  %v9651_v58 = vld [vmem:[#allocation21_spill] sm:$0xff] }
 0x476   : > { %4072 = vmatpush.msrb.mxu3 %v3770_v7  ;;  %v3144_v4 = vadd.f32 %v3143_v40, %v3067_v50  ;;  %v1651_v0 = vadd.f32 %v9651_v58, %v1574_v25  ;;  %v9653_v20 = vld [vmem:[#allocation29_spill] sm:$0xff]  ;;  %v571_v7 = vadd.s32 7, %v7720_v55  ;;  %v9654_v25 = vld [vmem:[#allocation82_spill] sm:$0xff] }
 0x477   : > { %v3295_v12 = vadd.f32 %v3294_v10, %v3218_v42  ;;  %v5069_v10 = vpack.i.bf16 %v2733_v48, %v7638_v5  ;;  %v2993_v5 = vadd.f32 %v7710_v21, %v7635_v28  ;;  %v1885_v11 = vadd.f32 %v9652_v27, %v1808_v22  ;;  %v3766_v28 = vld [vmem:[%s9351_s11 + $0x180] sm:$0xff]  ;;  %v3300_v48 = vpop.f32.mrf.mxu3 }
 0x478   : > { %4073 = vmatpush.msrb.mxu3 %v3769_v36  ;;  %v1728_v50 = vadd.f32 %v9653_v20, %v1651_v0  ;;  %vm581_vm15 = vcmp.ge.s32.totalorder %v571_v7, 0  ;;  %vm591_vm0 = vcmp.lt.s32.totalorder %v571_v7, 16  ;;  %v9656_v0 = vld [vmem:[#allocation85_spill] sm:$0xff] }
 0x479   : > { %v3330_v2 = vmax.f32 %v3295_v12, 0.0  ;;  %v3146_v19 = vpop.f32.mrf.mxu2  ;;  %v1942_v12 = vmax.f32 %v1885_v11, 0.0  ;;  %vm7978_vm10 = vmand %vm581_vm15, %vm591_vm0 }
 0x47a   : > { %4074 = vmatpush.msrb.mxu3 %v3768_v14  ;;  %v1805_v63 = vadd.f32 %v9654_v25, %v1728_v50  ;;  %v2734_v50 = vrot.slane %v7663_v44, 1  ;;  %v9663_v44 = vld [vmem:[#allocation31_spill] sm:$0xff] }
 0x47b   : > { %v3350_v6 = vsel %vm7937_vm7, %v3330_v2, 0.0  ;;  %v3069_v62 = vpop.f32.mrf.mxu1 }
 0x47c   : > { %v3220_v33 = vpop.f32.mrf.mxu0  ;;  %3402 = vrot.lane.b32.xlu0 %v3350_v6, %s9468_s25  ;;  %5070 = vrot.lane.b32.xlu2 %v5069_v10, %s9468_s25  ;;  %v3070_v23 = vadd.f32 %v3069_v62, %v2993_v5  ;;  %v9655_v62 = vld [vmem:[#allocation81_spill] sm:$0xff]  ;;  %v1982_v5 = vsel %vm7728_vm11, %v1942_v12, 0.0 }
 0x47d   : > { %v3221_v56 = vadd.f32 %v3220_v33, %v3144_v4  ;;  %4075 = vmatpush.msrb.mxu3 %v3767_v43  ;;  %v2996_v4 = vadd.f32 %v7710_v21, %v7659_v54  ;;  %v1882_v33 = vadd.f32 %v9655_v62, %v1805_v63  ;;  %v2735_v62 = vsel %vm1017_vm6, %v2732_v59, %v2734_v50  ;;  %v9665_v59 = vld [vmem:[#allocation24_spill] sm:$0xff] }
 0x47e   : > { %v3147_v2 = vadd.f32 %v3146_v19, %v3070_v23  ;;  %v3381_v6 = vpop.permute.xlu2 %3380  ;;  %v9669_v50 = vld [vmem:[#allocation32_spill] sm:$0xff] }
 0x47f   : > { %v3298_v42 = vadd.f32 %v3297_v41, %v3221_v56  ;;  %4076 = vmatpush.msrb.mxu3 %v3766_v28  ;;  %v3439_v58 = vsel %vm1375_vm2, %v1982_v5, %v3381_v6  ;;  %v1941_v54 = vmax.f32 %v1882_v33, 0.0  ;;  %v3303_v12 = vpop.f32.mrf.mxu3 }
 0x480   : > { %v3479_v23 = vrot.slane %v3439_v58, 7 }
 0x481   : > { %v3331_v40 = vmax.f32 %v3298_v42, 0.0  ;;  %v3149_v11 = vpop.f32.mrf.mxu2  ;;  %v1981_v7 = vsel %vm7728_vm11, %v1941_v54, 0.0  ;;  %vm9667_vm11 = vcmask 1045504  }
 0x482   : > { %vm9668_vm1 = vmmov %vm9667_vm11 }
 0x483   : > { %v3351_v41 = vsel %vm7937_vm7, %v3331_v40, 0.0  ;;  %v3072_v26 = vpop.f32.mrf.mxu1  ;;  %v9659_v40 = vld [vmem:[#allocation22_spill] sm:$0xff]  ;;  %vm9685_vm12 = vmmov %vm9668_vm1 }
 0x484   : > { %v3223_v10 = vpop.f32.mrf.mxu0  ;;  %v5064_v36 = vpack.i.bf16 %v3351_v41, %v7619_v39  ;;  %v3073_v56 = vadd.f32 %v3072_v26, %v2996_v4  ;;  %v1580_v39 = vadd.f32 %v7906_v35, %v9656_v0  ;;  %v9664_v0 = vld [vmem:[#allocation26_spill] sm:$0xff] }
 0x485   : > { %v3224_v22 = vadd.f32 %v3223_v10, %v3147_v2  ;;  %v3548_v2 = vsel %vm900_vm5, %v3479_v23, 0.0  ;;  %v9662_v10 = vld [vmem:[#allocation87_spill] sm:$0xff] }
 0x486   : > { %5065 = vrot.lane.b32.xlu1 %v5064_v36, %s9468_s25  ;;  %v3150_v42 = vadd.f32 %v3149_v11, %v3073_v56  ;;  %v1657_v28 = vadd.f32 %v9659_v40, %v1580_v39  ;;  %v1583_v36 = vadd.f32 %v7906_v35, %v9662_v10  ;;  %v9671_v10 = vld [vmem:[#allocation88_spill] sm:$0xff] }
 0x487   : > { %v3301_v14 = vadd.f32 %v3300_v48, %v3224_v22  ;;  %v3577_v22 = vrot.slane %v3548_v2, 1 }
 0x488   : > { %v1734_v4 = vadd.f32 %v9663_v44, %v1657_v28  ;;  %v9672_v44 = vld [vmem:[#allocation12_spill] sm:$0xff] }
 0x489   : > { %v3332_v27 = vmax.f32 %v3301_v14, 0.0 }
 0x48a   : > { %v1811_v39 = vadd.f32 %v9664_v0, %v1734_v4  ;;  %v9675_v0 = vld [vmem:[#allocation56_spill] sm:$0xff] }
 0x48b   : > { %v3352_v43 = vsel %vm7978_vm10, %v3332_v27, 0.0  ;;  %v3633_v27 = vrot.slane %v3548_v2, 2 }
 0x48c   : > { %v3226_v19 = vpop.f32.mrf.mxu0  ;;  %3406 = vrot.lane.b32.xlu0 %v3352_v43, %s9468_s25 }
 0x48d   : > { %v3227_v20 = vadd.f32 %v3226_v19, %v3150_v42  ;;  %v1660_v19 = vadd.f32 %v9665_v59, %v1583_v36 }
 0x48e   : > { %v3379_v48 = vpop.permute.xlu1 %3378 }
 0x48f   : > { %v3304_v41 = vadd.f32 %v3303_v12, %v3227_v20  ;;  %v3438_v25 = vsel %vm1375_vm2, %v1981_v7, %v3379_v48  ;;  %v1737_v12 = vadd.f32 %v9669_v50, %v1660_v19  ;;  %v9670_v7 = vld [vmem:[#allocation53_spill] sm:$0xff] }
 0x490   : > { %v3478_v26 = vrot.slane %v3438_v25, 7  ;;  %v1586_v2 = vadd.f32 %v7906_v35, %v9670_v7  ;;  %v3765_v25 = vld [vmem:[%s9351_s11 + $0x178] sm:$0xff]  ;;  %v9678_v19 = vld [vmem:[#allocation89_spill] sm:$0xff] }
 0x491   : > { %v3333_v6 = vmax.f32 %v3304_v41, 0.0  ;;  %v3749_v41 = vld [vmem:[%s9351_s11 + $0xf8] sm:$0xff]  ;;  %v1814_v36 = vadd.f32 %v9671_v10, %v1737_v12  ;;  %3996 = vmatpush.msra.mxu0 %v3765_v25 }
 0x492   : > { %v3538_v52 = vsel %vm900_vm5, 0.0, %v3478_v26  ;;  %4835 = vmatmul.msk.f32.vlgmr.msrb.gmra.mxu1 %vm7992_vm13, %v3478_v26  ;;  %v3480_v33 = vsel %vm900_vm5, %v3478_v26, %v3479_v23  ;;  %v9666_v23 = vld [vmem:[#allocation84_spill] sm:$0xff]  ;;  %v3748_v26 = vld [vmem:[%s9351_s11 + $0xf0] sm:$0xff]  ;;  %3931 = vmatpush.msra.mxu2 %v3749_v41  ;;  %v1663_v4 = vadd.f32 %v9672_v44, %v1586_v2  ;;  %v9680_v25 = vld [vmem:[#allocation34_spill] sm:$0xff] }
 0x493   : > { %v3574_v5 = vrot.slane %v3538_v52, 1  ;;  %v3630_v56 = vrot.slane %v3538_v52, 2  ;;  %v3353_v14 = vsel %vm7978_vm10, %v3333_v6, 0.0  ;;  %v3575_v58 = vrot.slane %v3480_v33, 1  ;;  %v9673_v6 = vld [vmem:[#allocation86_spill] sm:$0xff]  ;;  %v9679_v2 = vld [vmem:[#allocation68_spill] sm:$0xff] }
 0x494   : > { %v5074_v54 = vpack.i.bf16 %v3353_v14, %v2735_v62  ;;  %v3631_v11 = vrot.slane %v3480_v33, 2  ;;  %v1888_v40 = vadd.f32 %v9666_v23, %v1811_v39  ;;  %3932 = vmatpush.msra.mxu2 %v3748_v26  ;;  %v1589_v39 = vadd.f32 %v7906_v35, %v9675_v0 }
 0x495   : > { %v8010_v42 = vsel %vm1017_vm6, %v3574_v5, %v3575_v58  ;;  %v8013_v43 = vsel %vm1017_vm6, %v3575_v58, %v3577_v22  ;;  %v1891_v22 = vadd.f32 %v9673_v6, %v1814_v36  ;;  %v1592_v41 = vadd.f32 %v7906_v35, %v9679_v2 }
 0x496   : > { %5075 = vrot.lane.b32.xlu1 %v5074_v54, %s9468_s25  ;;  %v8019_v28 = vsel %vm9667_vm11, %v3630_v56, %v3631_v11  ;;  %v8022_v20 = vsel %vm9668_vm1, %v3631_v11, %v3633_v27  ;;  %v1943_v48 = vmax.f32 %v1888_v40, 0.0  ;;  %v9674_v56 = vld [vmem:[#allocation33_spill] sm:$0xff]  ;;  %v9676_v27 = vld [vmem:[#allocation90_spill] sm:$0xff]  ;;  %vm9739_vm11 = vmmov %vm9668_vm1 }
 0x497   : > { %v1740_v14 = vadd.f32 %v9674_v56, %v1663_v4  ;;  %v1944_v58 = vmax.f32 %v1891_v22, 0.0  ;;  %v9677_v11 = vld [vmem:[#allocation25_spill] sm:$0xff]  ;;  %v3387_v22 = vpop.permute.xlu2 %3386  ;;  %v9681_v56 = vld [vmem:[#allocation14_spill] sm:$0xff] }
 0x498   : > { %v1983_v62 = vsel %vm7750_vm14, %v1943_v48, 0.0  ;;  %v1666_v59 = vadd.f32 %v9677_v11, %v1589_v39  ;;  %v3764_v39 = vld [vmem:[%s9351_s11 + $0x170] sm:$0xff] }
 0x499   : > { %v1817_v54 = vadd.f32 %v9676_v27, %v1740_v14  ;;  %v1984_v50 = vsel %vm7750_vm14, %v1944_v58, 0.0  ;;  %v1669_v14 = vadd.f32 %v9681_v56, %v1592_v41  ;;  %v9682_v58 = vld [vmem:[#allocation92_spill] sm:$0xff]  ;;  %3997 = vmatpush.msra.mxu0 %v3764_v39  ;;  %vm9683_vm14 = vmmov %vm9668_vm1 }
 0x49a   : > { %3885 = vmatmul.f32.gmra.mxu1 %v3480_v33  ;;  %v1743_v26 = vadd.f32 %v9680_v25, %v1666_v59  ;;  %v9687_v25 = vld [vmem:[#allocation72_spill] sm:$0xff] }
 0x49b   : > { %v1894_v23 = vadd.f32 %v9678_v19, %v1817_v54  ;;  %v9684_v19 = vld [vmem:[#allocation91_spill] sm:$0xff] }
 0x49c   : > { %v1820_v0 = vadd.f32 %v9682_v58, %v1743_v26 }
 0x49d   : > { %v1945_v10 = vmax.f32 %v1894_v23, 0.0 }
 0x49e   : > { %v3383_v52 = vpop.permute.xlu0 %3382  ;;  %v1897_v23 = vadd.f32 %v9684_v19, %v1820_v0  ;;  %v9692_v19 = vld [vmem:[#allocation52_spill] sm:$0xff] }
 0x49f   : > { %v3440_v33 = vsel %vm1375_vm2, %v1983_v62, %v3383_v52  ;;  %v1985_v27 = vsel %vm7771_vm8, %v1945_v10, 0.0 }
 0x4a0   : > { %v3481_v5 = vrot.slane %v3440_v33, 7  ;;  %v1946_v10 = vmax.f32 %v1897_v23, 0.0 }
 0x4a2   : > { %4837 = vmatmul.msk.f32.gmra.mxu1 %vm7992_vm13, %v3481_v5  ;;  %4851 = vmatmul.msk.f32.vlgmr.msrb.gmra.mxu3 %vm7992_vm13, %v3481_v5  ;;  %v3539_v12 = vsel %vm900_vm5, 0.0, %v3481_v5 }
 0x4a3   : > { %v3579_v4 = vrot.slane %v3539_v12, 1  ;;  %v3635_v6 = vrot.slane %v3539_v12, 2 }
 0x4a6   : > { %v3385_v40 = vpop.permute.xlu1 %3384 }
 0x4a7   : > { %v3441_v48 = vsel %vm1375_vm2, %v1984_v50, %v3385_v40  ;;  %v3442_v40 = vsel %vm1375_vm2, %v1985_v27, %v3387_v22  ;;  %v9689_v22 = vld [vmem:[#allocation93_spill] sm:$0xff] }
 0x4a8   : > { %v3482_v7 = vrot.slane %v3441_v48, 7  ;;  %v8086_v41 = vrot.slane %v3442_v40, 7  ;;  %v3391_v40 = vpop.permute.xlu2 %3390 }
 0x4aa   : > { %v3549_v36 = vsel %vm900_vm5, %v3482_v7, 0.0  ;;  %v3483_v44 = vsel %vm900_vm5, %v3481_v5, %v3482_v7  ;;  %v3747_v5 = vld [vmem:[%s9351_s11 + $0xe8] sm:$0xff]  ;;  %v9686_v7 = vld [vmem:[#allocation35_spill] sm:$0xff] }
 0x4ab   : > { %v3582_v45 = vrot.slane %v3549_v36, 1  ;;  %v3638_v52 = vrot.slane %v3549_v36, 2  ;;  %v3580_v62 = vrot.slane %v3483_v44, 1  ;;  %3891 = vmatmul.f32.gmra.mxu1 %v3483_v44  ;;  %4080 = vmatmul.f32.gmra.mxu3 %v3483_v44  ;;  %v3636_v33 = vrot.slane %v3483_v44, 2  ;;  %v9688_v36 = vld [vmem:[#allocation94_spill] sm:$0xff] }
 0x4ac   : > { %3933 = vmatpush.msra.mxu2 %v3747_v5  ;;  %v1746_v2 = vadd.f32 %v9686_v7, %v1669_v14  ;;  %v9690_v14 = vld [vmem:[#allocation23_spill] sm:$0xff]  ;;  %v9693_v7 = vld [vmem:[#allocation36_spill] sm:$0xff] }
 0x4ad   : > { %v8072_v54 = vsel %vm1017_vm6, %v3579_v4, %v3580_v62  ;;  %v8075_v11 = vsel %vm1017_vm6, %v3580_v62, %v3582_v45  ;;  %v8078_v59 = vsel %vm9683_vm14, %v3635_v6, %v3636_v33  ;;  %v8083_v12 = vsel %vm9685_vm12, %v3636_v33, %v3638_v52  ;;  %v3763_v4 = vld [vmem:[%s9351_s11 + $0x168] sm:$0xff]  ;;  %v3746_v6 = vld [vmem:[%s9351_s11 + $0xe0] sm:$0xff]  ;;  %vm9740_vm14 = vmmov %vm9668_vm1 }
 0x4ae   : > { %v5056_v50 = vpop.permute.xlu1 %5055  ;;  %v1823_v44 = vadd.f32 %v9688_v36, %v1746_v2  ;;  %3998 = vmatpush.msra.mxu0 %v3763_v4  ;;  %3934 = vmatpush.msra.mxu2 %v3746_v6  ;;  %v1986_v62 = vsel %vm7771_vm8, %v1946_v10, 0.0  ;;  %v1595_v58 = vadd.f32 %v7906_v35, %v9690_v14  ;;  %v9691_v5 = vld [vmem:[#allocation71_spill] sm:$0xff]  ;;  %v3797_v4 = vld [vmem:[%s9351_s11 + $0x278] sm:$0xff]  ;;  %v9698_v14 = vld [vmem:[#allocation37_spill] sm:$0xff] }
 0x4af   : > { %v5057_v48 = vunpack.i.l.bf16 %v5056_v50  ;;  %v5058_v52 = vunpack.i.h.bf16 %v5056_v50  ;;  %v3762_v50 = vld [vmem:[%s9351_s11 + $0x160] sm:$0xff]  ;;  %4126 = vmatpush.msra.mxu1 %v3797_v4  ;;  %vm9729_vm8 = vmmov %vm9668_vm1 }
 0x4b0   : > { %v1900_v45 = vadd.f32 %v9689_v22, %v1823_v44  ;;  %v1672_v23 = vadd.f32 %v9692_v19, %v1595_v58  ;;  %3999 = vmatpush.msra.mxu0 %v3762_v50  ;;  %v3745_v44 = vld [vmem:[%s9351_s11 + $0xd8] sm:$0xff]  ;;  %v9695_v6 = vld [vmem:[#allocation15_spill] sm:$0xff]  ;;  %v3744_v50 = vld [vmem:[%s9351_s11 + $0xd0] sm:$0xff] }
 0x4b1   : > { %v2809_v26 = vsel %vm1375_vm2, %v9687_v25, %v5057_v48  ;;  %v2810_v27 = vsel %vm1375_vm2, %v9691_v5, %v5058_v52  ;;  %3935 = vmatpush.msra.mxu2 %v3745_v44  ;;  %v9696_v52 = vld [vmem:[#allocation95_spill] sm:$0xff]  ;;  %vm9741_vm12 = vmmov %vm9668_vm1 }
 0x4b2   : > { %3151 = vmatmul.f32.gmra.mxu2 %v2809_v26  ;;  %v1947_v39 = vmax.f32 %v1900_v45, 0.0  ;;  %v1749_v2 = vadd.f32 %v9693_v7, %v1672_v23  ;;  %v9694_v26 = vld [vmem:[#allocation73_spill] sm:$0xff] }
 0x4b3   : > { %4839 = vmatmul.msk.f32.gmra.mxu1 %vm7992_vm13, %v8086_v41  ;;  %4853 = vmatmul.msk.f32.gmra.mxu3 %vm7992_vm13, %v8086_v41  ;;  %v1598_v10 = vadd.f32 %v7906_v35, %v9694_v26 }
 0x4b4   : > { %v1987_v48 = vsel %vm7802_vm9, %v1947_v39, 0.0  ;;  %v1826_v36 = vadd.f32 %v7516_v60, %v1749_v2  ;;  %v9697_v60 = vld [vmem:[#allocation74_spill] sm:$0xff]  ;;  %v9699_v39 = vld [vmem:[#allocation57_spill] sm:$0xff]  ;;  %3936 = vmatpush.msra.mxu2 %v3744_v50  ;;  %v9703_v50 = vld [vmem:[#allocation39_spill] sm:$0xff] }
 0x4b5   : > { %v3444_v25 = vsel %vm1375_vm2, %v1987_v48, %v3391_v40  ;;  %v1675_v22 = vadd.f32 %v9695_v6, %v1598_v10  ;;  %v3761_v40 = vld [vmem:[%s9351_s11 + $0x158] sm:$0xff]  ;;  %v3796_v48 = vld [vmem:[%s9351_s11 + $0x270] sm:$0xff] }
 0x4b6   : > { %v3389_v33 = vpop.permute.xlu0 %3388  ;;  %v8140_v45 = vrot.slane %v3444_v25, 7  ;;  %v3395_v19 = vpop.permute.xlu2 %3394  ;;  %4000 = vmatpush.msra.mxu0 %v3761_v40  ;;  %4127 = vmatpush.msra.mxu1 %v3796_v48 }
 0x4b7   : > { %v8107_v56 = vsel %vm1375_vm2, %v1986_v62, %v3389_v33  ;;  %v1903_v62 = vadd.f32 %v9696_v52, %v1826_v36  ;;  %v1601_v33 = vadd.f32 %v7906_v35, %v9697_v60  ;;  %v1752_v58 = vadd.f32 %v9698_v14, %v1675_v22  ;;  %v9701_v60 = vld [vmem:[#allocation28_spill] sm:$0xff] }
 0x4b8   : > { %v3485_v0 = vrot.slane %v8107_v56, 7  ;;  %v3795_v14 = vld [vmem:[%s9351_s11 + $0x268] sm:$0xff] }
 0x4b9   : > { %v1678_v5 = vadd.f32 %v9699_v39, %v1601_v33  ;;  %v1829_v23 = vadd.f32 %v7527_v34, %v1752_v58  ;;  %v9700_v34 = vld [vmem:[#allocation38_spill] sm:$0xff]  ;;  %v1604_v33 = vadd.f32 %v7906_v35, %v9701_v60  ;;  %v9702_v58 = vld [vmem:[#allocation16_spill] sm:$0xff]  ;;  %4128 = vmatpush.msra.mxu1 %v3795_v14 }
 0x4ba   : > { %3154 = vmatmul.f32.gmra.mxu2 %v2810_v27  ;;  %v8119_v31 = vsel %vm900_vm5, %v8086_v41, %v3485_v0  ;;  %v1948_v27 = vmax.f32 %v1903_v62, 0.0  ;;  %v9706_v60 = vld [vmem:[#allocation40_spill] sm:$0xff] }
 0x4bb   : > { %3897 = vmatmul.f32.gmra.mxu1 %v8119_v31  ;;  %4086 = vmatmul.f32.gmra.mxu3 %v8119_v31  ;;  %v1906_v2 = vadd.f32 %v7518_v47, %v1829_v23  ;;  %v1755_v10 = vadd.f32 %v9700_v34, %v1678_v5  ;;  %v1681_v39 = vadd.f32 %v9702_v58, %v1604_v33  ;;  %v9707_v58 = vld [vmem:[#allocation78_spill] sm:$0xff] }
 0x4bc   : > { %v1988_v36 = vsel %vm7802_vm9, %v1948_v27, 0.0  ;;  %vm9731_vm9 = vmmov %vm9668_vm1 }
 0x4bd   : > { %v1832_v6 = vadd.f32 %v7540_v38, %v1755_v10  ;;  %v1949_v47 = vmax.f32 %v1906_v2, 0.0  ;;  %v3743_v38 = vld [vmem:[%s9351_s11 + $0xc8] sm:$0xff]  ;;  %v1758_v48 = vadd.f32 %v9703_v50, %v1681_v39  ;;  %v9704_v2 = vld [vmem:[#allocation27_spill] sm:$0xff]  ;;  %v1610_v39 = vadd.f32 %v7906_v35, %v9707_v58  ;;  %v3792_v50 = vld [vmem:[%s9351_s11 + $0x250] sm:$0xff] }
 0x4be   : > { %3937 = vmatpush.msra.mxu2 %v3743_v38  ;;  %v9711_v58 = vld [vmem:[#allocation13_spill] sm:$0xff] }
 0x4bf   : > { %v1909_v52 = vadd.f32 %v7529_v13, %v1832_v6  ;;  %v3760_v13 = vld [vmem:[%s9351_s11 + $0x150] sm:$0xff]  ;;  %v1989_v5 = vsel %vm7825_vm3, %v1949_v47, 0.0 }
 0x4c0   : > { %4001 = vmatpush.msra.mxu0 %v3760_v13  ;;  %v3446_v23 = vsel %vm1375_vm2, %v1989_v5, %v3395_v19  ;;  %v1835_v19 = vadd.f32 %v7556_v51, %v1758_v48  ;;  %v9708_v48 = vld [vmem:[#allocation17_spill] sm:$0xff] }
 0x4c1   : > { %v1950_v27 = vmax.f32 %v1909_v52, 0.0  ;;  %v3742_v52 = vld [vmem:[%s9351_s11 + $0xc0] sm:$0xff] }
 0x4c2   : > { %v1912_v6 = vadd.f32 %v7544_v32, %v1835_v19  ;;  %3938 = vmatpush.msra.mxu2 %v3742_v52  ;;  %v3794_v32 = vld [vmem:[%s9351_s11 + $0x260] sm:$0xff] }
 0x4c3   : > { %4841 = vmatmul.msk.f32.gmra.mxu1 %vm7992_vm13, %v8140_v45  ;;  %4855 = vmatmul.msk.f32.gmra.mxu3 %vm7992_vm13, %v8140_v45 }
 0x4c4   : > { %v1951_v13 = vmax.f32 %v1912_v6, 0.0  ;;  %4129 = vmatpush.msra.mxu1 %v3794_v32  ;;  %v9709_v6 = vld [vmem:[#allocation41_spill] sm:$0xff] }
 0x4c5   : > { %v3756_v32 = vld [vmem:[%s9351_s11 + $0x130] sm:$0xff] }
 0x4c8   : > { %v5061_v7 = vpop.permute.xlu0 %5060 }
 0x4c9   : > { %v5063_v25 = vunpack.i.h.bf16 %v5061_v7  ;;  %v5062_v26 = vunpack.i.l.bf16 %v5061_v7  ;;  %v8203_v7 = vrot.slane %v3446_v23, 7  ;;  %v3793_v23 = vld [vmem:[%s9351_s11 + $0x258] sm:$0xff] }
 0x4ca   : > { %4130 = vmatpush.msra.mxu1 %v3793_v23  ;;  %v9712_v23 = vld [vmem:[#allocation63_spill] sm:$0xff] }
 0x4cb   : > { %v8168_v44 = vsel %vm1375_vm2, %v1988_v36, %v5063_v25  ;;  %v2813_v4 = vsel %vm1375_vm2, %v7416_v30, %v5062_v26  ;;  %v2739_v30 = vpop.permute.xlu1 %2738  ;;  %v1607_v25 = vadd.f32 %v7906_v35, %v9704_v2  ;;  %v1990_v26 = vsel %vm7825_vm3, %v1950_v27, 0.0  ;;  %v3740_v27 = vld [vmem:[%s9351_s11 + $0xb0] sm:$0xff]  ;;  %vm9732_vm3 = vmmov %vm9668_vm1 }
 0x4cc   : > { %v3488_v22 = vrot.slane %v8168_v44, 7  ;;  %3228 = vmatmul.f32.gmra.mxu0 %v2813_v4  ;;  %v2814_v40 = vsel %vm1375_vm2, %v7454_v24, %v2739_v30  ;;  %v3759_v30 = vld [vmem:[%s9351_s11 + $0x148] sm:$0xff]  ;;  %v1687_v2 = vadd.f32 %v9708_v48, %v1610_v39  ;;  %4131 = vmatpush.msra.mxu1 %v3792_v50  ;;  %v3788_v50 = vld [vmem:[%s9351_s11 + $0x230] sm:$0xff]  ;;  %v3754_v48 = vld [vmem:[%s9351_s11 + $0x120] sm:$0xff] }
 0x4cd   : > { %v1684_v4 = vadd.f32 %v9705_v16, %v1607_v25  ;;  %4002 = vmatpush.msra.mxu0 %v3759_v30  ;;  %v1991_v25 = vsel %vm7876_vm4, %v1951_v13, 0.0  ;;  %v3737_v16 = vld [vmem:[%s9351_s11 + $0x98] sm:$0xff]  ;;  %v3736_v30 = vld [vmem:[%s9351_s11 + $0x90] sm:$0xff] }
 0x4ce   : > { %v8175_v62 = vpop.permute.xlu2 %3400  ;;  %v8181_v53 = vsel %vm900_vm5, %v8140_v45, %v3488_v22 }
 0x4cf   : > { %3903 = vmatmul.f32.gmra.mxu1 %v8181_v53  ;;  %4092 = vmatmul.f32.gmra.mxu3 %v8181_v53  ;;  %v1761_v33 = vadd.f32 %v9706_v60, %v1684_v4  ;;  %v3757_v4 = vld [vmem:[%s9351_s11 + $0x138] sm:$0xff]  ;;  %v3790_v60 = vld [vmem:[%s9351_s11 + $0x240] sm:$0xff] }
 0x4d1   : > { %v1838_v38 = vadd.f32 %v7567_v8, %v1761_v33 }
 0x4d3   : > { %v1915_v8 = vadd.f32 %v7558_v49, %v1838_v38  ;;  %v3738_v49 = vld [vmem:[%s9351_s11 + $0xa0] sm:$0xff] }
 0x4d4   : > { %3231 = vmatmul.f32.gmra.mxu0 %v2814_v40  ;;  %v3739_v40 = vld [vmem:[%s9351_s11 + $0xa8] sm:$0xff] }
 0x4d5   : > { %v1952_v19 = vmax.f32 %v1915_v8, 0.0  ;;  %v3735_v8 = vld [vmem:[%s9351_s11 + $0x88] sm:$0xff] }
 0x4d6   : > { %v3397_v34 = vpop.permute.xlu0 %3396  ;;  %v8209_v10 = vpop.permute.xlu2 %5070 }
 0x4d7   : > { %v8213_v36 = vsel %vm1375_vm2, %v1990_v26, %v3397_v34  ;;  %v5073_v24 = vunpack.i.h.bf16 %v8209_v10  ;;  %4843 = vmatmul.msk.f32.gmra.mxu1 %vm7992_vm13, %v8203_v7  ;;  %4857 = vmatmul.msk.f32.gmra.mxu3 %vm7992_vm13, %v8203_v7  ;;  %v3758_v26 = vld [vmem:[%s9351_s11 + $0x140] sm:$0xff]  ;;  %v1992_v38 = vsel %vm7876_vm4, %v1952_v19, 0.0  ;;  %v9713_v19 = vld [vmem:[#allocation42_spill] sm:$0xff]  ;;  %vm9734_vm4 = vmmov %vm9668_vm1 }
 0x4d8   : > { %v3491_v47 = vrot.slane %v8213_v36, 7  ;;  %4003 = vmatpush.msra.mxu0 %v3758_v26  ;;  %v3753_v26 = vld [vmem:[%s9351_s11 + $0x118] sm:$0xff]  ;;  %v3306_v36 = vpop.f32.mrf.mxu3 }
 0x4d9   : > { %v2815_v51 = vsel %vm1375_vm2, %v7649_v3, %v5073_v24  ;;  %v3741_v3 = vld [vmem:[%s9351_s11 + $0xb8] sm:$0xff]  ;;  %v3791_v24 = vld [vmem:[%s9351_s11 + $0x248] sm:$0xff] }
 0x4da   : > { %v8245_v14 = vsel %vm900_vm5, %v8203_v7, %v3491_v47  ;;  %3939 = vmatpush.msra.mxu2 %v3741_v3  ;;  %4132 = vmatpush.msra.mxu1 %v3791_v24  ;;  %v9710_v3 = vld [vmem:[#allocation80_spill] sm:$0xff] }
 0x4db   : > { %4004 = vmatpush.msra.mxu0 %v3757_v4  ;;  %v1613_v13 = vadd.f32 %v7906_v35, %v9710_v3  ;;  %v9714_v4 = vld [vmem:[#allocation46_spill] sm:$0xff]  ;;  %v3751_v3 = vld [vmem:[%s9351_s11 + $0x108] sm:$0xff] }
 0x4dc   : > { %3234 = vmatmul.f32.gmra.mxu0 %v2815_v51  ;;  %3940 = vmatpush.msra.mxu2 %v3740_v27  ;;  %v1764_v51 = vadd.f32 %v9709_v6, %v1687_v2  ;;  %v8314_v27 = vsel %vm1375_vm2, %v1992_v38, %v8175_v62  ;;  %v3734_v62 = vld [vmem:[%s9351_s11 + $0x80] sm:$0xff]  ;;  %v1616_v6 = vadd.f32 %v7906_v35, %v9714_v4 }
 0x4dd   : > { %4133 = vmatpush.msra.mxu1 %v3790_v60  ;;  %4005 = vmatpush.msra.mxu0 %v3756_v32  ;;  %v3494_v2 = vrot.slane %v8314_v27, 7  ;;  %v3752_v60 = vld [vmem:[%s9351_s11 + $0x110] sm:$0xff]  ;;  %v9715_v32 = vld [vmem:[#allocation20_spill] sm:$0xff] }
 0x4de   : > { %v3399_v5 = vpop.permute.xlu1 %3398  ;;  %3941 = vmatpush.msra.mxu2 %v3739_v40  ;;  %v1841_v33 = vadd.f32 %v7578_v1, %v1764_v51  ;;  %v3789_v1 = vld [vmem:[%s9351_s11 + $0x238] sm:$0xff]  ;;  %v1690_v40 = vadd.f32 %v9712_v23, %v1613_v13  ;;  %v3784_v13 = vld [vmem:[%s9351_s11 + $0x210] sm:$0xff]  ;;  %v9717_v23 = vld [vmem:[#allocation43_spill] sm:$0xff] }
 0x4df   : > { %3909 = vmatmul.f32.gmra.mxu1 %v8245_v14  ;;  %4098 = vmatmul.f32.gmra.mxu3 %v8245_v14  ;;  %v3448_v34 = vsel %vm1375_vm2, %v1991_v25, %v3399_v5  ;;  %v8310_v5 = vpop.f32.mrf.mxu1  ;;  %v3787_v25 = vld [vmem:[%s9351_s11 + $0x228] sm:$0xff] }
 0x4e0   : > { %3942 = vmatpush.msra.mxu2 %v3738_v49  ;;  %v8284_v52 = vrot.slane %v3448_v34, 7  ;;  %v1918_v39 = vadd.f32 %v9711_v58, %v1841_v33  ;;  %4134 = vmatpush.msra.mxu1 %v3789_v1  ;;  %v3786_v34 = vld [vmem:[%s9351_s11 + $0x220] sm:$0xff]  ;;  %v1767_v24 = vadd.f32 %v9713_v19, %v1690_v40  ;;  %v1693_v1 = vadd.f32 %v9715_v32, %v1616_v6 }
 0x4e1   : > { %4006 = vmatpush.msra.mxu0 %v3755_v29  ;;  %v3783_v29 = vld [vmem:[%s9351_s11 + $0x208] sm:$0xff] }
 0x4e2   : > { %3943 = vmatpush.msra.mxu2 %v3737_v16  ;;  %4135 = vmatpush.msra.mxu1 %v3788_v50  ;;  %v1953_v49 = vmax.f32 %v1918_v39, 0.0  ;;  %v8347_v16 = vsel %vm900_vm5, %v8284_v52, %v3494_v2  ;;  %v1844_v33 = vadd.f32 %v7591_v37, %v1767_v24  ;;  %v9716_v37 = vld [vmem:[#allocation54_spill] sm:$0xff]  ;;  %v1770_v40 = vadd.f32 %v9717_v23, %v1693_v1  ;;  %v9720_v1 = vld [vmem:[#allocation67_spill] sm:$0xff] }
 0x4e3   : > { %4007 = vmatpush.msra.mxu0 %v3754_v48 }
 0x4e4   : > { %3944 = vmatpush.msra.mxu2 %v3736_v30  ;;  %4136 = vmatpush.msra.mxu1 %v3787_v25  ;;  %v3785_v30 = vld [vmem:[%s9351_s11 + $0x218] sm:$0xff]  ;;  %v1993_v35 = vsel %vm7937_vm7, %v1953_v49, 0.0  ;;  %v1921_v38 = vadd.f32 %v9716_v37, %v1844_v33  ;;  %v9718_v25 = vld [vmem:[#allocation59_spill] sm:$0xff] }
 0x4e5   : > { %4008 = vmatpush.msra.mxu0 %v3753_v26  ;;  %v1847_v49 = vadd.f32 %v9718_v25, %v1770_v40 }
 0x4e6   : > { %3945 = vmatpush.msra.mxu2 %v3735_v8  ;;  %4137 = vmatpush.msra.mxu1 %v3786_v34  ;;  %v3750_v8 = vld [vmem:[%s9351_s11 + $0x100] sm:$0xff]  ;;  %v1954_v48 = vmax.f32 %v1921_v38, 0.0 }
 0x4e7   : > { %4845 = vmatmul.msk.f32.gmra.mxu1 %vm7992_vm13, %v8284_v52  ;;  %4859 = vmatmul.msk.f32.gmra.mxu3 %vm7992_vm13, %v8284_v52  ;;  %v8371_v39 = vpop.f32.mrf.mxu1  ;;  %v9719_v34 = vld [vmem:[#allocation55_spill] sm:$0xff] }
 0x4e8   : > { %3946 = vmatpush.msra.mxu2 %v3734_v62  ;;  %4009 = vmatpush.msra.mxu0 %v3752_v60  ;;  %v3782_v62 = vld [vmem:[%s9351_s11 + $0x200] sm:$0xff]  ;;  %v1924_v19 = vadd.f32 %v9719_v34, %v1847_v49  ;;  %v1994_v6 = vsel %vm7937_vm7, %v1954_v48, 0.0 }
 0x4e9   : > { %4138 = vmatpush.msra.mxu1 %v3785_v30 }
 0x4ea   : > { %4010 = vmatpush.msra.mxu0 %v3751_v3  ;;  %v1955_v30 = vmax.f32 %v1924_v19, 0.0 }
 0x4eb   : > { %4139 = vmatpush.msra.mxu1 %v3784_v13  ;;  %v5072_v13 = vunpack.i.l.bf16 %v8209_v10 }
 0x4ec   : > { %4011 = vmatpush.msra.mxu0 %v3750_v8  ;;  %v9723_v8 = vld [vmem:[#allocation58_spill] sm:$0xff] }
 0x4ed   : > { %4140 = vmatpush.msra.mxu1 %v3783_v29  ;;  %v2812_v40 = vsel %vm1375_vm2, %v7792_v57, %v5072_v13 }
 0x4ee   : > { %v3403_v51 = vpop.permute.xlu0 %3402 }
 0x4ef   : > { %3915 = vmatmul.f32.gmra.mxu1 %v8347_v16  ;;  %4104 = vmatmul.f32.gmra.mxu3 %v8347_v16  ;;  %v3450_v58 = vsel %vm1375_vm2, %v1993_v35, %v3403_v51  ;;  %v8401_v32 = vpop.f32.mrf.mxu1  ;;  %v9721_v35 = vld [vmem:[#allocation44_spill] sm:$0xff] }
 0x4f0   : > { %v8380_v50 = vrot.slane %v3450_v58, 7  ;;  %4141 = vmatpush.msra.mxu1 %v3782_v62  ;;  %v1773_v3 = vadd.f32 %v9721_v35, %v9720_v1  ;;  %v1995_v58 = vsel %vm7978_vm10, %v1955_v30, 0.0  ;;  %v3641_v1 = vrot.slane %v8119_v31, 2 }
 0x4f7   : > { %4847 = vmatmul.msk.f32.gmra.mxu1 %vm7992_vm13, %v8380_v50  ;;  %4861 = vmatmul.msk.f32.gmra.mxu3 %vm7992_vm13, %v8380_v50  ;;  %v8423_v48 = vpop.f32.mrf.mxu1 }
 0x4f8   : > { %v5066_v26 = vpop.permute.xlu1 %5065 }
 0x4f9   : > { %v5068_v24 = vunpack.i.h.bf16 %v5066_v26  ;;  %v5067_v4 = vunpack.i.l.bf16 %v5066_v26 }
 0x4fb   : > { %v8396_v51 = vsel %vm1375_vm2, %v1994_v6, %v5068_v24  ;;  %v2811_v60 = vsel %vm1375_vm2, %v7813_v15, %v5067_v4  ;;  %v9722_v15 = vld [vmem:[#allocation62_spill] sm:$0xff] }
 0x4fc   : > { %v3497_v33 = vrot.slane %v8396_v51, 7  ;;  %3157 = vmatmul.f32.gmra.mxu2 %v2811_v60  ;;  %v1850_v38 = vadd.f32 %v9722_v15, %v1773_v3  ;;  %v3585_v60 = vrot.slane %v8119_v31, 1  ;;  %v3590_v3 = vrot.slane %v8181_v53, 1  ;;  %v3799_v51 = vld [vmem:[%s9351_s11 + $0x288] sm:$0xff] }
 0x4fe   : > { %v8409_v61 = vsel %vm900_vm5, %v8380_v50, %v3497_v33  ;;  %v3407_v37 = vpop.permute.xlu0 %3406  ;;  %v1927_v29 = vadd.f32 %v9723_v8, %v1850_v38  ;;  %v3813_v8 = vld [vmem:[%s9351_s11 + $0x2f8] sm:$0xff] }
 0x4ff   : > { %3921 = vmatmul.f32.gmra.mxu1 %v8409_v61  ;;  %4110 = vmatmul.f32.gmra.mxu3 %v8409_v61  ;;  %v3452_v23 = vsel %vm1375_vm2, %v1995_v58, %v3407_v37  ;;  %v3551_v58 = vsel %vm900_vm5, %v3488_v22, 0.0  ;;  %v3646_v22 = vrot.slane %v8181_v53, 2 }
 0x500   : > { %v8421_v62 = vrot.slane %v3452_v23, 7  ;;  %v1956_v10 = vmax.f32 %v1927_v29, 0.0  ;;  %4191 = vmatpush.msrb.mxu2 %v3813_v8  ;;  %v3592_v23 = vrot.slane %v3551_v58, 1  ;;  %v3811_v8 = vld [vmem:[%s9351_s11 + $0x2e8] sm:$0xff] }
 0x502   : > { %v1996_v57 = vsel %vm7978_vm10, %v1956_v10, 0.0  ;;  %v8512_v44 = vsel %vm1017_vm6, %v3590_v3, %v3592_v23  ;;  %v3828_v23 = vld [vmem:[%s9351_s11 + $0x370] sm:$0xff]  ;;  %vm9738_vm10 = vmmov %vm9668_vm1 }
 0x504   : > { %3160 = vmatmul.f32.gmra.mxu2 %v2812_v40  ;;  %v3845_v40 = vld [vmem:[%s9351_s11 + $0x3f8] sm:$0xff] }
 0x505   : > { %4321 = vmatpush.msra.mxu3 %v3845_v40  ;;  %v572_v40 = vadd.s32 8, %v7720_v55 }
 0x507   : > { %4849 = vmatmul.msk.f32.gmra.mxu1 %vm7992_vm13, %v8421_v62  ;;  %4863 = vmatmul.msk.f32.gmra.mxu3 %vm7992_vm13, %v8421_v62  ;;  %vm582_vm7 = vcmp.ge.s32.totalorder %v572_v40, 0  ;;  %vm592_vm15 = vcmp.lt.s32.totalorder %v572_v40, 16 }
 0x508   : > { %v5076_v25 = vpop.permute.xlu1 %5075  ;;  %vm8586_vm0 = vmand %vm582_vm7, %vm592_vm15 }
 0x509   : > { %v5078_v49 = vunpack.i.h.bf16 %v5076_v25  ;;  %v5077_v26 = vunpack.i.l.bf16 %v5076_v25  ;;  %v3812_v25 = vld [vmem:[%s9351_s11 + $0x2f0] sm:$0xff]  ;;  %vm9750_vm15 = vmmov %vm9668_vm1 }
 0x50a   : > { %4192 = vmatpush.msrb.mxu2 %v3812_v25 }
 0x50b   : > { %v8434_v34 = vsel %vm1375_vm2, %v1996_v57, %v5078_v49  ;;  %v2816_v19 = vsel %vm1375_vm2, %v7652_v46, %v5077_v26  ;;  %v3829_v49 = vld [vmem:[%s9351_s11 + $0x378] sm:$0xff]  ;;  %v8524_v57 = vsel %vm900_vm5, 0.0, %v8203_v7 }
 0x50c   : > { %v9416_v24 = vrot.slane %v8434_v34, 7  ;;  %3237 = vmatmul.f32.gmra.mxu0 %v2816_v19  ;;  %3947 = vmatmul.f32.vlgmr.msra.gmra.mxu2 %v8010_v42  ;;  %v3540_v42 = vsel %vm900_vm5, 0.0, %v8086_v41  ;;  %v3595_v19 = vrot.slane %v8245_v14, 1 }
 0x50d   : > { %v3640_v56 = vrot.slane %v3540_v42, 2  ;;  %4256 = vmatpush.msrb.mxu0 %v3829_v49  ;;  %4193 = vmatpush.msrb.mxu2 %v3811_v8  ;;  %v3651_v8 = vrot.slane %v8245_v14, 2 }
 0x50e   : > { %v8444_v4 = vsel %vm900_vm5, %v8421_v62, %v9416_v24  ;;  %v3661_v24 = vrot.slane %v8409_v61, 2 }
 0x50f   : > { %v8446_v6 = vpop.f32.mrf.mxu1  ;;  %3927 = vmatmul.f32.gmra.mxu1 %v8444_v4  ;;  %4116 = vmatmul.f32.gmra.mxu3 %v8444_v4  ;;  %v8487_v13 = vsel %vm9729_vm8, %v3640_v56, %v3641_v1  ;;  %vm9744_vm8 = vmmov %vm9668_vm1 }
 0x510   : > { %9724 = vst [vmem:[#allocation11_spill] sm:$0xff] %v8446_v6  ;;  %4257 = vmatpush.msrb.mxu0 %v3828_v23  ;;  %v8593_v23 = vsel %vm900_vm5, 0.0, %v8284_v52  ;;  %v3836_v6 = vld [vmem:[%s9351_s11 + $0x3b0] sm:$0xff] }
 0x514   : > { %3950 = vmatmul.f32.gmra.mxu2 %v8013_v43  ;;  %4012 = vmatmul.f32.vlgmr.msra.gmra.mxu0 %v8019_v28  ;;  %v3584_v43 = vrot.slane %v3540_v42, 1  ;;  %v3844_v42 = vld [vmem:[%s9351_s11 + $0x3f0] sm:$0xff] }
 0x515   : > { %4322 = vmatpush.msra.mxu3 %v3844_v42 }
 0x516   : > { %v8466_v28 = vsel %vm1017_vm6, %v3584_v43, %v3585_v60 }
 0x517   : > { %v8452_v46 = vpop.f32.mrf.mxu1  ;;  %4142 = vmatmul.f32.vlgmr.msra.gmra.mxu1 %v8072_v54 }
 0x518   : > { %9725 = vst [vmem:[#allocation30_spill] sm:$0xff] %v8452_v46 }
 0x51c   : > { %3953 = vmatmul.f32.gmra.mxu2 %v8072_v54  ;;  %4015 = vmatmul.f32.gmra.mxu0 %v8022_v20  ;;  %v3550_v20 = vsel %vm900_vm5, %v3485_v0, 0.0  ;;  %v3541_v0 = vsel %vm900_vm5, 0.0, %v8140_v45 }
 0x51d   : > { %v3587_v30 = vrot.slane %v3550_v20, 1  ;;  %v3589_v37 = vrot.slane %v3541_v0, 1  ;;  %v3643_v38 = vrot.slane %v3550_v20, 2  ;;  %v3645_v26 = vrot.slane %v3541_v0, 2 }
 0x51e   : > { %v3594_v0 = vrot.slane %v8524_v57, 1 }
 0x51f   : > { %v8457_v21 = vpop.f32.mrf.mxu1  ;;  %4145 = vmatmul.f32.gmra.mxu1 %v8075_v11  ;;  %v8492_v15 = vsel %vm1017_vm6, %v3589_v37, %v3590_v3  ;;  %v8507_v10 = vsel %vm9731_vm9, %v3641_v1, %v3643_v38  ;;  %v8534_v20 = vsel %vm9732_vm3, %v3645_v26, %v3646_v22  ;;  %v8555_v38 = vsel %vm900_vm5, %v3491_v47, 0.0  ;;  %v3860_v26 = vld [vmem:[%s9351_s11 + $0x470] sm:$0xff]  ;;  %vm9745_vm9 = vmmov %vm9668_vm1 }
 0x520   : > { %9726 = vst [vmem:[#allocation21_spill] sm:$0xff] %v8457_v21  ;;  %v8550_v37 = vsel %vm1017_vm6, %v3594_v0, %v3595_v19  ;;  %v3597_v47 = vrot.slane %v8555_v38, 1  ;;  %v3837_v21 = vld [vmem:[%s9351_s11 + $0x3b8] sm:$0xff] }
 0x524   : > { %3956 = vmatmul.f32.gmra.mxu2 %v8075_v11  ;;  %4018 = vmatmul.f32.gmra.mxu0 %v8078_v59  ;;  %v8477_v11 = vsel %vm1017_vm6, %v3585_v60, %v3587_v30  ;;  %v3861_v60 = vld [vmem:[%s9351_s11 + $0x478] sm:$0xff]  ;;  %v8539_v30 = vld [vmem:[%s9350_s10] ss:$0 sm:$0xff] }
 0x525   : > { %4386 = vmatpush.msrb.mxu1 %v3861_v60  ;;  %v2999_v1 = vadd.f32 %v8539_v30, %v7679_v9  ;;  %v3648_v9 = vrot.slane %v3551_v58, 2  ;;  %v3843_v58 = vld [vmem:[%s9351_s11 + $0x3e8] sm:$0xff]  ;;  %v3002_v60 = vadd.f32 %v8539_v30, %v7691_v17 }
 0x526   : > { %4323 = vmatpush.msra.mxu3 %v3843_v58  ;;  %v3600_v58 = vrot.slane %v8347_v16, 1 }
 0x527   : > { %4148 = vmatmul.f32.gmra.mxu1 %v8466_v28  ;;  %v3076_v3 = vadd.f32 %v8310_v5, %v2999_v1  ;;  %v8573_v42 = vsel %vm9734_vm4, %v3646_v22, %v3648_v9  ;;  %v8583_v22 = vsel %vm1017_vm6, %v3595_v19, %v3597_v47  ;;  %v3827_v19 = vld [vmem:[%s9351_s11 + $0x368] sm:$0xff] }
 0x528   : > { %v8472_v54 = vpop.f32.mrf.mxu1  ;;  %4387 = vmatpush.msrb.mxu1 %v3860_v26  ;;  %4258 = vmatpush.msrb.mxu0 %v3827_v19  ;;  %v3842_v26 = vld [vmem:[%s9351_s11 + $0x3e0] sm:$0xff] }
 0x529   : > { %9727 = vst [vmem:[#allocation83_spill] sm:$0xff] %v8472_v54  ;;  %4324 = vmatpush.msra.mxu3 %v3842_v26  ;;  %v3841_v26 = vld [vmem:[%s9351_s11 + $0x3d8] sm:$0xff] }
 0x52b   : > { %4325 = vmatpush.msra.mxu3 %v3841_v26  ;;  %v3822_v26 = vld [vmem:[%s9351_s11 + $0x340] sm:$0xff] }
 0x52c   : > { %3959 = vmatmul.f32.gmra.mxu2 %v8466_v28  ;;  %4021 = vmatmul.f32.gmra.mxu0 %v8083_v12 }
 0x52f   : > { %4151 = vmatmul.f32.gmra.mxu1 %v8477_v11 }
 0x530   : > { %v8481_v35 = vpop.f32.mrf.mxu1 }
 0x531   : > { %9728 = vst [vmem:[#allocation29_spill] sm:$0xff] %v8481_v35 }
 0x534   : > { %3962 = vmatmul.f32.gmra.mxu2 %v8477_v11  ;;  %4024 = vmatmul.f32.gmra.mxu0 %v8487_v13 }
 0x535   : > { %v3152_v43 = vpop.f32.mrf.mxu2 }
 0x536   : > { %v3153_v5 = vadd.f32 %v3152_v43, %v3076_v3  ;;  %v3079_v3 = vadd.f32 %v8371_v39, %v3002_v60  ;;  %v3810_v39 = vld [vmem:[%s9351_s11 + $0x2e0] sm:$0xff]  ;;  %v3859_v60 = vld [vmem:[%s9351_s11 + $0x468] sm:$0xff] }
 0x537   : > { %4154 = vmatmul.f32.gmra.mxu1 %v8492_v15  ;;  %4194 = vmatpush.msrb.mxu2 %v3810_v39 }
 0x538   : > { %v8501_v29 = vpop.f32.mrf.mxu1  ;;  %4388 = vmatpush.msrb.mxu1 %v3859_v60  ;;  %v3858_v60 = vld [vmem:[%s9351_s11 + $0x460] sm:$0xff] }
 0x539   : > { %9730 = vst [vmem:[#allocation82_spill] sm:$0xff] %v8501_v29  ;;  %v3814_v29 = vld [vmem:[%s9351_s11 + $0x300] sm:$0xff] }
 0x53a   : > { %4389 = vmatpush.msrb.mxu1 %v3858_v60  ;;  %v3840_v60 = vld [vmem:[%s9351_s11 + $0x3d0] sm:$0xff] }
 0x53b   : > { %4326 = vmatpush.msra.mxu3 %v3840_v60 }
 0x53c   : > { %3965 = vmatmul.f32.gmra.mxu2 %v8492_v15  ;;  %4027 = vmatmul.f32.gmra.mxu0 %v8507_v10 }
 0x53d   : > { %v3155_v0 = vpop.f32.mrf.mxu2 }
 0x53f   : > { %4157 = vmatmul.f32.gmra.mxu1 %v8512_v44 }
 0x540   : > { %v8543_v56 = vpop.f32.mrf.mxu1 }
 0x541   : > { %9733 = vst [vmem:[#allocation81_spill] sm:$0xff] %v8543_v56 }
 0x544   : > { %3968 = vmatmul.f32.gmra.mxu2 %v8512_v44  ;;  %4030 = vmatmul.f32.gmra.mxu0 %v8534_v20 }
 0x547   : > { %4160 = vmatmul.f32.gmra.mxu1 %v8550_v37 }
 0x549   : > { %v3229_v25 = vpop.f32.mrf.mxu0 }
 0x54a   : > { %v3230_v49 = vadd.f32 %v3229_v25, %v3153_v5  ;;  %v3156_v5 = vadd.f32 %v3155_v0, %v3079_v3  ;;  %v3650_v25 = vrot.slane %v8524_v57, 2 }
 0x54c   : > { %v3307_v43 = vadd.f32 %v3306_v36, %v3230_v49  ;;  %v8577_v1 = vpop.f32.mrf.mxu1  ;;  %3971 = vmatmul.f32.gmra.mxu2 %v8550_v37  ;;  %4033 = vmatmul.f32.gmra.mxu0 %v8573_v42  ;;  %v3599_v49 = vrot.slane %v8593_v23, 1  ;;  %v8614_v0 = vsel %vm9738_vm10, %v3650_v25, %v3651_v8  ;;  %v3807_v25 = vld [vmem:[%s9351_s11 + $0x2c8] sm:$0xff] }
 0x54d   : > { %9735 = vst [vmem:[#allocation85_spill] sm:$0xff] %v8577_v1  ;;  %v3816_v1 = vld [vmem:[%s9351_s11 + $0x310] sm:$0xff] }
 0x54e   : > { %v3334_v9 = vmax.f32 %v3307_v43, 0.0  ;;  %v3309_v43 = vpop.f32.mrf.mxu3  ;;  %v8624_v39 = vsel %vm1017_vm6, %v3599_v49, %v3600_v58  ;;  %v3806_v49 = vld [vmem:[%s9351_s11 + $0x2c0] sm:$0xff] }
 0x54f   : > { %4163 = vmatmul.f32.gmra.mxu1 %v8583_v22 }
 0x550   : > { %v3354_v40 = vsel %vm8586_vm0, %v3334_v9, 0.0  ;;  %v3809_v9 = vld [vmem:[%s9351_s11 + $0x2d8] sm:$0xff] }
 0x551   : > { %v3232_v36 = vpop.f32.mrf.mxu0  ;;  %3410 = vrot.lane.b32.xlu2 %v3354_v40, %s9468_s25  ;;  %4195 = vmatpush.msrb.mxu2 %v3809_v9  ;;  %v3808_v40 = vld [vmem:[%s9351_s11 + $0x2d0] sm:$0xff] }
 0x552   : > { %v3233_v47 = vadd.f32 %v3232_v36, %v3156_v5  ;;  %v3653_v5 = vrot.slane %v8555_v38, 2  ;;  %v3826_v36 = vld [vmem:[%s9351_s11 + $0x360] sm:$0xff]  ;;  %v8642_v38 = vsel %vm900_vm5, %v3494_v2, 0.0 }
 0x553   : > { %4196 = vmatpush.msrb.mxu2 %v3808_v40  ;;  %4259 = vmatpush.msrb.mxu0 %v3826_v36  ;;  %v3602_v2 = vrot.slane %v8642_v38, 1  ;;  %v3804_v40 = vld [vmem:[%s9351_s11 + $0x2b0] sm:$0xff] }
 0x554   : > { %v3310_v57 = vadd.f32 %v3309_v43, %v3233_v47  ;;  %v8616_v3 = vpop.f32.mrf.mxu1  ;;  %3974 = vmatmul.f32.gmra.mxu2 %v8583_v22  ;;  %4036 = vmatmul.f32.gmra.mxu0 %v8614_v0  ;;  %v8655_v27 = vsel %vm9739_vm11, %v3651_v8, %v3653_v5  ;;  %v3825_v8 = vld [vmem:[%s9351_s11 + $0x358] sm:$0xff]  ;;  %v3656_v5 = vrot.slane %v8347_v16, 2  ;;  %v3824_v36 = vld [vmem:[%s9351_s11 + $0x350] sm:$0xff] }
 0x555   : > { %4197 = vmatpush.msrb.mxu2 %v3807_v25  ;;  %v8669_v9 = vsel %vm1017_vm6, %v3600_v58, %v3602_v2  ;;  %4260 = vmatpush.msrb.mxu0 %v3825_v8  ;;  %v8682_v58 = vsel %vm900_vm5, 0.0, %v8380_v50  ;;  %v3823_v25 = vld [vmem:[%s9351_s11 + $0x348] sm:$0xff] }
 0x556   : > { %v3335_v19 = vmax.f32 %v3310_v57, 0.0  ;;  %v3805_v57 = vld [vmem:[%s9351_s11 + $0x2b8] sm:$0xff]  ;;  %v8730_v60 = vpop.f32.mrf.mxu3 }
 0x557   : > { %4166 = vmatmul.f32.gmra.mxu1 %v8624_v39  ;;  %4198 = vmatpush.msrb.mxu2 %v3806_v49  ;;  %v3802_v49 = vld [vmem:[%s9351_s11 + $0x2a0] sm:$0xff] }
 0x558   : > { %v3355_v47 = vsel %vm8586_vm0, %v3335_v19, 0.0  ;;  %v3655_v19 = vrot.slane %v8593_v23, 2  ;;  %4261 = vmatpush.msrb.mxu0 %v3824_v36  ;;  %v3803_v23 = vld [vmem:[%s9351_s11 + $0x2a8] sm:$0xff]  ;;  %v3821_v36 = vld [vmem:[%s9351_s11 + $0x338] sm:$0xff] }
 0x559   : > { %3412 = vrot.lane.b32.xlu0 %v3355_v47, %s9468_s25  ;;  %4199 = vmatpush.msrb.mxu2 %v3805_v57  ;;  %v3605_v47 = vrot.slane %v8409_v61, 1  ;;  %v3857_v57 = vld [vmem:[%s9351_s11 + $0x458] sm:$0xff] }
 0x55a   : > { %4262 = vmatpush.msrb.mxu0 %v3823_v25  ;;  %v8701_v2 = vsel %vm9668_vm1, %v3655_v19, %v3656_v5  ;;  %v3801_v19 = vld [vmem:[%s9351_s11 + $0x298] sm:$0xff]  ;;  %4390 = vmatpush.msrb.mxu1 %v3857_v57  ;;  %v3554_v25 = vsel %vm900_vm5, %v3497_v33, 0.0  ;;  %v3658_v57 = vrot.slane %v8642_v38, 2 }
 0x55b   : > { %4200 = vmatpush.msrb.mxu2 %v3804_v40  ;;  %v3604_v40 = vrot.slane %v8682_v58, 1  ;;  %v3607_v33 = vrot.slane %v3554_v25, 1 }
 0x55c   : > { %v8658_v43 = vpop.f32.mrf.mxu1  ;;  %3977 = vmatmul.f32.gmra.mxu2 %v8624_v39  ;;  %4039 = vmatmul.f32.gmra.mxu0 %v8655_v27 }
 0x55d   : > { %4201 = vmatpush.msrb.mxu2 %v3803_v23  ;;  %4263 = vmatpush.msrb.mxu0 %v3822_v26  ;;  %v8718_v23 = vsel %vm1017_vm6, %v3604_v40, %v3605_v47  ;;  %v3820_v26 = vld [vmem:[%s9351_s11 + $0x330] sm:$0xff]  ;;  %v3819_v40 = vld [vmem:[%s9351_s11 + $0x328] sm:$0xff] }
 0x55f   : > { %4169 = vmatmul.f32.gmra.mxu1 %v8669_v9  ;;  %4202 = vmatpush.msrb.mxu2 %v3802_v49  ;;  %v3800_v49 = vld [vmem:[%s9351_s11 + $0x290] sm:$0xff] }
 0x560   : > { %4264 = vmatpush.msrb.mxu0 %v3821_v36  ;;  %v3798_v36 = vld [vmem:[%s9351_s11 + $0x280] sm:$0xff] }
 0x561   : > { %4203 = vmatpush.msrb.mxu2 %v3801_v19  ;;  %v8740_v19 = vsel %vm9740_vm14, %v3656_v5, %v3658_v57  ;;  %v3839_v5 = vld [vmem:[%s9351_s11 + $0x3c8] sm:$0xff]  ;;  %v8759_v57 = vsel %vm1017_vm6, %v3605_v47, %v3607_v33  ;;  %v3545_v47 = vsel %vm900_vm5, 0.0, %v8421_v62  ;;  %v3610_v33 = vrot.slane %v8444_v4, 1 }
 0x562   : > { %4265 = vmatpush.msrb.mxu0 %v3820_v26  ;;  %v3856_v26 = vld [vmem:[%s9351_s11 + $0x450] sm:$0xff]  ;;  %4327 = vmatpush.msra.mxu3 %v3839_v5  ;;  %v3855_v5 = vld [vmem:[%s9351_s11 + $0x448] sm:$0xff]  ;;  %v3609_v56 = vrot.slane %v3545_v47, 1 }
 0x563   : > { %4204 = vmatpush.msrb.mxu2 %v3800_v49  ;;  %v3818_v49 = vld [vmem:[%s9351_s11 + $0x320] sm:$0xff]  ;;  %4391 = vmatpush.msrb.mxu1 %v3856_v26  ;;  %v8782_v26 = vpop.f32.mrf.mxu3 }
 0x564   : > { %v8706_v8 = vpop.f32.mrf.mxu1  ;;  %3980 = vmatmul.f32.gmra.mxu2 %v8669_v9  ;;  %4042 = vmatmul.f32.gmra.mxu0 %v8701_v2  ;;  %v8795_v35 = vsel %vm1017_vm6, %v3609_v56, %v3610_v33 }
 0x565   : > { %4205 = vmatpush.msrb.mxu2 %v3799_v51  ;;  %4266 = vmatpush.msrb.mxu0 %v3819_v40  ;;  %v3817_v51 = vld [vmem:[%s9351_s11 + $0x318] sm:$0xff]  ;;  %v3660_v40 = vrot.slane %v8682_v58, 2 }
 0x566   : > { %4392 = vmatpush.msrb.mxu1 %v3855_v5 }
 0x567   : > { %4172 = vmatmul.f32.gmra.mxu1 %v8718_v23  ;;  %4206 = vmatpush.msrb.mxu2 %v3798_v36  ;;  %v3815_v36 = vld [vmem:[%s9351_s11 + $0x308] sm:$0xff]  ;;  %v8785_v58 = vsel %vm9741_vm12, %v3660_v40, %v3661_v24  ;;  %v9742_v40 = vrot.slane %v8434_v34, 7  ;;  %v3005_v34 = vadd.f32 %v8539_v30, %v7702_v18  ;;  %v3235_v18 = vpop.f32.mrf.mxu0 }
 0x568   : > { %4267 = vmatpush.msrb.mxu0 %v3818_v49  ;;  %v3838_v49 = vld [vmem:[%s9351_s11 + $0x3c0] sm:$0xff] }
 0x569   : > { %4328 = vmatpush.msra.mxu3 %v3838_v49  ;;  %v3555_v49 = vsel %vm900_vm5, %v9742_v40, 0.0 }
 0x56a   : > { %4268 = vmatpush.msrb.mxu0 %v3817_v51  ;;  %v3612_v54 = vrot.slane %v3555_v49, 1 }
 0x56b   : > { %v8807_v5 = vpop.f32.mrf.mxu3  ;;  %4329 = vmatpush.msra.mxu3 %v3837_v21 }
 0x56c   : > { %v8745_v38 = vpop.f32.mrf.mxu1  ;;  %3983 = vmatmul.f32.gmra.mxu2 %v8718_v23  ;;  %4045 = vmatmul.f32.gmra.mxu0 %v8740_v19  ;;  %9743 = vst [vmem:[#allocation22_spill] sm:$0xff] %v8807_v5  ;;  %v8820_v40 = vsel %vm1017_vm6, %v3610_v33, %v3612_v54  ;;  %v9746_v33 = vld [vmem:[#allocation98_spill] sm:$0xff] }
 0x56d   : > { %4269 = vmatpush.msrb.mxu0 %v3816_v1  ;;  %v3663_v1 = vrot.slane %v3554_v25, 2  ;;  %v3082_v25 = vadd.f32 %v8401_v32, %v3005_v34  ;;  %v3853_v32 = vld [vmem:[%s9351_s11 + $0x438] sm:$0xff]  ;;  %4330 = vmatpush.msra.mxu3 %v3836_v6 }
 0x56f   : > { %4175 = vmatmul.f32.gmra.mxu1 %v8759_v57  ;;  %4270 = vmatpush.msrb.mxu0 %v3815_v36  ;;  %v3854_v36 = vld [vmem:[%s9351_s11 + $0x440] sm:$0xff]  ;;  %v8810_v56 = vsel %vm9744_vm8, %v3661_v24, %v3663_v1  ;;  %v3666_v24 = vrot.slane %v8444_v4, 2  ;;  %v573_v1 = vadd.s32 9, %v7720_v55 }
 0x570   : > { %4393 = vmatpush.msrb.mxu1 %v3854_v36  ;;  %v3665_v36 = vrot.slane %v3545_v47, 2 }
 0x571   : > { %4271 = vmatpush.msrb.mxu0 %v3814_v29  ;;  %vm583_vm3 = vcmp.ge.s32.totalorder %v573_v1, 0  ;;  %vm593_vm4 = vcmp.lt.s32.totalorder %v573_v1, 16 }
 0x572   : > { %v8832_v54 = vsel %vm9745_vm9, %v3665_v36, %v3666_v24  ;;  %4394 = vmatpush.msrb.mxu1 %v3853_v32  ;;  %vm8844_vm7 = vmand %vm583_vm3, %vm593_vm4 }
 0x573   : > { %v8841_v34 = vpop.f32.mrf.mxu3 }
 0x574   : > { %v8787_v51 = vpop.f32.mrf.mxu1  ;;  %3986 = vmatmul.f32.gmra.mxu2 %v8759_v57  ;;  %4048 = vmatmul.f32.gmra.mxu0 %v8785_v58  ;;  %9747 = vst [vmem:[#allocation87_spill] sm:$0xff] %v8841_v34 }
 0x577   : > { %4178 = vmatmul.f32.gmra.mxu1 %v8795_v35 }
 0x57c   : > { %v8814_v29 = vpop.f32.mrf.mxu1  ;;  %3989 = vmatmul.f32.gmra.mxu2 %v8795_v35  ;;  %4051 = vmatmul.f32.gmra.mxu0 %v8810_v56 }
 0x57f   : > { %v3158_v5 = vpop.f32.mrf.mxu2  ;;  %4181 = vmatmul.f32.gmra.mxu1 %v8820_v40 }
 0x580   : > { %v3159_v21 = vadd.f32 %v3158_v5, %v3082_v25  ;;  %v3008_v5 = vadd.f32 %v8539_v30, %v9746_v33  ;;  %v3668_v30 = vrot.slane %v3555_v49, 2  ;;  %v3852_v49 = vld [vmem:[%s9351_s11 + $0x430] sm:$0xff] }
 0x581   : > { %4395 = vmatpush.msrb.mxu1 %v3852_v49 }
 0x582   : > { %v3236_v46 = vadd.f32 %v3235_v18, %v3159_v21  ;;  %v3085_v25 = vadd.f32 %v8423_v48, %v3008_v5  ;;  %v8855_v48 = vsel %vm9750_vm15, %v3666_v24, %v3668_v30 }
 0x584   : > { %v8836_v55 = vpop.f32.mrf.mxu1  ;;  %3992 = vmatmul.f32.gmra.mxu2 %v8820_v40  ;;  %4054 = vmatmul.f32.gmra.mxu0 %v8832_v54  ;;  %v3313_v47 = vadd.f32 %v8730_v60, %v3236_v46  ;;  %v3835_v46 = vld [vmem:[%s9351_s11 + $0x3a8] sm:$0xff] }
 0x585   : > { %4331 = vmatpush.msra.mxu3 %v3835_v46  ;;  %v9753_v46 = vld [vmem:[#allocation75_spill] sm:$0xff] }
 0x586   : > { %v3336_v21 = vmax.f32 %v3313_v47, 0.0 }
 0x587   : > { %v3161_v6 = vpop.f32.mrf.mxu2 }
 0x588   : > { %v3162_v36 = vadd.f32 %v3161_v6, %v3085_v25  ;;  %v3356_v32 = vsel %vm8844_vm7, %v3336_v21, 0.0  ;;  %v8865_v25 = vpop.f32.mrf.mxu3  ;;  %v3851_v6 = vld [vmem:[%s9351_s11 + $0x428] sm:$0xff] }
 0x589   : > { %v3238_v33 = vpop.f32.mrf.mxu0  ;;  %3414 = vrot.lane.b32.xlu1 %v3356_v32, %s9468_s25  ;;  %9751 = vst [vmem:[#allocation31_spill] sm:$0xff] %v8865_v25  ;;  %4396 = vmatpush.msrb.mxu1 %v3851_v6  ;;  %v9752_v32 = vld [vmem:[#allocation49_spill] sm:$0xff] }
 0x58a   : > { %v3239_v1 = vadd.f32 %v3238_v33, %v3162_v36  ;;  %v8889_v36 = vld [vmem:[%s9346_s6] ss:$0 sm:$0xff]  ;;  %v3832_v25 = vld [vmem:[%s9351_s11 + $0x390] sm:$0xff] }
 0x58b   : > { %v1622_v33 = vadd.f32 %v8889_v36, %v9752_v32  ;;  %v9757_v32 = vld [vmem:[#allocation66_spill] sm:$0xff] }
 0x58c   : > { %v3316_v60 = vadd.f32 %v8782_v26, %v3239_v1  ;;  %v8858_v5 = vpop.f32.mrf.mxu1  ;;  %4057 = vmatmul.f32.gmra.mxu0 %v8855_v48  ;;  %4207 = vmatmul.f32.vlgmr.msrb.gmra.mxu2 %v8078_v59  ;;  %v3834_v59 = vld [vmem:[%s9351_s11 + $0x3a0] sm:$0xff] }
 0x58d   : > { %4332 = vmatpush.msra.mxu3 %v3834_v59  ;;  %v9756_v59 = vld [vmem:[#allocation45_spill] sm:$0xff] }
 0x58e   : > { %v3337_v47 = vmax.f32 %v3316_v60, 0.0  ;;  %v1699_v60 = vadd.f32 %v9753_v46, %v1622_v33 }
 0x58f   : > { %v8867_v21 = vpop.f32.mrf.mxu2 }
 0x590   : > { %v3357_v24 = vsel %vm8844_vm7, %v3337_v47, 0.0  ;;  %v8896_v49 = vpop.f32.mrf.mxu3  ;;  %v1776_v6 = vadd.f32 %v9756_v59, %v1699_v60 }
 0x591   : > { %3416 = vrot.lane.b32.xlu2 %v3357_v24, %s9468_s25  ;;  %v8872_v26 = vpop.f32.mrf.mxu0  ;;  %9754 = vst [vmem:[#allocation26_spill] sm:$0xff] %v8896_v49  ;;  %s508_s25 = sadd.s32 %s4738_s16, %s4737_s20  ;;  %s4890_s20 = sshll.u32 %s5167_s28, 4 }
 0x592   : > { %v1853_v33 = vadd.f32 %v9757_v32, %v1776_v6  ;;  %v3831_v32 = vld [vmem:[%s9351_s11 + $0x388] sm:$0xff]  ;;  %s4739_s19 = sshll.u32 %s508_s25, 3  ;;  %s4885_s16 = sshll.u32 %s5171_s29, 5 }
 0x593   : > { %s9028_s3 = scalar_lea.vmem %s9342_s2, %s4739_s19  ;;  %s4609_s25 = sadd.s32 %s4890_s20, %s4885_s16 }
 0x594   : > { %v8880_v30 = vpop.f32.mrf.mxu1  ;;  %4210 = vmatmul.f32.gmra.mxu2 %v8083_v12  ;;  %4867 = vmatmul.msk.f32.vlgmr.msrb.gmra.mxu0 %vm7992_vm13, %v8086_v41  ;;  %v3833_v12 = vld [vmem:[%s9351_s11 + $0x398] sm:$0xff]  ;;  %v3850_v41 = vld [vmem:[%s9351_s11 + $0x420] sm:$0xff]  ;;  %v4472_v63 = vld [vmem:[%s9028_s3 + $0x28] sm:$0xff]  ;;  %s4886_s19 = sshll.u32 %s4609_s25, 3  ;;  %s5109_s16 = scalar_lea.hbm %s9353_s13, 512 }
 0x595   : > { %4333 = vmatpush.msra.mxu3 %v3833_v12  ;;  %4397 = vmatpush.msrb.mxu1 %v3850_v41  ;;  %v3849_v12 = vld [vmem:[%s9351_s11 + $0x418] sm:$0xff]  ;;  %v9758_v41 = vld [vmem:[#allocation61_spill] sm:$0xff]  ;;  %s4611_s0 = scalar_lea.hbm %s9353_s13, %s4886_s19 }
 0x596   : > { %s4614_s24 = sshll.u32 %s4611_s0, 4  ;;  %s4615_s24 = int_to_ptr.hbm [resolvable:$true] %s4614_s24 }
 0x597   : > { %v8893_v1 = vpop.f32.mrf.mxu2  ;;  %4334 = vmatpush.msra.mxu3 %v3832_v25  ;;  %4398 = vmatpush.msrb.mxu1 %v3849_v12 }
 0x598   : > { %v8923_v34 = vpop.f32.mrf.mxu3 }
 0x599   : > { %v8898_v47 = vpop.f32.mrf.mxu0  ;;  %9759 = vst [vmem:[#allocation84_spill] sm:$0xff] %v8923_v34  ;;  %4335 = vmatpush.msra.mxu3 %v3831_v32 }
 0x59c   : > { %v8906_v24 = vpop.f32.mrf.mxu1  ;;  %4213 = vmatmul.f32.gmra.mxu2 %v8487_v13  ;;  %4275 = vmatmul.f32.gmra.mxu0 %v8119_v31 }
 0x59d   : > { %9755 = vst [vmem:[#allocation24_spill] sm:$0xff] %v8906_v24  ;;  %v1930_v24 = vadd.f32 %v9758_v41, %v1853_v33 }
 0x59f   : > { %v8912_v46 = vpop.f32.mrf.mxu2  ;;  %v1957_v60 = vmax.f32 %v1930_v24, 0.0 }
 0x5a0   : > { %v8938_v33 = vpop.f32.mrf.mxu3 }
 0x5a1   : > { %v8914_v49 = vpop.f32.mrf.mxu0  ;;  %9763 = vst [vmem:[#allocation12_spill] sm:$0xff] %v8938_v33  ;;  %v1997_v25 = vsel %vm8586_vm0, %v1957_v60, 0.0  ;;  %v3848_v60 = vld [vmem:[%s9351_s11 + $0x410] sm:$0xff] }
 0x5a2   : > { %4399 = vmatpush.msrb.mxu1 %v3848_v60  ;;  %v9769_v60 = vld [vmem:[#allocation51_spill] sm:$0xff] }
 0x5a3   : > { %v1625_v33 = vadd.f32 %v8889_v36, %v9769_v60  ;;  %v9775_v60 = vld [vmem:[#allocation65_spill] sm:$0xff] }
 0x5a4   : > { %v8925_v31 = vpop.f32.mrf.mxu1  ;;  %4216 = vmatmul.f32.gmra.mxu2 %v8507_v10  ;;  %4869 = vmatmul.msk.f32.gmra.mxu0 %vm7992_vm13, %v8140_v45 }
 0x5a5   : > { %9760 = vst [vmem:[#allocation32_spill] sm:$0xff] %v8925_v31 }
 0x5a7   : > { %v8931_v59 = vpop.f32.mrf.mxu2 }
 0x5a8   : > { %9761 = vst [vmem:[#allocation53_spill] sm:$0xff] %v8931_v59 }
 0x5a9   : > { %v8933_v6 = vpop.f32.mrf.mxu0 }
 0x5aa   : > { %9762 = vst [vmem:[#allocation88_spill] sm:$0xff] %v8933_v6 }
 0x5ab   : > { %v3411_v12 = vpop.permute.xlu2 %3410 }
 0x5ac   : > { %v3454_v41 = vsel %vm1375_vm2, %v1997_v25, %v3411_v12  ;;  %v8943_v34 = vpop.f32.mrf.mxu1  ;;  %4219 = vmatmul.f32.gmra.mxu2 %v8534_v20  ;;  %4281 = vmatmul.f32.gmra.mxu0 %v8181_v53  ;;  %v3830_v53 = vld [vmem:[%s9351_s11 + $0x380] sm:$0xff]  ;;  %v3847_v25 = vld [vmem:[%s9351_s11 + $0x408] sm:$0xff] }
 0x5ad   : > { %9764 = vst [vmem:[#allocation86_spill] sm:$0xff] %v8943_v34  ;;  %v8947_v45 = vrot.slane %v3454_v41, 7  ;;  %v8971_v41 = vpop.f32.mrf.mxu3  ;;  %4336 = vmatpush.msra.mxu3 %v3830_v53  ;;  %4400 = vmatpush.msrb.mxu1 %v3847_v25  ;;  %v9771_v34 = vld [vmem:[#allocation76_spill] sm:$0xff]  ;;  %v9774_v53 = vld [vmem:[#allocation47_spill] sm:$0xff] }
 0x5ae   : > { %9768 = vst [vmem:[#allocation25_spill] sm:$0xff] %v8971_v41 }
 0x5af   : > { %v8949_v24 = vpop.f32.mrf.mxu2  ;;  %4865 = vmatmul.msk.f32.gmra.mxu3 %vm7992_vm13, %v8947_v45 }
 0x5b0   : > { %9765 = vst [vmem:[#allocation33_spill] sm:$0xff] %v8949_v24  ;;  %v1702_v24 = vadd.f32 %v9771_v34, %v1625_v33 }
 0x5b1   : > { %v8957_v32 = vpop.f32.mrf.mxu0 }
 0x5b2   : > { %9766 = vst [vmem:[#allocation56_spill] sm:$0xff] %v8957_v32  ;;  %v1779_v25 = vadd.f32 %v9774_v53, %v1702_v24 }
 0x5b4   : > { %v8965_v12 = vpop.f32.mrf.mxu1  ;;  %4222 = vmatmul.f32.gmra.mxu2 %v8573_v42  ;;  %4871 = vmatmul.msk.f32.gmra.mxu0 %vm7992_vm13, %v8203_v7  ;;  %v1856_v41 = vadd.f32 %v9775_v60, %v1779_v25  ;;  %v9014_v25 = vld [vmem:[%s9352_s12] ss:$0 sm:$0xff] }
 0x5b5   : > { %9767 = vst [vmem:[#allocation90_spill] sm:$0xff] %v8965_v12  ;;  %v3846_v12 = vld [vmem:[%s9351_s11 + $0x400] sm:$0xff]  ;;  %v8990_v34 = vpop.f32.mrf.mxu3  ;;  %v3908_v17 = vadd.f32 %v9014_v25, %v8616_v3  ;;  %v3926_v18 = vadd.f32 %v9014_v25, %v8836_v55 }
 0x5b6   : > { %4401 = vmatpush.msrb.mxu1 %v3846_v12  ;;  %9776 = vst [vmem:[#allocation14_spill] sm:$0xff] %v8990_v34  ;;  %v9023_v34 = vsel %vm900_vm5, 0.0, %v8947_v45 }
 0x5b7   : > { %v8975_v32 = vpop.f32.mrf.mxu2 }
 0x5b8   : > { %9770 = vst [vmem:[#allocation89_spill] sm:$0xff] %v8975_v32  ;;  %v9779_v32 = vld [vmem:[#allocation64_spill] sm:$0xff] }
 0x5b9   : > { %v8978_v6 = vpop.f32.mrf.mxu0  ;;  %v1933_v31 = vadd.f32 %v9779_v32, %v1856_v41 }
 0x5ba   : > { %9772 = vst [vmem:[#allocation68_spill] sm:$0xff] %v8978_v6 }
 0x5bc   : > { %v8984_v7 = vpop.f32.mrf.mxu1  ;;  %4225 = vmatmul.f32.gmra.mxu2 %v8614_v0  ;;  %4287 = vmatmul.f32.gmra.mxu0 %v8245_v14  ;;  %v1958_v14 = vmax.f32 %v1933_v31, 0.0 }
 0x5bd   : > { %9773 = vst [vmem:[#allocation34_spill] sm:$0xff] %v8984_v7  ;;  %v4102_v12 = vpop.f32.mrf.mxu3  ;;  %v4468_v7 = vld [vmem:[%s9028_s3 + $0x8] sm:$0xff] }
 0x5be   : > { %v1998_v32 = vsel %vm8586_vm0, %v1958_v14, 0.0  ;;  %4501 = vrot.lane.b32.xlu1 %v4468_v7, %s5186_s22  ;;  %v9784_v7 = vld [vmem:[#allocation18_spill] sm:$0xff]  ;;  %vm9794_vm0 = vmmov %vm9668_vm1 }
 0x5bf   : > { %v8992_v33 = vpop.f32.mrf.mxu2  ;;  %vm9797_vm10 = vmmov %vm9794_vm0 }
 0x5c0   : > { %9777 = vst [vmem:[#allocation92_spill] sm:$0xff] %v8992_v33 }
 0x5c1   : > { %v8995_v6 = vpop.f32.mrf.mxu0 }
 0x5c2   : > { %9778 = vst [vmem:[#allocation91_spill] sm:$0xff] %v8995_v6 }
 0x5c4   : > { %v8998_v59 = vpop.f32.mrf.mxu1  ;;  %4228 = vmatmul.f32.gmra.mxu2 %v8655_v27  ;;  %4873 = vmatmul.msk.f32.gmra.mxu0 %vm7992_vm13, %v8284_v52 }
 0x5c5   : > { %9780 = vst [vmem:[#allocation35_spill] sm:$0xff] %v8998_v59 }
 0x5c7   : > { %v9005_v24 = vpop.f32.mrf.mxu2 }
 0x5c8   : > { %9781 = vst [vmem:[#allocation72_spill] sm:$0xff] %v9005_v24  ;;  %v4105_v24 = vpop.f32.mrf.mxu3 }
 0x5c9   : > { %v9007_v53 = vpop.f32.mrf.mxu0 }
 0x5ca   : > { %9782 = vst [vmem:[#allocation94_spill] sm:$0xff] %v9007_v53 }
 0x5cb   : > { %v3413_v41 = vpop.permute.xlu0 %3412 }
 0x5cc   : > { %v3455_v52 = vsel %vm1375_vm2, %v1998_v32, %v3413_v41  ;;  %v9017_v60 = vpop.f32.mrf.mxu1  ;;  %4231 = vmatmul.f32.gmra.mxu2 %v8701_v2  ;;  %4293 = vmatmul.f32.gmra.mxu0 %v8347_v16  ;;  %v3688_v41 = vrot.slane %v9023_v34, 1 }
 0x5cd   : > { %9783 = vst [vmem:[#allocation93_spill] sm:$0xff] %v9017_v60  ;;  %v3503_v31 = vrot.slane %v3455_v52, 7  ;;  %v4467_v60 = vld [vmem:[%s9028_s3] sm:$0xff] }
 0x5ce   : > { %4499 = vrot.lane.b32.xlu0 %v4467_v60, %s5186_s22 }
 0x5cf   : > { %v3972_v14 = vpop.f32.mrf.mxu2  ;;  %v9034_v32 = vsel %vm900_vm5, %v8947_v45, %v3503_v31  ;;  %v9045_v6 = vsel %vm900_vm5, %v3503_v31, 0.0 }
 0x5d0   : > { %v3973_v16 = vadd.f32 %v3972_v14, %v3908_v17  ;;  %4122 = vmatmul.f32.gmra.mxu3 %v9034_v32  ;;  %v3689_v52 = vrot.slane %v9034_v32, 1  ;;  %v3691_v60 = vrot.slane %v9045_v6, 1 }
 0x5d1   : > { %v4037_v53 = vpop.f32.mrf.mxu0 }
 0x5d2   : > { %v4038_v59 = vadd.f32 %v4037_v53, %v3973_v16  ;;  %v9042_v3 = vsel %vm1017_vm6, %v3688_v41, %v3689_v52  ;;  %v3911_v53 = vadd.f32 %v9014_v25, %v8658_v43  ;;  %v9061_v33 = vsel %vm1017_vm6, %v3689_v52, %v3691_v60 }
 0x5d3   : > { %4184 = vmatmul.f32.gmra.mxu1 %v9042_v3 }
 0x5d4   : > { %v4103_v17 = vadd.f32 %v4102_v12, %v4038_v59  ;;  %v4167_v14 = vpop.f32.mrf.mxu1  ;;  %4234 = vmatmul.f32.gmra.mxu2 %v8740_v19  ;;  %4875 = vmatmul.msk.f32.gmra.mxu0 %vm7992_vm13, %v8380_v50 }
 0x5d6   : > { %v9055_v16 = vadd.f32 %v4167_v14, %v4103_v17  ;;  %v4108_v17 = vpop.f32.mrf.mxu3 }
 0x5d7   : > { %v3975_v41 = vpop.f32.mrf.mxu2 }
 0x5d8   : > { %v3976_v31 = vadd.f32 %v3975_v41, %v3911_v53  ;;  %4337 = vmatmul.f32.vlgmr.msra.gmra.mxu3 %v8466_v28  ;;  %v3914_v28 = vadd.f32 %v9014_v25, %v8706_v8  ;;  %v1631_v41 = vadd.f32 %v8889_v36, %v9784_v7  ;;  %v9786_v8 = vld [vmem:[#allocation50_spill] sm:$0xff] }
 0x5d9   : > { %v4040_v59 = vpop.f32.mrf.mxu0 }
 0x5da   : > { %v4041_v12 = vadd.f32 %v4040_v59, %v3976_v31 }
 0x5db   : > { %4187 = vmatmul.f32.gmra.mxu1 %v9061_v33 }
 0x5dc   : > { %v4106_v50 = vadd.f32 %v4105_v24, %v4041_v12  ;;  %v4170_v43 = vpop.f32.mrf.mxu1  ;;  %4237 = vmatmul.f32.gmra.mxu2 %v8785_v58  ;;  %4299 = vmatmul.f32.gmra.mxu0 %v8409_v61  ;;  %v9785_v24 = vld [vmem:[#allocation79_spill] sm:$0xff] }
 0x5dd   : > { %v1708_v31 = vadd.f32 %v9785_v24, %v1631_v41  ;;  %v9789_v24 = vld [vmem:[#allocation77_spill] sm:$0xff] }
 0x5de   : > { %v9068_v14 = vadd.f32 %v4170_v43, %v4106_v50  ;;  %v4111_v7 = vpop.f32.mrf.mxu3 }
 0x5df   : > { %v3978_v53 = vpop.f32.mrf.mxu2  ;;  %v1785_v50 = vadd.f32 %v9786_v8, %v1708_v31  ;;  %v9790_v31 = vld [vmem:[#allocation70_spill] sm:$0xff]  ;;  %v9791_v8 = vld [vmem:[#allocation48_spill] sm:$0xff] }
 0x5e0   : > { %v3979_v52 = vadd.f32 %v3978_v53, %v3914_v28  ;;  %4340 = vmatmul.f32.gmra.mxu3 %v8477_v11  ;;  %v3917_v11 = vadd.f32 %v9014_v25, %v8745_v38  ;;  %v9787_v28 = vld [vmem:[#allocation19_spill] sm:$0xff] }
 0x5e1   : > { %v4043_v60 = vpop.f32.mrf.mxu0  ;;  %v1628_v53 = vadd.f32 %v8889_v36, %v9787_v28  ;;  %v9792_v28 = vld [vmem:[#allocation96_spill] sm:$0xff] }
 0x5e2   : > { %v4044_v59 = vadd.f32 %v4043_v60, %v3979_v52  ;;  %v4470_v60 = vld [vmem:[%s9028_s3 + $0x18] sm:$0xff] }
 0x5e3   : > { %4402 = vmatmul.f32.vlgmr.msrb.gmra.mxu1 %v8487_v13  ;;  %4505 = vrot.lane.b32.xlu0 %v4470_v60, %s5186_s22 }
 0x5e4   : > { %v4109_v61 = vadd.f32 %v4108_v17, %v4044_v59  ;;  %v4173_v12 = vpop.f32.mrf.mxu1  ;;  %4240 = vmatmul.f32.gmra.mxu2 %v8810_v56  ;;  %4877 = vmatmul.msk.f32.gmra.mxu0 %vm7992_vm13, %v8421_v62  ;;  %v9788_v17 = vld [vmem:[#allocation97_spill] sm:$0xff]  ;;  %v1705_v62 = vadd.f32 %v9789_v24, %v1628_v53 }
 0x5e5   : > { %v1862_v41 = vadd.f32 %v9788_v17, %v1785_v50  ;;  %v3920_v50 = vadd.f32 %v9014_v25, %v8787_v51  ;;  %v9793_v24 = vld [vmem:[#allocation69_spill] sm:$0xff] }
 0x5e6   : > { %v9082_v43 = vadd.f32 %v4173_v12, %v4109_v61 }
 0x5e7   : > { %v3981_v13 = vpop.f32.mrf.mxu2  ;;  %v1939_v61 = vadd.f32 %v9790_v31, %v1862_v41  ;;  %v4114_v41 = vpop.f32.mrf.mxu3  ;;  %v3923_v31 = vadd.f32 %v9014_v25, %v8814_v29 }
 0x5e8   : > { %v3982_v52 = vadd.f32 %v3981_v13, %v3917_v11  ;;  %4343 = vmatmul.f32.gmra.mxu3 %v8492_v15  ;;  %v1782_v15 = vadd.f32 %v9791_v8, %v1705_v62 }
 0x5e9   : > { %v4046_v59 = vpop.f32.mrf.mxu0  ;;  %v1960_v17 = vmax.f32 %v1939_v61, 0.0 }
 0x5ea   : > { %v4047_v38 = vadd.f32 %v4046_v59, %v3982_v52  ;;  %v1859_v53 = vadd.f32 %v9792_v28, %v1782_v15 }
 0x5eb   : > { %4405 = vmatmul.f32.gmra.mxu1 %v8507_v10  ;;  %v2000_v51 = vsel %vm8844_vm7, %v1960_v17, 0.0 }
 0x5ec   : > { %v4112_v36 = vadd.f32 %v4111_v7, %v4047_v38  ;;  %v4176_v12 = vpop.f32.mrf.mxu1  ;;  %4243 = vmatmul.f32.gmra.mxu2 %v8832_v54  ;;  %4305 = vmatmul.f32.gmra.mxu0 %v8444_v4  ;;  %v4471_v7 = vld [vmem:[%s9028_s3 + $0x20] sm:$0xff]  ;;  %v3417_v4 = vpop.permute.xlu2 %3416  ;;  %v1936_v62 = vadd.f32 %v9793_v24, %v1859_v53  ;;  %v3695_v53 = vrot.slane %v9023_v34, 2 }
 0x5ed   : > { %4507 = vrot.lane.b32.xlu1 %v4471_v7, %s5186_s22 }
 0x5ee   : > { %v9098_v11 = vadd.f32 %v4176_v12, %v4112_v36  ;;  %v1959_v36 = vmax.f32 %v1936_v62, 0.0  ;;  %v3696_v12 = vrot.slane %v9034_v32, 2 }
 0x5ef   : > { %v3984_v13 = vpop.f32.mrf.mxu2 }
 0x5f0   : > { %v3985_v10 = vadd.f32 %v3984_v13, %v3920_v50  ;;  %4346 = vmatmul.f32.gmra.mxu3 %v8512_v44  ;;  %v3457_v44 = vsel %vm1375_vm2, %v2000_v51, %v3417_v4  ;;  %v4469_v50 = vld [vmem:[%s9028_s3 + $0x10] sm:$0xff]  ;;  %v4117_v13 = vpop.f32.mrf.mxu3  ;;  %v1999_v29 = vsel %vm8844_vm7, %v1959_v36, 0.0 }
 0x5f1   : > { %v4049_v52 = vpop.f32.mrf.mxu0  ;;  %v3506_v8 = vrot.slane %v3457_v44, 7  ;;  %4503 = vrot.lane.b32.xlu2 %v4469_v50, %s5186_s22  ;;  %v4473_v44 = vld [vmem:[%s9028_s3 + $0x30] sm:$0xff]  ;;  %v3929_v50 = vadd.f32 %v9014_v25, %v8858_v5 }
 0x5f2   : > { %v4050_v60 = vadd.f32 %v4049_v52, %v3985_v10  ;;  %v9126_v10 = vsel %vm9794_vm0, %v3695_v53, %v3696_v12  ;;  %4511 = vrot.lane.b32.xlu0 %v4473_v44, %s5186_s22 }
 0x5f3   : > { %4408 = vmatmul.f32.gmra.mxu1 %v8534_v20  ;;  %v3557_v7 = vsel %vm900_vm5, %v3506_v8, 0.0 }
 0x5f4   : > { %v4115_v59 = vadd.f32 %v4114_v41, %v4050_v60  ;;  %v4179_v38 = vpop.f32.mrf.mxu1  ;;  %4246 = vmatmul.f32.gmra.mxu2 %v8855_v48  ;;  %4879 = vmatmul.msk.f32.gmra.mxu0 %vm7992_vm13, %v8947_v45  ;;  %v3707_v52 = vrot.slane %v3557_v7, 1  ;;  %v3714_v4 = vrot.slane %v3557_v7, 2 }
 0x5f6   : > { %v9115_v61 = vadd.f32 %v4179_v38, %v4115_v59 }
 0x5f7   : > { %v3987_v20 = vpop.f32.mrf.mxu2 }
 0x5f8   : > { %v3988_v15 = vadd.f32 %v3987_v20, %v3923_v31  ;;  %4349 = vmatmul.f32.gmra.mxu3 %v8550_v37 }
 0x5f9   : > { %v4052_v28 = vpop.f32.mrf.mxu0  ;;  %4509 = vrot.lane.b32.xlu2 %v4472_v63, %s5186_s22 }
 0x5fa   : > { %v4053_v45 = vadd.f32 %v4052_v28, %v3988_v15 }
 0x5fb   : > { %v3415_v17 = vpop.permute.xlu1 %3414  ;;  %4411 = vmatmul.f32.gmra.mxu1 %v8573_v42  ;;  %v3698_v42 = vrot.slane %v9045_v6, 2 }
 0x5fc   : > { %v3456_v37 = vsel %vm1375_vm2, %v1999_v29, %v3415_v17  ;;  %v9130_v41 = vadd.f32 %v4117_v13, %v4053_v45  ;;  %4249 = vmatmul.f32.gmra.mxu2 %v9126_v10  ;;  %4311 = vmatmul.f32.gmra.mxu0 %v9034_v32  ;;  %vm9795_vm2 = vmmov %vm9794_vm0  ;;  %v9798_v13 = vld [vmem:[#allocation11_spill] sm:$0xff]  ;;  %v4482_v29 = vld [vmem:[%s9028_s3 + $0x78] sm:$0xff] }
 0x5fd   : > { %v3505_v34 = vrot.slane %v3456_v37, 7 }
 0x5ff   : > { %v3547_v60 = vsel %vm900_vm5, 0.0, %v3505_v34  ;;  %v3990_v24 = vpop.f32.mrf.mxu2  ;;  %v3507_v62 = vsel %vm900_vm5, %v3505_v34, %v3506_v8  ;;  %vm9796_vm5 = vmmov %vm9794_vm0 }
 0x600   : > { %v3991_v51 = vadd.f32 %v3990_v24, %v3926_v18  ;;  %4352 = vmatmul.f32.gmra.mxu3 %v8583_v22  ;;  %v3705_v59 = vrot.slane %v3507_v62, 1  ;;  %v3712_v38 = vrot.slane %v3507_v62, 2  ;;  %v3704_v32 = vrot.slane %v3547_v60, 1 }
 0x601   : > { %v4055_v31 = vpop.f32.mrf.mxu0  ;;  %v3711_v55 = vrot.slane %v3547_v60, 2  ;;  %v3699_v22 = vsel %vm9796_vm5, %v3696_v12, %v3698_v42  ;;  %v9800_v42 = vld [vmem:[#allocation22_spill] sm:$0xff] }
 0x602   : > { %v4056_v6 = vadd.f32 %v4055_v31, %v3991_v51  ;;  %v3706_v36 = vsel %vm1017_vm6, %v3704_v32, %v3705_v59  ;;  %v3708_v20 = vsel %vm1017_vm6, %v3705_v59, %v3707_v52  ;;  %v9145_v15 = vsel %vm9795_vm2, %v3712_v38, %v3714_v4  ;;  %v9801_v59 = vld [vmem:[#allocation21_spill] sm:$0xff] }
 0x603   : > { %4414 = vmatmul.f32.gmra.mxu1 %v8614_v0  ;;  %v9150_v8 = vsel %vm9797_vm10, %v3711_v55, %v3712_v38  ;;  %v4474_v0 = vld [vmem:[%s9028_s3 + $0x38] sm:$0xff]  ;;  %v3890_v38 = vadd.f32 %v9014_v25, %v9801_v59  ;;  %v4481_v31 = vld [vmem:[%s9028_s3 + $0x70] sm:$0xff]  ;;  %vm4547_vm6 = vcmask 1031168  }
 0x604   : > { %4252 = vmatmul.f32.gmra.mxu2 %v3699_v22  ;;  %4881 = vmatmul.msk.f32.gmra.mxu0 %vm7992_vm13, %v3505_v34 }
 0x605   : > { %4513 = vrot.lane.b32.xlu1 %v4474_v0, %s5186_s22 }
 0x607   : > { %v3993_v28 = vpop.f32.mrf.mxu2 }
 0x608   : > { %v3994_v53 = vadd.f32 %v3993_v28, %v3929_v50  ;;  %4355 = vmatmul.f32.gmra.mxu3 %v8624_v39  ;;  %v4476_v39 = vld [vmem:[%s9028_s3 + $0x48] sm:$0xff] }
 0x609   : > { %v4058_v45 = vpop.f32.mrf.mxu0  ;;  %4517 = vrot.lane.b32.xlu0 %v4476_v39, %s5186_s22 }
 0x60a   : > { %v4059_v12 = vadd.f32 %v4058_v45, %v3994_v53  ;;  %v9804_v45 = vld [vmem:[#allocation83_spill] sm:$0xff] }
 0x60b   : > { %4417 = vmatmul.f32.gmra.mxu1 %v8655_v27  ;;  %v4477_v27 = vld [vmem:[%s9028_s3 + $0x50] sm:$0xff] }
 0x60c   : > { %4317 = vmatmul.f32.gmra.mxu0 %v3507_v62 }
 0x60d   : > { %4519 = vrot.lane.b32.xlu1 %v4477_v27, %s5186_s22 }
 0x610   : > { %4358 = vmatmul.f32.gmra.mxu3 %v8669_v9  ;;  %v4475_v9 = vld [vmem:[%s9028_s3 + $0x40] sm:$0xff] }
 0x611   : > { %4515 = vrot.lane.b32.xlu2 %v4475_v9, %s5186_s22  ;;  %v9806_v9 = vld [vmem:[#allocation53_spill] sm:$0xff] }
 0x613   : > { %4420 = vmatmul.f32.gmra.mxu1 %v8701_v2  ;;  %v4479_v2 = vld [vmem:[%s9028_s3 + $0x60] sm:$0xff] }
 0x614   : > { %4523 = vrot.lane.b32.xlu0 %v4479_v2, %s5186_s22 }
 0x618   : > { %4361 = vmatmul.f32.gmra.mxu3 %v8718_v23 }
 0x61b   : > { %4423 = vmatmul.f32.gmra.mxu1 %v8740_v19 }
 0x61c   : > { %4529 = vrot.lane.b32.xlu0 %v4482_v29, %s5186_s22 }
 0x620   : > { %4364 = vmatmul.f32.gmra.mxu3 %v8759_v57  ;;  %v4208_v57 = vpop.f32.mrf.mxu2 }
 0x623   : > { %4426 = vmatmul.f32.gmra.mxu1 %v8785_v58  ;;  %v4273_v58 = vpop.f32.mrf.mxu0 }
 0x628   : > { %4367 = vmatmul.f32.gmra.mxu3 %v8795_v35  ;;  %v4480_v35 = vld [vmem:[%s9028_s3 + $0x68] sm:$0xff] }
 0x629   : > { %4525 = vrot.lane.b32.xlu1 %v4480_v35, %s5186_s22 }
 0x62b   : > { %4429 = vmatmul.f32.gmra.mxu1 %v8810_v56  ;;  %v4478_v56 = vld [vmem:[%s9028_s3 + $0x58] sm:$0xff]  ;;  %v4276_v5 = vpop.f32.mrf.mxu0  ;;  %s5103_s3 = sshra.s32 %s4615_s24, 4  ;;  %s5104_s3 = int_to_ptr.hbm [resolvable:$true] %s5103_s3 }
 0x62c   : > { %4521 = vrot.lane.b32.xlu2 %v4478_v56, %s5186_s22  ;;  %p5110_p4 = scmp.lt.s32.totalorder %s5104_s3, %s9353_s13 }
 0x630   : > { %4370 = vmatmul.f32.gmra.mxu3 %v8820_v40  ;;  %v4211_v40 = vpop.f32.mrf.mxu2  ;;  %v4502_v29 = vpop.permute.xlu1 %4501 }
 0x632   : > { %v4120_v23 = vpop.f32.mrf.mxu3 }
 0x633   : > { %v4121_v19 = vadd.f32 %v4120_v23, %v4056_v6  ;;  %4432 = vmatmul.f32.gmra.mxu1 %v8832_v54  ;;  %v9188_v54 = vpop.f32.mrf.mxu1  ;;  %v4279_v7 = vpop.f32.mrf.mxu0 }
 0x634   : > { %4527 = vrot.lane.b32.xlu2 %v4481_v31, %s5186_s22  ;;  %s5105_s22 = scalar_lea.hbm %s5104_s3, 128 }
 0x635   : > { %p5106_p0 = scmp.ne.s32.totalorder %s5104_s3, %s5105_s22  ;;  %p5111_p5 = scmp.lt.s32.totalorder %s5109_s16, %s5105_s22 }
 0x637   : > { %p5107_p1 = pnand %p5106_p0, %p5310_p3  ;;  %p5112_p6 = por %p5111_p5, %p5110_p4 }
 0x638   : > { %4373 = vmatmul.f32.gmra.mxu3 %v9042_v3  ;;  %v3884_v3 = vadd.f32 %v9014_v25, %v9798_v13  ;;  %v9808_v13 = vld [vmem:[#allocation88_spill] sm:$0xff] }
 0x639   : > { %p5108_p2 = pneg %p5107_p1 }
 0x63b   : > { %4435 = vmatmul.f32.gmra.mxu1 %v8855_v48  ;;  %v3949_v48 = vadd.f32 %v8867_v21, %v3884_v3  ;;  %v4282_v55 = vpop.f32.mrf.mxu0  ;;  %p5113_p7 = pnand %p5112_p6, %p5108_p2 }
 0x63d   : > { %v4014_v17 = vadd.f32 %v8872_v26, %v3949_v48 }
 0x63f   : > { %v4079_v52 = vadd.f32 %v9800_v42, %v4014_v17  ;;  %v9809_v17 = vld [vmem:[#allocation29_spill] sm:$0xff] }
 0x640   : > { %4376 = vmatmul.f32.gmra.mxu3 %v9061_v33  ;;  %v4214_v33 = vpop.f32.mrf.mxu2  ;;  %v4500_v28 = vpop.permute.xlu0 %4499 }
 0x641   : > { %v4144_v26 = vadd.f32 %v8880_v30, %v4079_v52  ;;  %v9810_v52 = vld [vmem:[#allocation26_spill] sm:$0xff] }
 0x643   : > { %4438 = vmatmul.f32.gmra.mxu1 %v9126_v10  ;;  %v9799_v10 = vld [vmem:[#allocation30_spill] sm:$0xff]  ;;  %v4209_v44 = vadd.f32 %v4208_v57, %v4144_v26 }
 0x644   : > { %v3887_v34 = vadd.f32 %v9014_v25, %v9799_v10 }
 0x645   : > { %v4274_v30 = vadd.f32 %v4273_v58, %v4209_v44  ;;  %v9807_v58 = vld [vmem:[#allocation32_spill] sm:$0xff]  ;;  %v9812_v44 = vld [vmem:[#allocation86_spill] sm:$0xff] }
 0x646   : > { %v3952_v4 = vadd.f32 %v8893_v1, %v3887_v34  ;;  %v9802_v1 = vld [vmem:[#allocation87_spill] sm:$0xff] }
 0x648   : > { %4379 = vmatmul.f32.gmra.mxu3 %v3706_v36  ;;  %v4217_v24 = vpop.f32.mrf.mxu2  ;;  %v4017_v62 = vadd.f32 %v8898_v47, %v3952_v4  ;;  %v3955_v36 = vadd.f32 %v8912_v46, %v3890_v38  ;;  %v9803_v47 = vld [vmem:[#allocation24_spill] sm:$0xff]  ;;  %v4548_v46 = vsel %vm4547_vm6, 0.0, %v4500_v28 }
 0x649   : > { %v9815_v28 = vld [vmem:[#allocation84_spill] sm:$0xff] }
 0x64a   : > { %v4082_v6 = vadd.f32 %v9802_v1, %v4017_v62  ;;  %v9813_v1 = vld [vmem:[#allocation56_spill] sm:$0xff] }
 0x64b   : > { %4441 = vmatmul.f32.gmra.mxu1 %v3699_v22 }
 0x64c   : > { %v4147_v22 = vadd.f32 %v9803_v47, %v4082_v6 }
 0x64e   : > { %v4212_v63 = vadd.f32 %v4211_v40, %v4147_v22 }
 0x650   : > { %v4185_v37 = vpop.f32.mrf.mxu1  ;;  %4382 = vmatmul.f32.gmra.mxu3 %v3708_v20  ;;  %v4220_v53 = vpop.f32.mrf.mxu2  ;;  %v4277_v57 = vadd.f32 %v4276_v5, %v4212_v63  ;;  %v4549_v5 = vsel %vm4547_vm6, 0.0, %v4502_v29  ;;  %v9820_v29 = vld [vmem:[#allocation12_spill] sm:$0xff] }
 0x651   : > { %v9198_v18 = vadd.f32 %v4185_v37, %v4121_v19  ;;  %v4285_v19 = vpop.f32.mrf.mxu0  ;;  %v3896_v37 = vadd.f32 %v9014_v25, %v9809_v17 }
 0x653   : > { %v4123_v60 = vpop.f32.mrf.mxu3  ;;  %4444 = vmatmul.f32.gmra.mxu1 %v9150_v8  ;;  %v4020_v8 = vadd.f32 %v8914_v49, %v3955_v36 }
 0x654   : > { %v4124_v21 = vadd.f32 %v4123_v60, %v4059_v12  ;;  %v3893_v12 = vadd.f32 %v9014_v25, %v9804_v45  ;;  %v9811_v60 = vld [vmem:[#allocation33_spill] sm:$0xff] }
 0x656   : > { %v3958_v2 = vadd.f32 %v9806_v9, %v3893_v12 }
 0x658   : > { %v4188_v51 = vpop.f32.mrf.mxu1  ;;  %v4023_v3 = vadd.f32 %v9808_v13, %v3958_v2  ;;  %v4223_v42 = vpop.f32.mrf.mxu2  ;;  %v9818_v2 = vld [vmem:[#allocation68_spill] sm:$0xff] }
 0x659   : > { %v9207_v32 = vadd.f32 %v4188_v51, %v4124_v21  ;;  %v3961_v21 = vadd.f32 %v9811_v60, %v3896_v37  ;;  %v4288_v38 = vpop.f32.mrf.mxu0 }
 0x65a   : > { %v4088_v4 = vadd.f32 %v9810_v52, %v4023_v3 }
 0x65b   : > { %v4338_v20 = vpop.f32.mrf.mxu3  ;;  %4447 = vmatmul.f32.gmra.mxu1 %v9145_v15  ;;  %v9805_v15 = vld [vmem:[#allocation31_spill] sm:$0xff]  ;;  %v4026_v6 = vadd.f32 %v9813_v1, %v3961_v21 }
 0x65c   : > { %v4339_v50 = vadd.f32 %v4338_v20, %v4274_v30  ;;  %v4085_v27 = vadd.f32 %v9805_v15, %v4020_v8  ;;  %v4153_v31 = vadd.f32 %v9812_v44, %v4088_v4  ;;  %v9814_v30 = vld [vmem:[#allocation82_spill] sm:$0xff]  ;;  %v9823_v21 = vld [vmem:[#allocation91_spill] sm:$0xff] }
 0x65d   : > { %v3899_v47 = vadd.f32 %v9014_v25, %v9814_v30  ;;  %v9822_v4 = vld [vmem:[#allocation34_spill] sm:$0xff] }
 0x65e   : > { %v4150_v56 = vadd.f32 %v9807_v58, %v4085_v27  ;;  %v4218_v22 = vadd.f32 %v4217_v24, %v4153_v31  ;;  %v9817_v27 = vld [vmem:[#allocation90_spill] sm:$0xff]  ;;  %v9819_v58 = vld [vmem:[#allocation81_spill] sm:$0xff] }
 0x660   : > { %v4403_v0 = vpop.f32.mrf.mxu1  ;;  %v4215_v10 = vadd.f32 %v4214_v33, %v4150_v56  ;;  %v4504_v33 = vpop.permute.xlu2 %4503  ;;  %v3902_v56 = vadd.f32 %v9014_v25, %v9819_v58  ;;  %v9830_v58 = vld [vmem:[#allocation93_spill] sm:$0xff] }
 0x661   : > { %v4404_v39 = vadd.f32 %v4403_v0, %v4339_v50  ;;  %v4550_v50 = vsel %vm4547_vm6, 0.0, %v4504_v33  ;;  %v9816_v0 = vld [vmem:[#allocation89_spill] sm:$0xff]  ;;  %v4291_v24 = vpop.f32.mrf.mxu0 }
 0x662   : > { %v4280_v51 = vadd.f32 %v4279_v7, %v4215_v10  ;;  %v4091_v7 = vadd.f32 %v9815_v28, %v4026_v6  ;;  %v3964_v45 = vadd.f32 %v9816_v0, %v3899_v47  ;;  %v9827_v28 = vld [vmem:[#allocation35_spill] sm:$0xff]  ;;  %v9828_v0 = vld [vmem:[#allocation94_spill] sm:$0xff] }
 0x663   : > { %v4451_v23 = vmax.f32 %v4404_v39, 0.0  ;;  %v4341_v49 = vpop.f32.mrf.mxu3  ;;  %v4226_v39 = vpop.f32.mrf.mxu2 }
 0x664   : > { %v4342_v40 = vadd.f32 %v4341_v49, %v4277_v57  ;;  %v4156_v9 = vadd.f32 %v9817_v27, %v4091_v7  ;;  %v4506_v57 = vpop.permute.xlu0 %4505 }
 0x665   : > { %v4564_v35 = vadd.f32 %v4548_v46, %v4451_v23  ;;  %v4283_v46 = vadd.f32 %v4282_v55, %v4218_v22  ;;  %v4029_v23 = vadd.f32 %v9818_v2, %v3964_v45 }
 0x666   : > { %v4221_v13 = vadd.f32 %v4220_v53, %v4156_v9  ;;  %v4508_v53 = vpop.permute.xlu1 %4507  ;;  %v9829_v9 = vld [vmem:[#allocation14_spill] sm:$0xff] }
 0x667   : > { %4580 = vst [vmem:[%s9226_s23] sm:$0xff] %v4564_v35  ;;  %v4094_v55 = vadd.f32 %v9820_v29, %v4029_v23 }
 0x668   : > { %v4406_v48 = vpop.f32.mrf.mxu1 }
 0x669   : > { %v4407_v34 = vadd.f32 %v4406_v48, %v4342_v40  ;;  %v4551_v40 = vsel %vm4547_vm6, 0.0, %v4506_v57  ;;  %v9821_v48 = vld [vmem:[#allocation92_spill] sm:$0xff]  ;;  %v4159_v60 = vadd.f32 %v9822_v4, %v4094_v55  ;;  %v4294_v6 = vpop.f32.mrf.mxu0 }
 0x66a   : > { %v3967_v17 = vadd.f32 %v9821_v48, %v3902_v56 }
 0x66b   : > { %v4452_v26 = vmax.f32 %v4407_v34, 0.0  ;;  %v4344_v62 = vpop.f32.mrf.mxu3  ;;  %v4286_v34 = vadd.f32 %v4285_v19, %v4221_v13  ;;  %v4229_v52 = vpop.f32.mrf.mxu2  ;;  %v4224_v31 = vadd.f32 %v4223_v42, %v4159_v60  ;;  %v9825_v19 = vld [vmem:[#allocation25_spill] sm:$0xff] }
 0x66c   : > { %v4345_v36 = vadd.f32 %v4344_v62, %v4280_v51  ;;  %v4510_v42 = vpop.permute.xlu2 %4509 }
 0x66d   : > { %v4565_v59 = vadd.f32 %v4549_v5, %v4452_v26  ;;  %v4032_v26 = vadd.f32 %v9823_v21, %v3967_v17  ;;  %v4553_v27 = vsel %vm4547_vm6, 0.0, %v4510_v42 }
 0x66f   : > { %4581 = vst [vmem:[%s9226_s23 + $0x8] sm:$0xff] %v4565_v59  ;;  %v9824_v59 = vld [vmem:[#allocation85_spill] sm:$0xff]  ;;  %v4097_v33 = vadd.f32 %v9825_v19, %v4032_v26 }
 0x670   : > { %v4409_v20 = vpop.f32.mrf.mxu1  ;;  %v3905_v44 = vadd.f32 %v9014_v25, %v9824_v59 }
 0x671   : > { %v4410_v8 = vadd.f32 %v4409_v20, %v4345_v36  ;;  %v4552_v36 = vsel %vm4547_vm6, 0.0, %v4508_v53  ;;  %v9826_v20 = vld [vmem:[#allocation72_spill] sm:$0xff]  ;;  %v4162_v7 = vadd.f32 %v9827_v28, %v4097_v33 }
 0x672   : > { %v3970_v30 = vadd.f32 %v9826_v20, %v3905_v44 }
 0x673   : > { %v4453_v12 = vmax.f32 %v4410_v8, 0.0  ;;  %v4347_v63 = vpop.f32.mrf.mxu3  ;;  %v4289_v8 = vadd.f32 %v4288_v38, %v4224_v31  ;;  %v4297_v38 = vpop.f32.mrf.mxu0 }
 0x674   : > { %v4348_v49 = vadd.f32 %v4347_v63, %v4283_v46  ;;  %v4035_v45 = vadd.f32 %v9828_v0, %v3970_v30  ;;  %v4227_v46 = vadd.f32 %v4226_v39, %v4162_v7 }
 0x675   : > { %v4566_v15 = vadd.f32 %v4550_v50, %v4453_v12  ;;  %v4232_v12 = vpop.f32.mrf.mxu2 }
 0x676   : > { %v4100_v2 = vadd.f32 %v9829_v9, %v4035_v45  ;;  %v4292_v57 = vadd.f32 %v4291_v24, %v4227_v46  ;;  %v4233_v21 = vadd.f32 %v4232_v12, %v9055_v16 }
 0x677   : > { %4582 = vst [vmem:[%s9226_s23 + $0x10] sm:$0xff] %v4566_v15  ;;  %v4514_v4 = vpop.permute.xlu1 %4513 }
 0x678   : > { %v4412_v35 = vpop.f32.mrf.mxu1  ;;  %v4165_v56 = vadd.f32 %v9830_v58, %v4100_v2  ;;  %v4298_v59 = vadd.f32 %v4297_v38, %v4233_v21 }
 0x679   : > { %v4413_v3 = vadd.f32 %v4412_v35, %v4348_v49 }
 0x67a   : > { %v4230_v29 = vadd.f32 %v4229_v52, %v4165_v56 }
 0x67b   : > { %v4454_v37 = vmax.f32 %v4413_v3, 0.0  ;;  %v4350_v10 = vpop.f32.mrf.mxu3  ;;  %v4512_v3 = vpop.permute.xlu0 %4511 }
 0x67c   : > { %v4351_v62 = vadd.f32 %v4350_v10, %v4286_v34  ;;  %v4554_v48 = vsel %vm4547_vm6, 0.0, %v4512_v3  ;;  %v4295_v10 = vadd.f32 %v4294_v6, %v4230_v29 }
 0x67d   : > { %v4567_v5 = vadd.f32 %v4551_v40, %v4454_v37  ;;  %v4235_v39 = vpop.f32.mrf.mxu2 }
 0x67e   : > { %v4236_v19 = vadd.f32 %v4235_v39, %v9068_v14 }
 0x67f   : > { %4583 = vst [vmem:[%s9226_s23 + $0x18] sm:$0xff] %v4567_v5  ;;  %v4300_v5 = vpop.f32.mrf.mxu0 }
 0x680   : > { %v4415_v51 = vpop.f32.mrf.mxu1 }
 0x681   : > { %v4416_v1 = vadd.f32 %v4415_v51, %v4351_v62  ;;  %v4555_v62 = vsel %vm4547_vm6, 0.0, %v4514_v4 }
 0x683   : > { %v4455_v47 = vmax.f32 %v4416_v1, 0.0  ;;  %v4353_v22 = vpop.f32.mrf.mxu3  ;;  %v4516_v1 = vpop.permute.xlu2 %4515 }
 0x684   : > { %v4354_v25 = vadd.f32 %v4353_v22, %v4289_v8  ;;  %v4556_v20 = vsel %vm4547_vm6, 0.0, %v4516_v1  ;;  %v4518_v28 = vpop.permute.xlu0 %4517 }
 0x685   : > { %v4568_v50 = vadd.f32 %v4552_v36, %v4455_v47  ;;  %v4238_v51 = vpop.f32.mrf.mxu2  ;;  %v4301_v47 = vadd.f32 %v4300_v5, %v4236_v19  ;;  %v4557_v42 = vsel %vm4547_vm6, 0.0, %v4518_v28  ;;  %v4183_v5 = vadd.f32 %v9188_v54, %v9130_v41 }
 0x686   : > { %v4239_v0 = vadd.f32 %v4238_v51, %v9082_v43 }
 0x687   : > { %4584 = vst [vmem:[%s9226_s23 + $0x20] sm:$0xff] %v4568_v50  ;;  %v4303_v6 = vpop.f32.mrf.mxu0 }
 0x688   : > { %v4418_v63 = vpop.f32.mrf.mxu1 }
 0x689   : > { %v4419_v15 = vadd.f32 %v4418_v63, %v4354_v25  ;;  %v4304_v63 = vadd.f32 %v4303_v6, %v4239_v0 }
 0x68b   : > { %v4456_v23 = vmax.f32 %v4419_v15, 0.0  ;;  %v4356_v49 = vpop.f32.mrf.mxu3  ;;  %v4522_v3 = vpop.permute.xlu2 %4521 }
 0x68c   : > { %v4357_v13 = vadd.f32 %v4356_v49, %v4292_v57  ;;  %v4524_v4 = vpop.permute.xlu0 %4523 }
 0x68d   : > { %v4569_v35 = vadd.f32 %v4553_v27, %v4456_v23  ;;  %v4241_v8 = vpop.f32.mrf.mxu2  ;;  %v4520_v27 = vpop.permute.xlu1 %4519 }
 0x68e   : > { %v4242_v23 = vadd.f32 %v4241_v8, %v9098_v11  ;;  %v4558_v38 = vsel %vm4547_vm6, 0.0, %v4520_v27 }
 0x68f   : > { %4585 = vst [vmem:[%s9226_s23 + $0x28] sm:$0xff] %v4569_v35  ;;  %v4306_v25 = vpop.f32.mrf.mxu0 }
 0x690   : > { %v4421_v40 = vpop.f32.mrf.mxu1  ;;  %v4307_v58 = vadd.f32 %v4306_v25, %v4242_v23 }
 0x691   : > { %v4422_v55 = vadd.f32 %v4421_v40, %v4357_v13 }
 0x693   : > { %v4457_v17 = vmax.f32 %v4422_v55, 0.0  ;;  %v4359_v37 = vpop.f32.mrf.mxu3 }
 0x694   : > { %v4360_v24 = vadd.f32 %v4359_v37, %v4295_v10 }
 0x695   : > { %v4570_v34 = vadd.f32 %v4554_v48, %v4457_v17  ;;  %v4244_v9 = vpop.f32.mrf.mxu2  ;;  %v4559_v48 = vsel %vm4547_vm6, 0.0, %v4522_v3 }
 0x696   : > { %v4245_v29 = vadd.f32 %v4244_v9, %v9115_v61  ;;  %v4560_v61 = vsel %vm4547_vm6, 0.0, %v4524_v4 }
 0x697   : > { %4586 = vst [vmem:[%s9226_s23 + $0x30] sm:$0xff] %v4570_v34  ;;  %v4309_v35 = vpop.f32.mrf.mxu0 }
 0x698   : > { %v4424_v60 = vpop.f32.mrf.mxu1  ;;  %v4310_v37 = vadd.f32 %v4309_v35, %v4245_v29 }
 0x699   : > { %v4425_v26 = vadd.f32 %v4424_v60, %v4360_v24 }
 0x69b   : > { %v4458_v52 = vmax.f32 %v4425_v26, 0.0  ;;  %v4362_v53 = vpop.f32.mrf.mxu3 }
 0x69c   : > { %v4363_v31 = vadd.f32 %v4362_v53, %v4298_v59 }
 0x69d   : > { %v4571_v44 = vadd.f32 %v4555_v62, %v4458_v52  ;;  %v4247_v39 = vpop.f32.mrf.mxu2 }
 0x69e   : > { %v4248_v21 = vadd.f32 %v4247_v39, %v4183_v5 }
 0x69f   : > { %4587 = vst [vmem:[%s9226_s23 + $0x38] sm:$0xff] %v4571_v44  ;;  %v4312_v34 = vpop.f32.mrf.mxu0 }
 0x6a0   : > { %v4427_v36 = vpop.f32.mrf.mxu1  ;;  %v4313_v51 = vadd.f32 %v4312_v34, %v4248_v21 }
 0x6a1   : > { %v4428_v33 = vadd.f32 %v4427_v36, %v4363_v31  ;;  %v4526_v31 = vpop.permute.xlu1 %4525 }
 0x6a2   : > { %v4561_v36 = vsel %vm4547_vm6, 0.0, %v4526_v31 }
 0x6a3   : > { %v4459_v16 = vmax.f32 %v4428_v33, 0.0  ;;  %v4365_v30 = vpop.f32.mrf.mxu3 }
 0x6a4   : > { %v4366_v50 = vadd.f32 %v4365_v30, %v4301_v47 }
 0x6a5   : > { %v4572_v22 = vadd.f32 %v4556_v20, %v4459_v16  ;;  %v4250_v53 = vpop.f32.mrf.mxu2 }
 0x6a6   : > { %v4251_v1 = vadd.f32 %v4250_v53, %v9198_v18 }
 0x6a7   : > { %4588 = vst [vmem:[%s9226_s23 + $0x40] sm:$0xff] %v4572_v22  ;;  %v4315_v41 = vpop.f32.mrf.mxu0  ;;  %v4528_v22 = vpop.permute.xlu2 %4527 }
 0x6a8   : > { %v4430_v7 = vpop.f32.mrf.mxu1  ;;  %v4316_v20 = vadd.f32 %v4315_v41, %v4251_v1 }
 0x6a9   : > { %v4431_v45 = vadd.f32 %v4430_v7, %v4366_v50  ;;  %v4562_v7 = vsel %vm4547_vm6, 0.0, %v4528_v22 }
 0x6ab   : > { %v4460_v14 = vmax.f32 %v4431_v45, 0.0  ;;  %v4368_v12 = vpop.f32.mrf.mxu3 }
 0x6ac   : > { %v4369_v15 = vadd.f32 %v4368_v12, %v4304_v63  ;;  %v4530_v12 = vpop.permute.xlu0 %4529 }
 0x6ad   : > { %v4573_v46 = vadd.f32 %v4557_v42, %v4460_v14  ;;  %v4253_v30 = vpop.f32.mrf.mxu2 }
 0x6ae   : > { %v4254_v50 = vadd.f32 %v4253_v30, %v9207_v32 }
 0x6af   : > { %4589 = vst [vmem:[%s9226_s23 + $0x48] sm:$0xff] %v4573_v46  ;;  %v4318_v28 = vpop.f32.mrf.mxu0  ;;  %v4563_v46 = vsel %vm4547_vm6, 0.0, %v4530_v12 }
 0x6b0   : > { %v4433_v2 = vpop.f32.mrf.mxu1  ;;  %v4319_v25 = vadd.f32 %v4318_v28, %v4254_v50 }
 0x6b1   : > { %v4434_v49 = vadd.f32 %v4433_v2, %v4369_v15 }
 0x6b3   : > { %v4461_v43 = vmax.f32 %v4434_v49, 0.0  ;;  %v4371_v57 = vpop.f32.mrf.mxu3 }
 0x6b4   : > { %v4372_v13 = vadd.f32 %v4371_v57, %v4307_v58 }
 0x6b5   : > { %v4574_v56 = vadd.f32 %v4558_v38, %v4461_v43 }
 0x6b7   : > { %4590 = vst [vmem:[%s9226_s23 + $0x50] sm:$0xff] %v4574_v56 }
 0x6b8   : > { %v4436_v40 = vpop.f32.mrf.mxu1 }
 0x6b9   : > { %v4437_v55 = vadd.f32 %v4436_v40, %v4372_v13 }
 0x6bb   : > { %v4462_v11 = vmax.f32 %v4437_v55, 0.0  ;;  %v4374_v17 = vpop.f32.mrf.mxu3 }
 0x6bc   : > { %v4375_v24 = vadd.f32 %v4374_v17, %v4310_v37 }
 0x6bd   : > { %v4575_v10 = vadd.f32 %v4559_v48, %v4462_v11 }
 0x6bf   : > { %4591 = vst [vmem:[%s9226_s23 + $0x58] sm:$0xff] %v4575_v10 }
 0x6c0   : > { %v4439_v60 = vpop.f32.mrf.mxu1 }
 0x6c1   : > { %v4440_v26 = vadd.f32 %v4439_v60, %v4375_v24 }
 0x6c3   : > { %v4463_v62 = vmax.f32 %v4440_v26, 0.0  ;;  %v4377_v52 = vpop.f32.mrf.mxu3 }
 0x6c4   : > { %v4378_v44 = vadd.f32 %v4377_v52, %v4313_v51 }
 0x6c5   : > { %v4576_v59 = vadd.f32 %v4560_v61, %v4463_v62 }
 0x6c7   : > { %4592 = vst [vmem:[%s9226_s23 + $0x60] sm:$0xff] %v4576_v59 }
 0x6c8   : > { %v4442_v54 = vpop.f32.mrf.mxu1 }
 0x6c9   : > { %v4443_v6 = vadd.f32 %v4442_v54, %v4378_v44 }
 0x6cb   : > { %v4464_v19 = vmax.f32 %v4443_v6, 0.0  ;;  %v4380_v33 = vpop.f32.mrf.mxu3 }
 0x6cc   : > { %v4381_v47 = vadd.f32 %v4380_v33, %v4316_v20 }
 0x6cd   : > { %v4577_v16 = vadd.f32 %v4561_v36, %v4464_v19 }
 0x6cf   : > { %4593 = vst [vmem:[%s9226_s23 + $0x68] sm:$0xff] %v4577_v16 }
 0x6d0   : > { %v4445_v8 = vpop.f32.mrf.mxu1 }
 0x6d1   : > { %v4446_v18 = vadd.f32 %v4445_v8, %v4381_v47 }
 0x6d3   : > { %v4465_v0 = vmax.f32 %v4446_v18, 0.0  ;;  %v4383_v45 = vpop.f32.mrf.mxu3 }
 0x6d4   : > { %v4384_v14 = vadd.f32 %v4383_v45, %v4319_v25 }
 0x6d5   : > { %v4578_v42 = vadd.f32 %v4562_v7, %v4465_v0 }
 0x6d7   : > { %4594 = vst [vmem:[%s9226_s23 + $0x70] sm:$0xff] %v4578_v42 }
 0x6d8   : > { %v4448_v32 = vpop.f32.mrf.mxu1 }
 0x6d9   : > { %v4449_v63 = vadd.f32 %v4448_v32, %v4384_v14 }
 0x6db   : > { %v4466_v15 = vmax.f32 %v4449_v63, 0.0 }
 0x6dd   : > { %v4579_v27 = vadd.f32 %v4563_v46, %v4466_v15 }
 0x6df   : > { %4595 = vst [vmem:[%s9226_s23 + $0x78] sm:$0xff] %v4579_v27 }
 0x6e0   : > { %5116 = shalt.err (!%p5113_p7)
}
 0x6e1   : > { %s5187_s30 = smov 128   ;;  %s5188_s23 = smov 8  }
 0x6e2   : > { %4924 = dma.vmem_to_hbm [thread:$0]  (%p5310_p3), %s4613_s1, 2048, %s4615_s24, %s4597_s14, %s5187_s30, %s5187_s30, %s5188_s23  }
 0x6e3 PF: > { %s9831_s28 = sld [smem:[#allocation5_spill]]  ;;  %p4930_p9 = scmp.ge.s32.totalorder %s5183_s15, 2 }
 0x6e5   : > { %p4927_p10 = pnand %p4930_p9, %p5319_p8 }
 0x6e7   : > { %p4928_p11 = pneg %p4927_p10 }
 0x6e9   : > { %s4629_s0 = sand.u32 1, %s9831_s28  }
 0x6ea   : > { %s4630_s17 = scalar_lea.sflag [#allocation3], %s4629_s0 }
 0x6eb   : > { %5150 = dma.done.wait (%p4928_p11), %s4630_s17, 2048  }
 0x6ec   : > { %5152 = vsyncadd (%p4928_p11), %s4630_s17, 4294965248  ;;  %s26_s15 = sadd.s32 1, %s5183_s15   ;;  %s9833_s28 = sld [smem:[#allocation6_spill]] }
 0x6ed   : > { %p23_p12 = scmp.ge.s32.totalorder %s26_s15, 6   ;;  %s9834_s29 = sld [smem:[#allocation7_spill]] }
 0x6ee   : > { %s9835_s30 = sld [smem:[#allocation8_spill]]  ;;  %s9837_s25 = smov %s5159_s26 }
 0x6ef   : > { %s9836_s14 = sld [smem:[#allocation9_spill]]  ;;  %s9838_s26 = smov %s5163_s27 }
 0x6f0   : > { %s9839_s27 = smov %s5328_s18  ;;  %25 = sbr.rel (!%p23_p12) target bundleno = 9 (0x9), region = 115 }
 0x6f5   :  { %4636 = vsyncpa [#allocation3], 1 }
 0x6f6   :  { %4638 = vsyncpa [#allocation3 + $0x1], 1 }

</bundles_post_ra>
